<compile_context>
chip_gen: v7x
topology: tpu7x:2x2x1
jax: 0.10.0
libtpu: 0.0.40
codegen_flags: <defaults>
</compile_context>

<pallas_src>
import functools

import jax
import jax.numpy as jnp
from jax import lax
from jax.experimental import pallas as pl
from jax.experimental.pallas import tpu as pltpu

NUM_HEADS = 3
OUT_PAD = 128          # lane-dense packed output row: [pred(2P) | alpha,beta | 0]
EPS = 1e-12


def _round_up(x, m):
    return ((x + m - 1) // m) * m


def _sq_dot(a, b):
    # a @ b.T by contracting the last dim of both (no transpose materialized)
    return lax.dot_general(a, b, (((1,), (1,)), ((), ())),
                           preferred_element_type=jnp.float32)


def _row_softmax(s):
    # exact softmax (keep normalization exact for reference parity)
    m = jnp.max(s, axis=-1, keepdims=True)
    e = jnp.exp(s - m)
    return e / jnp.sum(e, axis=-1, keepdims=True)


# ---------------------------------------------------------------------------
# Single fused kernel: GAT front-end + GRU recurrence + heads + SIR rollout
# ---------------------------------------------------------------------------
def _gat_fused_kernel(h_ref, scal_ref, hx0_ref,
                      w1_ref, w2_ref, wih_ref, bih_ref,
                      writ_ref, brh_ref, whh_ref, bhh_ref, wrhx_ref,
                      out_ref, phy_ref, hx_sc,
                      *, num_heads, h1, gru_dim, pred_horizon):
    tb = h_ref.shape[0]
    G = gru_dim
    P = pred_horizon

    scal = scal_ref[...]                       # (tb, 8) = [It, Rt, I, R, S, N, 0, 0]
    w1 = w1_ref[...]                           # (din, NH*H1)
    w2 = w2_ref[...]                           # (NH*H1, H2)

    # ---------------- hx-independent GAT front-end (unrolled over Tb) -------
    xs = []
    for tt in range(tb):
        iz = h_ref[tt]                                             # (L, din)
        inv = lax.rsqrt(jnp.sum(iz * iz, axis=1, keepdims=True) + EPS)
        izn = iz * inv
        cosm = _sq_dot(izn, izn)                                   # (L, L)
        c2 = cosm * cosm
        ih = jnp.dot(c2 * c2, iz, preferred_element_type=jnp.float32)  # cos^4 mix

        # layer1: all heads in one 2-D matmul; per-head attention on lane slices
        zh = jnp.dot(ih, w1, preferred_element_type=jnp.float32)   # (L, NH*H1)
        heads = []
        for hd in range(num_heads):
            zh_h = zh[:, hd * h1:(hd + 1) * h1]                    # (L, H1)
            a = _row_softmax(_sq_dot(zh_h, zh_h))                  # (L, L)
            heads.append(jnp.dot(a, zh_h, preferred_element_type=jnp.float32))
        oh = jnp.maximum(jnp.concatenate(heads, axis=1), 0.0)      # relu(concat)

        # layer2 (single head) + relu + max-pool over nodes
        z2 = jnp.dot(oh, w2, preferred_element_type=jnp.float32)   # (L, H2)
        a2 = _row_softmax(_sq_dot(z2, z2))
        o2 = jnp.maximum(jnp.dot(a2, z2, preferred_element_type=jnp.float32), 0.0)
        xs.append(jnp.max(o2, axis=0, keepdims=True))              # (1, H2)
    x_blk = jnp.concatenate(xs, axis=0)                            # (tb, H2)

    # hoisted GRU input projection (M=tb matmul) and [It,Rt] output-head bias
    gx_blk = (jnp.dot(x_blk, wih_ref[...], preferred_element_type=jnp.float32)
              + bih_ref[...])                                      # (tb, 3G)
    hb_blk = (jnp.dot(scal[:, 0:2], writ_ref[...],
                      preferred_element_type=jnp.float32)
              + brh_ref[...])                                      # (tb, OUT_PAD)

    # ---------------- serial GRU recurrence + packed output heads -----------
    @pl.when(pl.program_id(0) == 0)
    def _():
        hx_sc[...] = hx0_ref[...]

    whh = whh_ref[...]
    bhh = bhh_ref[...]
    wrhx = wrhx_ref[...]
    hx = hx_sc[...]                                                # (1, G)
    rows = []
    for tt in range(tb):
        gx = gx_blk[tt:tt + 1, :]
        gh = jnp.dot(hx, whh, preferred_element_type=jnp.float32) + bhh
        r = jax.nn.sigmoid(gx[:, 0:G] + gh[:, 0:G])
        zg = jax.nn.sigmoid(gx[:, G:2 * G] + gh[:, G:2 * G])
        ng = jnp.tanh(gx[:, 2 * G:3 * G] + r * gh[:, 2 * G:3 * G])
        hx = (1.0 - zg) * ng + zg * hx
        rows.append(jnp.dot(hx, wrhx, preferred_element_type=jnp.float32)
                    + hb_blk[tt:tt + 1, :])                        # (1, OUT_PAD)
    hx_sc[...] = hx
    out_blk = jnp.concatenate(rows, axis=0)                        # (tb, OUT_PAD)
    out_ref[...] = out_blk                                         # one dense store

    # ---------------- SIR physics rollout, vectorized over Tb ----------------
    alpha = jax.nn.sigmoid(out_blk[:, 2 * P:2 * P + 1])            # (tb, 1)
    beta = jax.nn.sigmoid(out_blk[:, 2 * P + 1:2 * P + 2])         # (tb, 1)
    last_i = scal[:, 2:3]
    last_r = scal[:, 3:4]
    last_s = scal[:, 4:5]
    n_col = scal[:, 5:6]
    d_i = jnp.zeros_like(last_i)
    d_r = jnp.zeros_like(last_i)
    cols_i, cols_r = [], []
    for i in range(P):
        if i > 0:
            last_i = last_i + d_i
            last_r = last_r + d_r
            last_s = n_col - last_i - last_r
        d_i = alpha * last_i * (last_s / n_col) - beta * last_i
        d_r = beta * last_i
        cols_i.append(d_i)
        cols_r.append(d_r)
    phy = jnp.concatenate(cols_i + cols_r, axis=1)                 # (tb, 2P)
    pad_w = phy_ref.shape[1] - 2 * P
    if pad_w > 0:
        phy = jnp.concatenate([phy, jnp.zeros((tb, pad_w), jnp.float32)], axis=1)
    phy_ref[...] = phy


# ---------------------------------------------------------------------------
# Params (pre-packed / host-reshaped layouts) and forward wrapper
# ---------------------------------------------------------------------------
def init_params(key, in_dim, h1, h2, gru_dim, pred_horizon):
    ks = jax.random.split(key, 12)

    def w(k, shape, scale=0.1):
        return scale * jax.random.normal(k, shape, jnp.float32)

    G, P = gru_dim, pred_horizon
    assert 2 * P + 2 <= OUT_PAD

    wr1a = w(ks[6], (G, 2 * P))     # nn_res1 on hx part
    wr1b = w(ks[7], (2, 2 * P))     # nn_res1 on [It, Rt] part
    br1 = w(ks[8], (1, 2 * P))
    wr2a = w(ks[9], (G, 2))         # nn_res2 on hx part
    wr2b = w(ks[10], (2, 2))        # nn_res2 on [It, Rt] part
    br2 = w(ks[11], (1, 2))

    def pack(a, b):                 # [a | b | zero-pad] -> lane-dense OUT_PAD cols
        cat = jnp.concatenate([a, b], axis=1)
        return jnp.pad(cat, ((0, 0), (0, OUT_PAD - cat.shape[1])))

    return dict(
        w1=w(ks[0], (in_dim, NUM_HEADS * h1)),       # layer1 fc, heads fused (pre-T)
        w2=w(ks[1], (NUM_HEADS * h1, h2)),           # layer2 fc on concat(heads)
        wih=w(ks[2], (h2, 3 * G)),                   # fused GRU input weights (r|z|n)
        whh=w(ks[3], (G, 3 * G)),                    # fused GRU hidden weights
        bih=w(ks[4], (1, 3 * G)),
        bhh=w(ks[5], (1, 3 * G)),
        wrhx=pack(wr1a, wr2a),                       # (G, 128)
        writ=pack(wr1b, wr2b),                       # (2, 128)
        brh=pack(br1, br2),                          # (1, 128)
    )


def gat_forward(h_seq, N, I, R, S, It, Rt, hx0, params, *,
                pred_horizon, gru_dim, block_t=8):
    T, L, din = h_seq.shape
    P = pred_horizon
    G = gru_dim
    h1 = params["w1"].shape[1] // NUM_HEADS
    assert 2 * P + 2 <= OUT_PAD

    tb = block_t
    t_pad = _round_up(T, tb)
    nb = t_pad // tb
    phy_w = max(_round_up(2 * P, 128), 128)

    n_scalar = jnp.squeeze(jnp.asarray(N, jnp.float32))
    zeros_t = jnp.zeros((T,), jnp.float32)
    scal = jnp.stack([It, Rt, I, R, S,
                      jnp.broadcast_to(n_scalar, (T,)), zeros_t, zeros_t],
                     axis=1).astype(jnp.float32)                     # (T, 8)

    # pad T up to a Tb multiple (padded rows produce garbage that is sliced off;
    # they run after all real steps so the carried hx of real steps is unaffected)
    h_p = jnp.pad(h_seq.astype(jnp.float32), ((0, t_pad - T), (0, 0), (0, 0)))
    scal_p = jnp.pad(scal, ((0, t_pad - T), (0, 0)), constant_values=1.0)

    kernel = functools.partial(_gat_fused_kernel, num_heads=NUM_HEADS,
                               h1=h1, gru_dim=G, pred_horizon=P)

    def const_spec(a):
        return pl.BlockSpec(a.shape, lambda b: (0,) * a.ndim)   # resident in VMEM

    out, phy = pl.pallas_call(
        kernel,
        out_shape=(jax.ShapeDtypeStruct((t_pad, OUT_PAD), jnp.float32),
                   jax.ShapeDtypeStruct((t_pad, phy_w), jnp.float32)),
        grid=(nb,),
        in_specs=[
            pl.BlockSpec((tb, L, din), lambda b: (b, 0, 0)),
            pl.BlockSpec((tb, 8), lambda b: (b, 0)),
            const_spec(hx0),
            const_spec(params["w1"]), const_spec(params["w2"]),
            const_spec(params["wih"]), const_spec(params["bih"]),
            const_spec(params["writ"]), const_spec(params["brh"]),
            const_spec(params["whh"]), const_spec(params["bhh"]),
            const_spec(params["wrhx"]),
        ],
        out_specs=(pl.BlockSpec((tb, OUT_PAD), lambda b: (b, 0)),
                   pl.BlockSpec((tb, phy_w), lambda b: (b, 0))),
        scratch_shapes=[pltpu.VMEM((1, G), jnp.float32)],           # carried hx
        compiler_params=pltpu.CompilerParams(
            dimension_semantics=("arbitrary",)),     # sequential: hx recurrence
    )(h_p, scal_p, hx0, params["w1"], params["w2"], params["wih"],
      params["bih"], params["writ"], params["brh"], params["whh"],
      params["bhh"], params["wrhx"])

    out = out[:T]
    pred = out[:, :2 * P]
    new_I = pred[:, 0::2]
    new_R = pred[:, 1::2]
    phy = phy[:T]
    phy_I = phy[:, :P].reshape(-1)                    # t-major, matches reference
    phy_R = phy[:, P:2 * P].reshape(-1)
    return jnp.squeeze(new_I), jnp.squeeze(new_R), phy_I, phy_R


if __name__ == "__main__":
    T, L, DIN = 3, 8, 4            # time steps, num_locs (graph nodes), in_dim
    H1, H2 = 8, 16                 # hidden_dim1, hidden_dim2
    GRU_DIM, P = 32, 4             # gru_dim, pred_horizon

    key = jax.random.PRNGKey(0)
    k_h, k_p, k_hx, k_i, k_r, k_it, k_rt = jax.random.split(key, 7)

    h_seq = jax.random.normal(k_h, (T, L, DIN), jnp.float32)
    N = jnp.array([1000.0], jnp.float32)
    I = jax.random.uniform(k_i, (T,), jnp.float32, 1.0, 20.0)
    R = jax.random.uniform(k_r, (T,), jnp.float32, 1.0, 20.0)
    S = jnp.squeeze(N) - I - R
    It = jax.random.uniform(k_it, (T,), jnp.float32)
    Rt = jax.random.uniform(k_rt, (T,), jnp.float32)

    params = init_params(k_p, DIN, H1, H2, GRU_DIM, P)
    # reference draws torch.randn for the initial GRU state; deterministic here
    hx0 = jax.random.normal(k_hx, (1, GRU_DIM), jnp.float32)

    fwd = jax.jit(functools.partial(gat_forward, pred_horizon=P, gru_dim=GRU_DIM))
    new_I, new_R, phy_I, phy_R = fwd(h_seq, N, I, R, S, It, Rt, hx0, params)
    jax.block_until_ready((new_I, new_R, phy_I, phy_R))

    assert new_I.shape == (T, P) and new_R.shape == (T, P)
    assert phy_I.shape == (T * P,) and phy_R.shape == (T * P,)
    assert bool(jnp.all(jnp.isfinite(new_I))) and bool(jnp.all(jnp.isfinite(phy_I)))
    print("KERNEL_OK")
</pallas_src>

<mosaic_0001>
module attributes {stable_mosaic.version = 11 : i64} {
  func.func @_gat_fused_kernel(%arg0: i32, %arg1: memref<8x8x4xf32, #tpu.memory_space<vmem>>, %arg2: memref<8x8xf32, #tpu.memory_space<vmem>>, %arg3: memref<1x32xf32, #tpu.memory_space<vmem>>, %arg4: memref<4x24xf32, #tpu.memory_space<vmem>>, %arg5: memref<24x16xf32, #tpu.memory_space<vmem>>, %arg6: memref<16x96xf32, #tpu.memory_space<vmem>>, %arg7: memref<1x96xf32, #tpu.memory_space<vmem>>, %arg8: memref<2x128xf32, #tpu.memory_space<vmem>>, %arg9: memref<1x128xf32, #tpu.memory_space<vmem>>, %arg10: memref<32x96xf32, #tpu.memory_space<vmem>>, %arg11: memref<1x96xf32, #tpu.memory_space<vmem>>, %arg12: memref<32x128xf32, #tpu.memory_space<vmem>>, %arg13: memref<8x128xf32, #tpu.memory_space<vmem>>, %arg14: memref<8x128xf32, #tpu.memory_space<vmem>>, %arg15: memref<1x32xf32, #tpu.memory_space<vmem>>) attributes {dimension_semantics = [#tpu.dimension_semantics<arbitrary>], iteration_bounds = array<i64: 1>, scalar_prefetch = 0 : i64, scratch_operands = 1 : i64, tpu.core_type = #tpu.core_type<tc>, window_params = [{transform_indices = @transform_0, window_bounds = array<i64: 8, 8, 4>}, {transform_indices = @transform_1, window_bounds = array<i64: 8, 8>}, {pipeline_mode = #tpu.pipeline_mode<synchronous>, transform_indices = @transform_2, window_bounds = array<i64: 1, 32>}, {pipeline_mode = #tpu.pipeline_mode<synchronous>, transform_indices = @transform_3, window_bounds = array<i64: 4, 24>}, {pipeline_mode = #tpu.pipeline_mode<synchronous>, transform_indices = @transform_4, window_bounds = array<i64: 24, 16>}, {pipeline_mode = #tpu.pipeline_mode<synchronous>, transform_indices = @transform_5, window_bounds = array<i64: 16, 96>}, {pipeline_mode = #tpu.pipeline_mode<synchronous>, transform_indices = @transform_6, window_bounds = array<i64: 1, 96>}, {pipeline_mode = #tpu.pipeline_mode<synchronous>, transform_indices = @transform_7, window_bounds = array<i64: 2, 128>}, {pipeline_mode = #tpu.pipeline_mode<synchronous>, transform_indices = @transform_8, window_bounds = array<i64: 1, 128>}, {pipeline_mode = #tpu.pipeline_mode<synchronous>, transform_indices = @transform_9, window_bounds = array<i64: 32, 96>}, {pipeline_mode = #tpu.pipeline_mode<synchronous>, transform_indices = @transform_10, window_bounds = array<i64: 1, 96>}, {pipeline_mode = #tpu.pipeline_mode<synchronous>, transform_indices = @transform_11, window_bounds = array<i64: 32, 128>}, {transform_indices = @transform_12, window_bounds = array<i64: 8, 128>}, {transform_indices = @transform_13, window_bounds = array<i64: 8, 128>}]} {
    %c0 = arith.constant 0 : index
    %c0_0 = arith.constant 0 : index
    %0 = vector.load %arg2[%c0, %c0_0] : memref<8x8xf32, #tpu.memory_space<vmem>>, vector<8x8xf32>
    %c0_1 = arith.constant 0 : index
    %c0_2 = arith.constant 0 : index
    %1 = vector.load %arg4[%c0_1, %c0_2] : memref<4x24xf32, #tpu.memory_space<vmem>>, vector<4x24xf32>
    %c0_3 = arith.constant 0 : index
    %c0_4 = arith.constant 0 : index
    %2 = vector.load %arg5[%c0_3, %c0_4] : memref<24x16xf32, #tpu.memory_space<vmem>>, vector<24x16xf32>
    %c0_5 = arith.constant 0 : index
    %c0_6 = arith.constant 0 : index
    %c0_7 = arith.constant 0 : index
    %3 = vector.load %arg1[%c0_5, %c0_6, %c0_7] : memref<8x8x4xf32, #tpu.memory_space<vmem>>, vector<1x8x4xf32>
    %4 = vector.shape_cast %3 : vector<1x8x4xf32> to vector<8x4xf32>
    %5 = arith.mulf %4, %4 : vector<8x4xf32>
    %cst = arith.constant dense<0.000000e+00> : vector<8xf32>
    %6 = vector.multi_reduction <add>, %5, %cst [1] : vector<8x4xf32> to vector<8xf32>
    %7 = vector.shape_cast %6 : vector<8xf32> to vector<8x1xf32>
    %cst_8 = arith.constant 9.99999996E-13 : f32
    %8 = vector.broadcast %cst_8 : f32 to vector<8x1xf32>
    %9 = arith.addf %7, %8 : vector<8x1xf32>
    %10 = math.rsqrt %9 : vector<8x1xf32>
    %11 = vector.broadcast %10 : vector<8x1xf32> to vector<8x4xf32>
    %12 = arith.mulf %4, %11 : vector<8x4xf32>
    %cst_9 = arith.constant dense<0.000000e+00> : vector<8x8xf32>
    %13 = tpu.matmul %12, %12, %cst_9 {dimension_numbers = #tpu.dot_dimension_numbers<[1], [1], [0], [0], [0, 0, 1, 0], [], []>} : vector<8x4xf32>, vector<8x4xf32>, vector<8x8xf32> -> vector<8x8xf32>
    %14 = arith.mulf %13, %13 : vector<8x8xf32>
    %15 = arith.mulf %14, %14 : vector<8x8xf32>
    %cst_10 = arith.constant dense<0.000000e+00> : vector<8x4xf32>
    %16 = tpu.matmul %15, %4, %cst_10 {dimension_numbers = #tpu.dot_dimension_numbers<[1], [0], [0], [1], [0, 0, 1, 1], [], []>} : vector<8x8xf32>, vector<8x4xf32>, vector<8x4xf32> -> vector<8x4xf32>
    %cst_11 = arith.constant dense<0.000000e+00> : vector<8x24xf32>
    %17 = tpu.matmul %16, %1, %cst_11 {dimension_numbers = #tpu.dot_dimension_numbers<[1], [0], [0], [1], [0, 0, 1, 1], [], []>} : vector<8x4xf32>, vector<4x24xf32>, vector<8x24xf32> -> vector<8x24xf32>
    %18 = vector.extract_strided_slice %17 {offsets = [0, 0], sizes = [8, 8], strides = [1, 1]} : vector<8x24xf32> to vector<8x8xf32>
    %cst_12 = arith.constant dense<0.000000e+00> : vector<8x8xf32>
    %19 = tpu.matmul %18, %18, %cst_12 {dimension_numbers = #tpu.dot_dimension_numbers<[1], [1], [0], [0], [0, 0, 1, 0], [], []>} : vector<8x8xf32>, vector<8x8xf32>, vector<8x8xf32> -> vector<8x8xf32>
    %cst_13 = arith.constant dense<0xFF800000> : vector<8xf32>
    %20 = vector.multi_reduction <maximumf>, %19, %cst_13 [1] : vector<8x8xf32> to vector<8xf32>
    %21 = vector.shape_cast %20 : vector<8xf32> to vector<8x1xf32>
    %22 = vector.broadcast %21 : vector<8x1xf32> to vector<8x8xf32>
    %23 = arith.subf %19, %22 : vector<8x8xf32>
    %24 = math.exp %23 : vector<8x8xf32>
    %cst_14 = arith.constant dense<0.000000e+00> : vector<8xf32>
    %25 = vector.multi_reduction <add>, %24, %cst_14 [1] : vector<8x8xf32> to vector<8xf32>
    %26 = vector.shape_cast %25 : vector<8xf32> to vector<8x1xf32>
    %27 = vector.broadcast %26 : vector<8x1xf32> to vector<8x8xf32>
    %28 = arith.divf %24, %27 : vector<8x8xf32>
    %cst_15 = arith.constant dense<0.000000e+00> : vector<8x8xf32>
    %29 = tpu.matmul %28, %18, %cst_15 {dimension_numbers = #tpu.dot_dimension_numbers<[1], [0], [0], [1], [0, 0, 1, 1], [], []>} : vector<8x8xf32>, vector<8x8xf32>, vector<8x8xf32> -> vector<8x8xf32>
    %30 = vector.extract_strided_slice %17 {offsets = [0, 8], sizes = [8, 8], strides = [1, 1]} : vector<8x24xf32> to vector<8x8xf32>
    %cst_16 = arith.constant dense<0.000000e+00> : vector<8x8xf32>
    %31 = tpu.matmul %30, %30, %cst_16 {dimension_numbers = #tpu.dot_dimension_numbers<[1], [1], [0], [0], [0, 0, 1, 0], [], []>} : vector<8x8xf32>, vector<8x8xf32>, vector<8x8xf32> -> vector<8x8xf32>
    %cst_17 = arith.constant dense<0xFF800000> : vector<8xf32>
    %32 = vector.multi_reduction <maximumf>, %31, %cst_17 [1] : vector<8x8xf32> to vector<8xf32>
    %33 = vector.shape_cast %32 : vector<8xf32> to vector<8x1xf32>
    %34 = vector.broadcast %33 : vector<8x1xf32> to vector<8x8xf32>
    %35 = arith.subf %31, %34 : vector<8x8xf32>
    %36 = math.exp %35 : vector<8x8xf32>
    %cst_18 = arith.constant dense<0.000000e+00> : vector<8xf32>
    %37 = vector.multi_reduction <add>, %36, %cst_18 [1] : vector<8x8xf32> to vector<8xf32>
    %38 = vector.shape_cast %37 : vector<8xf32> to vector<8x1xf32>
    %39 = vector.broadcast %38 : vector<8x1xf32> to vector<8x8xf32>
    %40 = arith.divf %36, %39 : vector<8x8xf32>
    %cst_19 = arith.constant dense<0.000000e+00> : vector<8x8xf32>
    %41 = tpu.matmul %40, %30, %cst_19 {dimension_numbers = #tpu.dot_dimension_numbers<[1], [0], [0], [1], [0, 0, 1, 1], [], []>} : vector<8x8xf32>, vector<8x8xf32>, vector<8x8xf32> -> vector<8x8xf32>
    %42 = vector.extract_strided_slice %17 {offsets = [0, 16], sizes = [8, 8], strides = [1, 1]} : vector<8x24xf32> to vector<8x8xf32>
    %cst_20 = arith.constant dense<0.000000e+00> : vector<8x8xf32>
    %43 = tpu.matmul %42, %42, %cst_20 {dimension_numbers = #tpu.dot_dimension_numbers<[1], [1], [0], [0], [0, 0, 1, 0], [], []>} : vector<8x8xf32>, vector<8x8xf32>, vector<8x8xf32> -> vector<8x8xf32>
    %cst_21 = arith.constant dense<0xFF800000> : vector<8xf32>
    %44 = vector.multi_reduction <maximumf>, %43, %cst_21 [1] : vector<8x8xf32> to vector<8xf32>
    %45 = vector.shape_cast %44 : vector<8xf32> to vector<8x1xf32>
    %46 = vector.broadcast %45 : vector<8x1xf32> to vector<8x8xf32>
    %47 = arith.subf %43, %46 : vector<8x8xf32>
    %48 = math.exp %47 : vector<8x8xf32>
    %cst_22 = arith.constant dense<0.000000e+00> : vector<8xf32>
    %49 = vector.multi_reduction <add>, %48, %cst_22 [1] : vector<8x8xf32> to vector<8xf32>
    %50 = vector.shape_cast %49 : vector<8xf32> to vector<8x1xf32>
    %51 = vector.broadcast %50 : vector<8x1xf32> to vector<8x8xf32>
    %52 = arith.divf %48, %51 : vector<8x8xf32>
    %cst_23 = arith.constant dense<0.000000e+00> : vector<8x8xf32>
    %53 = tpu.matmul %52, %42, %cst_23 {dimension_numbers = #tpu.dot_dimension_numbers<[1], [0], [0], [1], [0, 0, 1, 1], [], []>} : vector<8x8xf32>, vector<8x8xf32>, vector<8x8xf32> -> vector<8x8xf32>
    %54 = tpu.concatenate %29, %41, %53 in 1 : vector<8x8xf32>, vector<8x8xf32>, vector<8x8xf32> -> vector<8x24xf32>
    %cst_24 = arith.constant 0.000000e+00 : f32
    %55 = vector.broadcast %cst_24 : f32 to vector<8x24xf32>
    %56 = arith.maximumf %54, %55 : vector<8x24xf32>
    %cst_25 = arith.constant dense<0.000000e+00> : vector<8x16xf32>
    %57 = tpu.matmul %56, %2, %cst_25 {dimension_numbers = #tpu.dot_dimension_numbers<[1], [0], [0], [1], [0, 0, 1, 1], [], []>} : vector<8x24xf32>, vector<24x16xf32>, vector<8x16xf32> -> vector<8x16xf32>
    %cst_26 = arith.constant dense<0.000000e+00> : vector<8x8xf32>
    %58 = tpu.matmul %57, %57, %cst_26 {dimension_numbers = #tpu.dot_dimension_numbers<[1], [1], [0], [0], [0, 0, 1, 0], [], []>} : vector<8x16xf32>, vector<8x16xf32>, vector<8x8xf32> -> vector<8x8xf32>
    %cst_27 = arith.constant dense<0xFF800000> : vector<8xf32>
    %59 = vector.multi_reduction <maximumf>, %58, %cst_27 [1] : vector<8x8xf32> to vector<8xf32>
    %60 = vector.shape_cast %59 : vector<8xf32> to vector<8x1xf32>
    %61 = vector.broadcast %60 : vector<8x1xf32> to vector<8x8xf32>
    %62 = arith.subf %58, %61 : vector<8x8xf32>
    %63 = math.exp %62 : vector<8x8xf32>
    %cst_28 = arith.constant dense<0.000000e+00> : vector<8xf32>
    %64 = vector.multi_reduction <add>, %63, %cst_28 [1] : vector<8x8xf32> to vector<8xf32>
    %65 = vector.shape_cast %64 : vector<8xf32> to vector<8x1xf32>
    %66 = vector.broadcast %65 : vector<8x1xf32> to vector<8x8xf32>
    %67 = arith.divf %63, %66 : vector<8x8xf32>
    %cst_29 = arith.constant dense<0.000000e+00> : vector<8x16xf32>
    %68 = tpu.matmul %67, %57, %cst_29 {dimension_numbers = #tpu.dot_dimension_numbers<[1], [0], [0], [1], [0, 0, 1, 1], [], []>} : vector<8x8xf32>, vector<8x16xf32>, vector<8x16xf32> -> vector<8x16xf32>
    %cst_30 = arith.constant 0.000000e+00 : f32
    %69 = vector.broadcast %cst_30 : f32 to vector<8x16xf32>
    %70 = arith.maximumf %68, %69 : vector<8x16xf32>
    %cst_31 = arith.constant dense<0xFF800000> : vector<16xf32>
    %71 = vector.multi_reduction <maximumf>, %70, %cst_31 [0] : vector<8x16xf32> to vector<16xf32>
    %72 = vector.shape_cast %71 : vector<16xf32> to vector<1x16xf32>
    %c1 = arith.constant 1 : index
    %c0_32 = arith.constant 0 : index
    %c0_33 = arith.constant 0 : index
    %73 = vector.load %arg1[%c1, %c0_32, %c0_33] : memref<8x8x4xf32, #tpu.memory_space<vmem>>, vector<1x8x4xf32>
    %74 = vector.shape_cast %73 : vector<1x8x4xf32> to vector<8x4xf32>
    %75 = arith.mulf %74, %74 : vector<8x4xf32>
    %cst_34 = arith.constant dense<0.000000e+00> : vector<8xf32>
    %76 = vector.multi_reduction <add>, %75, %cst_34 [1] : vector<8x4xf32> to vector<8xf32>
    %77 = vector.shape_cast %76 : vector<8xf32> to vector<8x1xf32>
    %cst_35 = arith.constant 9.99999996E-13 : f32
    %78 = vector.broadcast %cst_35 : f32 to vector<8x1xf32>
    %79 = arith.addf %77, %78 : vector<8x1xf32>
    %80 = math.rsqrt %79 : vector<8x1xf32>
    %81 = vector.broadcast %80 : vector<8x1xf32> to vector<8x4xf32>
    %82 = arith.mulf %74, %81 : vector<8x4xf32>
    %cst_36 = arith.constant dense<0.000000e+00> : vector<8x8xf32>
    %83 = tpu.matmul %82, %82, %cst_36 {dimension_numbers = #tpu.dot_dimension_numbers<[1], [1], [0], [0], [0, 0, 1, 0], [], []>} : vector<8x4xf32>, vector<8x4xf32>, vector<8x8xf32> -> vector<8x8xf32>
    %84 = arith.mulf %83, %83 : vector<8x8xf32>
    %85 = arith.mulf %84, %84 : vector<8x8xf32>
    %cst_37 = arith.constant dense<0.000000e+00> : vector<8x4xf32>
    %86 = tpu.matmul %85, %74, %cst_37 {dimension_numbers = #tpu.dot_dimension_numbers<[1], [0], [0], [1], [0, 0, 1, 1], [], []>} : vector<8x8xf32>, vector<8x4xf32>, vector<8x4xf32> -> vector<8x4xf32>
    %cst_38 = arith.constant dense<0.000000e+00> : vector<8x24xf32>
    %87 = tpu.matmul %86, %1, %cst_38 {dimension_numbers = #tpu.dot_dimension_numbers<[1], [0], [0], [1], [0, 0, 1, 1], [], []>} : vector<8x4xf32>, vector<4x24xf32>, vector<8x24xf32> -> vector<8x24xf32>
    %88 = vector.extract_strided_slice %87 {offsets = [0, 0], sizes = [8, 8], strides = [1, 1]} : vector<8x24xf32> to vector<8x8xf32>
    %cst_39 = arith.constant dense<0.000000e+00> : vector<8x8xf32>
    %89 = tpu.matmul %88, %88, %cst_39 {dimension_numbers = #tpu.dot_dimension_numbers<[1], [1], [0], [0], [0, 0, 1, 0], [], []>} : vector<8x8xf32>, vector<8x8xf32>, vector<8x8xf32> -> vector<8x8xf32>
    %cst_40 = arith.constant dense<0xFF800000> : vector<8xf32>
    %90 = vector.multi_reduction <maximumf>, %89, %cst_40 [1] : vector<8x8xf32> to vector<8xf32>
    %91 = vector.shape_cast %90 : vector<8xf32> to vector<8x1xf32>
    %92 = vector.broadcast %91 : vector<8x1xf32> to vector<8x8xf32>
    %93 = arith.subf %89, %92 : vector<8x8xf32>
    %94 = math.exp %93 : vector<8x8xf32>
    %cst_41 = arith.constant dense<0.000000e+00> : vector<8xf32>
    %95 = vector.multi_reduction <add>, %94, %cst_41 [1] : vector<8x8xf32> to vector<8xf32>
    %96 = vector.shape_cast %95 : vector<8xf32> to vector<8x1xf32>
    %97 = vector.broadcast %96 : vector<8x1xf32> to vector<8x8xf32>
    %98 = arith.divf %94, %97 : vector<8x8xf32>
    %cst_42 = arith.constant dense<0.000000e+00> : vector<8x8xf32>
    %99 = tpu.matmul %98, %88, %cst_42 {dimension_numbers = #tpu.dot_dimension_numbers<[1], [0], [0], [1], [0, 0, 1, 1], [], []>} : vector<8x8xf32>, vector<8x8xf32>, vector<8x8xf32> -> vector<8x8xf32>
    %100 = vector.extract_strided_slice %87 {offsets = [0, 8], sizes = [8, 8], strides = [1, 1]} : vector<8x24xf32> to vector<8x8xf32>
    %cst_43 = arith.constant dense<0.000000e+00> : vector<8x8xf32>
    %101 = tpu.matmul %100, %100, %cst_43 {dimension_numbers = #tpu.dot_dimension_numbers<[1], [1], [0], [0], [0, 0, 1, 0], [], []>} : vector<8x8xf32>, vector<8x8xf32>, vector<8x8xf32> -> vector<8x8xf32>
    %cst_44 = arith.constant dense<0xFF800000> : vector<8xf32>
    %102 = vector.multi_reduction <maximumf>, %101, %cst_44 [1] : vector<8x8xf32> to vector<8xf32>
    %103 = vector.shape_cast %102 : vector<8xf32> to vector<8x1xf32>
    %104 = vector.broadcast %103 : vector<8x1xf32> to vector<8x8xf32>
    %105 = arith.subf %101, %104 : vector<8x8xf32>
    %106 = math.exp %105 : vector<8x8xf32>
    %cst_45 = arith.constant dense<0.000000e+00> : vector<8xf32>
    %107 = vector.multi_reduction <add>, %106, %cst_45 [1] : vector<8x8xf32> to vector<8xf32>
    %108 = vector.shape_cast %107 : vector<8xf32> to vector<8x1xf32>
    %109 = vector.broadcast %108 : vector<8x1xf32> to vector<8x8xf32>
    %110 = arith.divf %106, %109 : vector<8x8xf32>
    %cst_46 = arith.constant dense<0.000000e+00> : vector<8x8xf32>
    %111 = tpu.matmul %110, %100, %cst_46 {dimension_numbers = #tpu.dot_dimension_numbers<[1], [0], [0], [1], [0, 0, 1, 1], [], []>} : vector<8x8xf32>, vector<8x8xf32>, vector<8x8xf32> -> vector<8x8xf32>
    %112 = vector.extract_strided_slice %87 {offsets = [0, 16], sizes = [8, 8], strides = [1, 1]} : vector<8x24xf32> to vector<8x8xf32>
    %cst_47 = arith.constant dense<0.000000e+00> : vector<8x8xf32>
    %113 = tpu.matmul %112, %112, %cst_47 {dimension_numbers = #tpu.dot_dimension_numbers<[1], [1], [0], [0], [0, 0, 1, 0], [], []>} : vector<8x8xf32>, vector<8x8xf32>, vector<8x8xf32> -> vector<8x8xf32>
    %cst_48 = arith.constant dense<0xFF800000> : vector<8xf32>
    %114 = vector.multi_reduction <maximumf>, %113, %cst_48 [1] : vector<8x8xf32> to vector<8xf32>
    %115 = vector.shape_cast %114 : vector<8xf32> to vector<8x1xf32>
    %116 = vector.broadcast %115 : vector<8x1xf32> to vector<8x8xf32>
    %117 = arith.subf %113, %116 : vector<8x8xf32>
    %118 = math.exp %117 : vector<8x8xf32>
    %cst_49 = arith.constant dense<0.000000e+00> : vector<8xf32>
    %119 = vector.multi_reduction <add>, %118, %cst_49 [1] : vector<8x8xf32> to vector<8xf32>
    %120 = vector.shape_cast %119 : vector<8xf32> to vector<8x1xf32>
    %121 = vector.broadcast %120 : vector<8x1xf32> to vector<8x8xf32>
    %122 = arith.divf %118, %121 : vector<8x8xf32>
    %cst_50 = arith.constant dense<0.000000e+00> : vector<8x8xf32>
    %123 = tpu.matmul %122, %112, %cst_50 {dimension_numbers = #tpu.dot_dimension_numbers<[1], [0], [0], [1], [0, 0, 1, 1], [], []>} : vector<8x8xf32>, vector<8x8xf32>, vector<8x8xf32> -> vector<8x8xf32>
    %124 = tpu.concatenate %99, %111, %123 in 1 : vector<8x8xf32>, vector<8x8xf32>, vector<8x8xf32> -> vector<8x24xf32>
    %cst_51 = arith.constant 0.000000e+00 : f32
    %125 = vector.broadcast %cst_51 : f32 to vector<8x24xf32>
    %126 = arith.maximumf %124, %125 : vector<8x24xf32>
    %cst_52 = arith.constant dense<0.000000e+00> : vector<8x16xf32>
    %127 = tpu.matmul %126, %2, %cst_52 {dimension_numbers = #tpu.dot_dimension_numbers<[1], [0], [0], [1], [0, 0, 1, 1], [], []>} : vector<8x24xf32>, vector<24x16xf32>, vector<8x16xf32> -> vector<8x16xf32>
    %cst_53 = arith.constant dense<0.000000e+00> : vector<8x8xf32>
    %128 = tpu.matmul %127, %127, %cst_53 {dimension_numbers = #tpu.dot_dimension_numbers<[1], [1], [0], [0], [0, 0, 1, 0], [], []>} : vector<8x16xf32>, vector<8x16xf32>, vector<8x8xf32> -> vector<8x8xf32>
    %cst_54 = arith.constant dense<0xFF800000> : vector<8xf32>
    %129 = vector.multi_reduction <maximumf>, %128, %cst_54 [1] : vector<8x8xf32> to vector<8xf32>
    %130 = vector.shape_cast %129 : vector<8xf32> to vector<8x1xf32>
    %131 = vector.broadcast %130 : vector<8x1xf32> to vector<8x8xf32>
    %132 = arith.subf %128, %131 : vector<8x8xf32>
    %133 = math.exp %132 : vector<8x8xf32>
    %cst_55 = arith.constant dense<0.000000e+00> : vector<8xf32>
    %134 = vector.multi_reduction <add>, %133, %cst_55 [1] : vector<8x8xf32> to vector<8xf32>
    %135 = vector.shape_cast %134 : vector<8xf32> to vector<8x1xf32>
    %136 = vector.broadcast %135 : vector<8x1xf32> to vector<8x8xf32>
    %137 = arith.divf %133, %136 : vector<8x8xf32>
    %cst_56 = arith.constant dense<0.000000e+00> : vector<8x16xf32>
    %138 = tpu.matmul %137, %127, %cst_56 {dimension_numbers = #tpu.dot_dimension_numbers<[1], [0], [0], [1], [0, 0, 1, 1], [], []>} : vector<8x8xf32>, vector<8x16xf32>, vector<8x16xf32> -> vector<8x16xf32>
    %cst_57 = arith.constant 0.000000e+00 : f32
    %139 = vector.broadcast %cst_57 : f32 to vector<8x16xf32>
    %140 = arith.maximumf %138, %139 : vector<8x16xf32>
    %cst_58 = arith.constant dense<0xFF800000> : vector<16xf32>
    %141 = vector.multi_reduction <maximumf>, %140, %cst_58 [0] : vector<8x16xf32> to vector<16xf32>
    %142 = vector.shape_cast %141 : vector<16xf32> to vector<1x16xf32>
    %c2 = arith.constant 2 : index
    %c0_59 = arith.constant 0 : index
    %c0_60 = arith.constant 0 : index
    %143 = vector.load %arg1[%c2, %c0_59, %c0_60] : memref<8x8x4xf32, #tpu.memory_space<vmem>>, vector<1x8x4xf32>
    %144 = vector.shape_cast %143 : vector<1x8x4xf32> to vector<8x4xf32>
    %145 = arith.mulf %144, %144 : vector<8x4xf32>
    %cst_61 = arith.constant dense<0.000000e+00> : vector<8xf32>
    %146 = vector.multi_reduction <add>, %145, %cst_61 [1] : vector<8x4xf32> to vector<8xf32>
    %147 = vector.shape_cast %146 : vector<8xf32> to vector<8x1xf32>
    %cst_62 = arith.constant 9.99999996E-13 : f32
    %148 = vector.broadcast %cst_62 : f32 to vector<8x1xf32>
    %149 = arith.addf %147, %148 : vector<8x1xf32>
    %150 = math.rsqrt %149 : vector<8x1xf32>
    %151 = vector.broadcast %150 : vector<8x1xf32> to vector<8x4xf32>
    %152 = arith.mulf %144, %151 : vector<8x4xf32>
    %cst_63 = arith.constant dense<0.000000e+00> : vector<8x8xf32>
    %153 = tpu.matmul %152, %152, %cst_63 {dimension_numbers = #tpu.dot_dimension_numbers<[1], [1], [0], [0], [0, 0, 1, 0], [], []>} : vector<8x4xf32>, vector<8x4xf32>, vector<8x8xf32> -> vector<8x8xf32>
    %154 = arith.mulf %153, %153 : vector<8x8xf32>
    %155 = arith.mulf %154, %154 : vector<8x8xf32>
    %cst_64 = arith.constant dense<0.000000e+00> : vector<8x4xf32>
    %156 = tpu.matmul %155, %144, %cst_64 {dimension_numbers = #tpu.dot_dimension_numbers<[1], [0], [0], [1], [0, 0, 1, 1], [], []>} : vector<8x8xf32>, vector<8x4xf32>, vector<8x4xf32> -> vector<8x4xf32>
    %cst_65 = arith.constant dense<0.000000e+00> : vector<8x24xf32>
    %157 = tpu.matmul %156, %1, %cst_65 {dimension_numbers = #tpu.dot_dimension_numbers<[1], [0], [0], [1], [0, 0, 1, 1], [], []>} : vector<8x4xf32>, vector<4x24xf32>, vector<8x24xf32> -> vector<8x24xf32>
    %158 = vector.extract_strided_slice %157 {offsets = [0, 0], sizes = [8, 8], strides = [1, 1]} : vector<8x24xf32> to vector<8x8xf32>
    %cst_66 = arith.constant dense<0.000000e+00> : vector<8x8xf32>
    %159 = tpu.matmul %158, %158, %cst_66 {dimension_numbers = #tpu.dot_dimension_numbers<[1], [1], [0], [0], [0, 0, 1, 0], [], []>} : vector<8x8xf32>, vector<8x8xf32>, vector<8x8xf32> -> vector<8x8xf32>
    %cst_67 = arith.constant dense<0xFF800000> : vector<8xf32>
    %160 = vector.multi_reduction <maximumf>, %159, %cst_67 [1] : vector<8x8xf32> to vector<8xf32>
    %161 = vector.shape_cast %160 : vector<8xf32> to vector<8x1xf32>
    %162 = vector.broadcast %161 : vector<8x1xf32> to vector<8x8xf32>
    %163 = arith.subf %159, %162 : vector<8x8xf32>
    %164 = math.exp %163 : vector<8x8xf32>
    %cst_68 = arith.constant dense<0.000000e+00> : vector<8xf32>
    %165 = vector.multi_reduction <add>, %164, %cst_68 [1] : vector<8x8xf32> to vector<8xf32>
    %166 = vector.shape_cast %165 : vector<8xf32> to vector<8x1xf32>
    %167 = vector.broadcast %166 : vector<8x1xf32> to vector<8x8xf32>
    %168 = arith.divf %164, %167 : vector<8x8xf32>
    %cst_69 = arith.constant dense<0.000000e+00> : vector<8x8xf32>
    %169 = tpu.matmul %168, %158, %cst_69 {dimension_numbers = #tpu.dot_dimension_numbers<[1], [0], [0], [1], [0, 0, 1, 1], [], []>} : vector<8x8xf32>, vector<8x8xf32>, vector<8x8xf32> -> vector<8x8xf32>
    %170 = vector.extract_strided_slice %157 {offsets = [0, 8], sizes = [8, 8], strides = [1, 1]} : vector<8x24xf32> to vector<8x8xf32>
    %cst_70 = arith.constant dense<0.000000e+00> : vector<8x8xf32>
    %171 = tpu.matmul %170, %170, %cst_70 {dimension_numbers = #tpu.dot_dimension_numbers<[1], [1], [0], [0], [0, 0, 1, 0], [], []>} : vector<8x8xf32>, vector<8x8xf32>, vector<8x8xf32> -> vector<8x8xf32>
    %cst_71 = arith.constant dense<0xFF800000> : vector<8xf32>
    %172 = vector.multi_reduction <maximumf>, %171, %cst_71 [1] : vector<8x8xf32> to vector<8xf32>
    %173 = vector.shape_cast %172 : vector<8xf32> to vector<8x1xf32>
    %174 = vector.broadcast %173 : vector<8x1xf32> to vector<8x8xf32>
    %175 = arith.subf %171, %174 : vector<8x8xf32>
    %176 = math.exp %175 : vector<8x8xf32>
    %cst_72 = arith.constant dense<0.000000e+00> : vector<8xf32>
    %177 = vector.multi_reduction <add>, %176, %cst_72 [1] : vector<8x8xf32> to vector<8xf32>
    %178 = vector.shape_cast %177 : vector<8xf32> to vector<8x1xf32>
    %179 = vector.broadcast %178 : vector<8x1xf32> to vector<8x8xf32>
    %180 = arith.divf %176, %179 : vector<8x8xf32>
    %cst_73 = arith.constant dense<0.000000e+00> : vector<8x8xf32>
    %181 = tpu.matmul %180, %170, %cst_73 {dimension_numbers = #tpu.dot_dimension_numbers<[1], [0], [0], [1], [0, 0, 1, 1], [], []>} : vector<8x8xf32>, vector<8x8xf32>, vector<8x8xf32> -> vector<8x8xf32>
    %182 = vector.extract_strided_slice %157 {offsets = [0, 16], sizes = [8, 8], strides = [1, 1]} : vector<8x24xf32> to vector<8x8xf32>
    %cst_74 = arith.constant dense<0.000000e+00> : vector<8x8xf32>
    %183 = tpu.matmul %182, %182, %cst_74 {dimension_numbers = #tpu.dot_dimension_numbers<[1], [1], [0], [0], [0, 0, 1, 0], [], []>} : vector<8x8xf32>, vector<8x8xf32>, vector<8x8xf32> -> vector<8x8xf32>
    %cst_75 = arith.constant dense<0xFF800000> : vector<8xf32>
    %184 = vector.multi_reduction <maximumf>, %183, %cst_75 [1] : vector<8x8xf32> to vector<8xf32>
    %185 = vector.shape_cast %184 : vector<8xf32> to vector<8x1xf32>
    %186 = vector.broadcast %185 : vector<8x1xf32> to vector<8x8xf32>
    %187 = arith.subf %183, %186 : vector<8x8xf32>
    %188 = math.exp %187 : vector<8x8xf32>
    %cst_76 = arith.constant dense<0.000000e+00> : vector<8xf32>
    %189 = vector.multi_reduction <add>, %188, %cst_76 [1] : vector<8x8xf32> to vector<8xf32>
    %190 = vector.shape_cast %189 : vector<8xf32> to vector<8x1xf32>
    %191 = vector.broadcast %190 : vector<8x1xf32> to vector<8x8xf32>
    %192 = arith.divf %188, %191 : vector<8x8xf32>
    %cst_77 = arith.constant dense<0.000000e+00> : vector<8x8xf32>
    %193 = tpu.matmul %192, %182, %cst_77 {dimension_numbers = #tpu.dot_dimension_numbers<[1], [0], [0], [1], [0, 0, 1, 1], [], []>} : vector<8x8xf32>, vector<8x8xf32>, vector<8x8xf32> -> vector<8x8xf32>
    %194 = tpu.concatenate %169, %181, %193 in 1 : vector<8x8xf32>, vector<8x8xf32>, vector<8x8xf32> -> vector<8x24xf32>
    %cst_78 = arith.constant 0.000000e+00 : f32
    %195 = vector.broadcast %cst_78 : f32 to vector<8x24xf32>
    %196 = arith.maximumf %194, %195 : vector<8x24xf32>
    %cst_79 = arith.constant dense<0.000000e+00> : vector<8x16xf32>
    %197 = tpu.matmul %196, %2, %cst_79 {dimension_numbers = #tpu.dot_dimension_numbers<[1], [0], [0], [1], [0, 0, 1, 1], [], []>} : vector<8x24xf32>, vector<24x16xf32>, vector<8x16xf32> -> vector<8x16xf32>
    %cst_80 = arith.constant dense<0.000000e+00> : vector<8x8xf32>
    %198 = tpu.matmul %197, %197, %cst_80 {dimension_numbers = #tpu.dot_dimension_numbers<[1], [1], [0], [0], [0, 0, 1, 0], [], []>} : vector<8x16xf32>, vector<8x16xf32>, vector<8x8xf32> -> vector<8x8xf32>
    %cst_81 = arith.constant dense<0xFF800000> : vector<8xf32>
    %199 = vector.multi_reduction <maximumf>, %198, %cst_81 [1] : vector<8x8xf32> to vector<8xf32>
    %200 = vector.shape_cast %199 : vector<8xf32> to vector<8x1xf32>
    %201 = vector.broadcast %200 : vector<8x1xf32> to vector<8x8xf32>
    %202 = arith.subf %198, %201 : vector<8x8xf32>
    %203 = math.exp %202 : vector<8x8xf32>
    %cst_82 = arith.constant dense<0.000000e+00> : vector<8xf32>
    %204 = vector.multi_reduction <add>, %203, %cst_82 [1] : vector<8x8xf32> to vector<8xf32>
    %205 = vector.shape_cast %204 : vector<8xf32> to vector<8x1xf32>
    %206 = vector.broadcast %205 : vector<8x1xf32> to vector<8x8xf32>
    %207 = arith.divf %203, %206 : vector<8x8xf32>
    %cst_83 = arith.constant dense<0.000000e+00> : vector<8x16xf32>
    %208 = tpu.matmul %207, %197, %cst_83 {dimension_numbers = #tpu.dot_dimension_numbers<[1], [0], [0], [1], [0, 0, 1, 1], [], []>} : vector<8x8xf32>, vector<8x16xf32>, vector<8x16xf32> -> vector<8x16xf32>
    %cst_84 = arith.constant 0.000000e+00 : f32
    %209 = vector.broadcast %cst_84 : f32 to vector<8x16xf32>
    %210 = arith.maximumf %208, %209 : vector<8x16xf32>
    %cst_85 = arith.constant dense<0xFF800000> : vector<16xf32>
    %211 = vector.multi_reduction <maximumf>, %210, %cst_85 [0] : vector<8x16xf32> to vector<16xf32>
    %212 = vector.shape_cast %211 : vector<16xf32> to vector<1x16xf32>
    %c3 = arith.constant 3 : index
    %c0_86 = arith.constant 0 : index
    %c0_87 = arith.constant 0 : index
    %213 = vector.load %arg1[%c3, %c0_86, %c0_87] : memref<8x8x4xf32, #tpu.memory_space<vmem>>, vector<1x8x4xf32>
    %214 = vector.shape_cast %213 : vector<1x8x4xf32> to vector<8x4xf32>
    %215 = arith.mulf %214, %214 : vector<8x4xf32>
    %cst_88 = arith.constant dense<0.000000e+00> : vector<8xf32>
    %216 = vector.multi_reduction <add>, %215, %cst_88 [1] : vector<8x4xf32> to vector<8xf32>
    %217 = vector.shape_cast %216 : vector<8xf32> to vector<8x1xf32>
    %cst_89 = arith.constant 9.99999996E-13 : f32
    %218 = vector.broadcast %cst_89 : f32 to vector<8x1xf32>
    %219 = arith.addf %217, %218 : vector<8x1xf32>
    %220 = math.rsqrt %219 : vector<8x1xf32>
    %221 = vector.broadcast %220 : vector<8x1xf32> to vector<8x4xf32>
    %222 = arith.mulf %214, %221 : vector<8x4xf32>
    %cst_90 = arith.constant dense<0.000000e+00> : vector<8x8xf32>
    %223 = tpu.matmul %222, %222, %cst_90 {dimension_numbers = #tpu.dot_dimension_numbers<[1], [1], [0], [0], [0, 0, 1, 0], [], []>} : vector<8x4xf32>, vector<8x4xf32>, vector<8x8xf32> -> vector<8x8xf32>
    %224 = arith.mulf %223, %223 : vector<8x8xf32>
    %225 = arith.mulf %224, %224 : vector<8x8xf32>
    %cst_91 = arith.constant dense<0.000000e+00> : vector<8x4xf32>
    %226 = tpu.matmul %225, %214, %cst_91 {dimension_numbers = #tpu.dot_dimension_numbers<[1], [0], [0], [1], [0, 0, 1, 1], [], []>} : vector<8x8xf32>, vector<8x4xf32>, vector<8x4xf32> -> vector<8x4xf32>
    %cst_92 = arith.constant dense<0.000000e+00> : vector<8x24xf32>
    %227 = tpu.matmul %226, %1, %cst_92 {dimension_numbers = #tpu.dot_dimension_numbers<[1], [0], [0], [1], [0, 0, 1, 1], [], []>} : vector<8x4xf32>, vector<4x24xf32>, vector<8x24xf32> -> vector<8x24xf32>
    %228 = vector.extract_strided_slice %227 {offsets = [0, 0], sizes = [8, 8], strides = [1, 1]} : vector<8x24xf32> to vector<8x8xf32>
    %cst_93 = arith.constant dense<0.000000e+00> : vector<8x8xf32>
    %229 = tpu.matmul %228, %228, %cst_93 {dimension_numbers = #tpu.dot_dimension_numbers<[1], [1], [0], [0], [0, 0, 1, 0], [], []>} : vector<8x8xf32>, vector<8x8xf32>, vector<8x8xf32> -> vector<8x8xf32>
    %cst_94 = arith.constant dense<0xFF800000> : vector<8xf32>
    %230 = vector.multi_reduction <maximumf>, %229, %cst_94 [1] : vector<8x8xf32> to vector<8xf32>
    %231 = vector.shape_cast %230 : vector<8xf32> to vector<8x1xf32>
    %232 = vector.broadcast %231 : vector<8x1xf32> to vector<8x8xf32>
    %233 = arith.subf %229, %232 : vector<8x8xf32>
    %234 = math.exp %233 : vector<8x8xf32>
    %cst_95 = arith.constant dense<0.000000e+00> : vector<8xf32>
    %235 = vector.multi_reduction <add>, %234, %cst_95 [1] : vector<8x8xf32> to vector<8xf32>
    %236 = vector.shape_cast %235 : vector<8xf32> to vector<8x1xf32>
    %237 = vector.broadcast %236 : vector<8x1xf32> to vector<8x8xf32>
    %238 = arith.divf %234, %237 : vector<8x8xf32>
    %cst_96 = arith.constant dense<0.000000e+00> : vector<8x8xf32>
    %239 = tpu.matmul %238, %228, %cst_96 {dimension_numbers = #tpu.dot_dimension_numbers<[1], [0], [0], [1], [0, 0, 1, 1], [], []>} : vector<8x8xf32>, vector<8x8xf32>, vector<8x8xf32> -> vector<8x8xf32>
    %240 = vector.extract_strided_slice %227 {offsets = [0, 8], sizes = [8, 8], strides = [1, 1]} : vector<8x24xf32> to vector<8x8xf32>
    %cst_97 = arith.constant dense<0.000000e+00> : vector<8x8xf32>
    %241 = tpu.matmul %240, %240, %cst_97 {dimension_numbers = #tpu.dot_dimension_numbers<[1], [1], [0], [0], [0, 0, 1, 0], [], []>} : vector<8x8xf32>, vector<8x8xf32>, vector<8x8xf32> -> vector<8x8xf32>
    %cst_98 = arith.constant dense<0xFF800000> : vector<8xf32>
    %242 = vector.multi_reduction <maximumf>, %241, %cst_98 [1] : vector<8x8xf32> to vector<8xf32>
    %243 = vector.shape_cast %242 : vector<8xf32> to vector<8x1xf32>
    %244 = vector.broadcast %243 : vector<8x1xf32> to vector<8x8xf32>
    %245 = arith.subf %241, %244 : vector<8x8xf32>
    %246 = math.exp %245 : vector<8x8xf32>
    %cst_99 = arith.constant dense<0.000000e+00> : vector<8xf32>
    %247 = vector.multi_reduction <add>, %246, %cst_99 [1] : vector<8x8xf32> to vector<8xf32>
    %248 = vector.shape_cast %247 : vector<8xf32> to vector<8x1xf32>
    %249 = vector.broadcast %248 : vector<8x1xf32> to vector<8x8xf32>
    %250 = arith.divf %246, %249 : vector<8x8xf32>
    %cst_100 = arith.constant dense<0.000000e+00> : vector<8x8xf32>
    %251 = tpu.matmul %250, %240, %cst_100 {dimension_numbers = #tpu.dot_dimension_numbers<[1], [0], [0], [1], [0, 0, 1, 1], [], []>} : vector<8x8xf32>, vector<8x8xf32>, vector<8x8xf32> -> vector<8x8xf32>
    %252 = vector.extract_strided_slice %227 {offsets = [0, 16], sizes = [8, 8], strides = [1, 1]} : vector<8x24xf32> to vector<8x8xf32>
    %cst_101 = arith.constant dense<0.000000e+00> : vector<8x8xf32>
    %253 = tpu.matmul %252, %252, %cst_101 {dimension_numbers = #tpu.dot_dimension_numbers<[1], [1], [0], [0], [0, 0, 1, 0], [], []>} : vector<8x8xf32>, vector<8x8xf32>, vector<8x8xf32> -> vector<8x8xf32>
    %cst_102 = arith.constant dense<0xFF800000> : vector<8xf32>
    %254 = vector.multi_reduction <maximumf>, %253, %cst_102 [1] : vector<8x8xf32> to vector<8xf32>
    %255 = vector.shape_cast %254 : vector<8xf32> to vector<8x1xf32>
    %256 = vector.broadcast %255 : vector<8x1xf32> to vector<8x8xf32>
    %257 = arith.subf %253, %256 : vector<8x8xf32>
    %258 = math.exp %257 : vector<8x8xf32>
    %cst_103 = arith.constant dense<0.000000e+00> : vector<8xf32>
    %259 = vector.multi_reduction <add>, %258, %cst_103 [1] : vector<8x8xf32> to vector<8xf32>
    %260 = vector.shape_cast %259 : vector<8xf32> to vector<8x1xf32>
    %261 = vector.broadcast %260 : vector<8x1xf32> to vector<8x8xf32>
    %262 = arith.divf %258, %261 : vector<8x8xf32>
    %cst_104 = arith.constant dense<0.000000e+00> : vector<8x8xf32>
    %263 = tpu.matmul %262, %252, %cst_104 {dimension_numbers = #tpu.dot_dimension_numbers<[1], [0], [0], [1], [0, 0, 1, 1], [], []>} : vector<8x8xf32>, vector<8x8xf32>, vector<8x8xf32> -> vector<8x8xf32>
    %264 = tpu.concatenate %239, %251, %263 in 1 : vector<8x8xf32>, vector<8x8xf32>, vector<8x8xf32> -> vector<8x24xf32>
    %cst_105 = arith.constant 0.000000e+00 : f32
    %265 = vector.broadcast %cst_105 : f32 to vector<8x24xf32>
    %266 = arith.maximumf %264, %265 : vector<8x24xf32>
    %cst_106 = arith.constant dense<0.000000e+00> : vector<8x16xf32>
    %267 = tpu.matmul %266, %2, %cst_106 {dimension_numbers = #tpu.dot_dimension_numbers<[1], [0], [0], [1], [0, 0, 1, 1], [], []>} : vector<8x24xf32>, vector<24x16xf32>, vector<8x16xf32> -> vector<8x16xf32>
    %cst_107 = arith.constant dense<0.000000e+00> : vector<8x8xf32>
    %268 = tpu.matmul %267, %267, %cst_107 {dimension_numbers = #tpu.dot_dimension_numbers<[1], [1], [0], [0], [0, 0, 1, 0], [], []>} : vector<8x16xf32>, vector<8x16xf32>, vector<8x8xf32> -> vector<8x8xf32>
    %cst_108 = arith.constant dense<0xFF800000> : vector<8xf32>
    %269 = vector.multi_reduction <maximumf>, %268, %cst_108 [1] : vector<8x8xf32> to vector<8xf32>
    %270 = vector.shape_cast %269 : vector<8xf32> to vector<8x1xf32>
    %271 = vector.broadcast %270 : vector<8x1xf32> to vector<8x8xf32>
    %272 = arith.subf %268, %271 : vector<8x8xf32>
    %273 = math.exp %272 : vector<8x8xf32>
    %cst_109 = arith.constant dense<0.000000e+00> : vector<8xf32>
    %274 = vector.multi_reduction <add>, %273, %cst_109 [1] : vector<8x8xf32> to vector<8xf32>
    %275 = vector.shape_cast %274 : vector<8xf32> to vector<8x1xf32>
    %276 = vector.broadcast %275 : vector<8x1xf32> to vector<8x8xf32>
    %277 = arith.divf %273, %276 : vector<8x8xf32>
    %cst_110 = arith.constant dense<0.000000e+00> : vector<8x16xf32>
    %278 = tpu.matmul %277, %267, %cst_110 {dimension_numbers = #tpu.dot_dimension_numbers<[1], [0], [0], [1], [0, 0, 1, 1], [], []>} : vector<8x8xf32>, vector<8x16xf32>, vector<8x16xf32> -> vector<8x16xf32>
    %cst_111 = arith.constant 0.000000e+00 : f32
    %279 = vector.broadcast %cst_111 : f32 to vector<8x16xf32>
    %280 = arith.maximumf %278, %279 : vector<8x16xf32>
    %cst_112 = arith.constant dense<0xFF800000> : vector<16xf32>
    %281 = vector.multi_reduction <maximumf>, %280, %cst_112 [0] : vector<8x16xf32> to vector<16xf32>
    %282 = vector.shape_cast %281 : vector<16xf32> to vector<1x16xf32>
    %c4 = arith.constant 4 : index
    %c0_113 = arith.constant 0 : index
    %c0_114 = arith.constant 0 : index
    %283 = vector.load %arg1[%c4, %c0_113, %c0_114] : memref<8x8x4xf32, #tpu.memory_space<vmem>>, vector<1x8x4xf32>
    %284 = vector.shape_cast %283 : vector<1x8x4xf32> to vector<8x4xf32>
    %285 = arith.mulf %284, %284 : vector<8x4xf32>
    %cst_115 = arith.constant dense<0.000000e+00> : vector<8xf32>
    %286 = vector.multi_reduction <add>, %285, %cst_115 [1] : vector<8x4xf32> to vector<8xf32>
    %287 = vector.shape_cast %286 : vector<8xf32> to vector<8x1xf32>
    %cst_116 = arith.constant 9.99999996E-13 : f32
    %288 = vector.broadcast %cst_116 : f32 to vector<8x1xf32>
    %289 = arith.addf %287, %288 : vector<8x1xf32>
    %290 = math.rsqrt %289 : vector<8x1xf32>
    %291 = vector.broadcast %290 : vector<8x1xf32> to vector<8x4xf32>
    %292 = arith.mulf %284, %291 : vector<8x4xf32>
    %cst_117 = arith.constant dense<0.000000e+00> : vector<8x8xf32>
    %293 = tpu.matmul %292, %292, %cst_117 {dimension_numbers = #tpu.dot_dimension_numbers<[1], [1], [0], [0], [0, 0, 1, 0], [], []>} : vector<8x4xf32>, vector<8x4xf32>, vector<8x8xf32> -> vector<8x8xf32>
    %294 = arith.mulf %293, %293 : vector<8x8xf32>
    %295 = arith.mulf %294, %294 : vector<8x8xf32>
    %cst_118 = arith.constant dense<0.000000e+00> : vector<8x4xf32>
    %296 = tpu.matmul %295, %284, %cst_118 {dimension_numbers = #tpu.dot_dimension_numbers<[1], [0], [0], [1], [0, 0, 1, 1], [], []>} : vector<8x8xf32>, vector<8x4xf32>, vector<8x4xf32> -> vector<8x4xf32>
    %cst_119 = arith.constant dense<0.000000e+00> : vector<8x24xf32>
    %297 = tpu.matmul %296, %1, %cst_119 {dimension_numbers = #tpu.dot_dimension_numbers<[1], [0], [0], [1], [0, 0, 1, 1], [], []>} : vector<8x4xf32>, vector<4x24xf32>, vector<8x24xf32> -> vector<8x24xf32>
    %298 = vector.extract_strided_slice %297 {offsets = [0, 0], sizes = [8, 8], strides = [1, 1]} : vector<8x24xf32> to vector<8x8xf32>
    %cst_120 = arith.constant dense<0.000000e+00> : vector<8x8xf32>
    %299 = tpu.matmul %298, %298, %cst_120 {dimension_numbers = #tpu.dot_dimension_numbers<[1], [1], [0], [0], [0, 0, 1, 0], [], []>} : vector<8x8xf32>, vector<8x8xf32>, vector<8x8xf32> -> vector<8x8xf32>
    %cst_121 = arith.constant dense<0xFF800000> : vector<8xf32>
    %300 = vector.multi_reduction <maximumf>, %299, %cst_121 [1] : vector<8x8xf32> to vector<8xf32>
    %301 = vector.shape_cast %300 : vector<8xf32> to vector<8x1xf32>
    %302 = vector.broadcast %301 : vector<8x1xf32> to vector<8x8xf32>
    %303 = arith.subf %299, %302 : vector<8x8xf32>
    %304 = math.exp %303 : vector<8x8xf32>
    %cst_122 = arith.constant dense<0.000000e+00> : vector<8xf32>
    %305 = vector.multi_reduction <add>, %304, %cst_122 [1] : vector<8x8xf32> to vector<8xf32>
    %306 = vector.shape_cast %305 : vector<8xf32> to vector<8x1xf32>
    %307 = vector.broadcast %306 : vector<8x1xf32> to vector<8x8xf32>
    %308 = arith.divf %304, %307 : vector<8x8xf32>
    %cst_123 = arith.constant dense<0.000000e+00> : vector<8x8xf32>
    %309 = tpu.matmul %308, %298, %cst_123 {dimension_numbers = #tpu.dot_dimension_numbers<[1], [0], [0], [1], [0, 0, 1, 1], [], []>} : vector<8x8xf32>, vector<8x8xf32>, vector<8x8xf32> -> vector<8x8xf32>
    %310 = vector.extract_strided_slice %297 {offsets = [0, 8], sizes = [8, 8], strides = [1, 1]} : vector<8x24xf32> to vector<8x8xf32>
    %cst_124 = arith.constant dense<0.000000e+00> : vector<8x8xf32>
    %311 = tpu.matmul %310, %310, %cst_124 {dimension_numbers = #tpu.dot_dimension_numbers<[1], [1], [0], [0], [0, 0, 1, 0], [], []>} : vector<8x8xf32>, vector<8x8xf32>, vector<8x8xf32> -> vector<8x8xf32>
    %cst_125 = arith.constant dense<0xFF800000> : vector<8xf32>
    %312 = vector.multi_reduction <maximumf>, %311, %cst_125 [1] : vector<8x8xf32> to vector<8xf32>
    %313 = vector.shape_cast %312 : vector<8xf32> to vector<8x1xf32>
    %314 = vector.broadcast %313 : vector<8x1xf32> to vector<8x8xf32>
    %315 = arith.subf %311, %314 : vector<8x8xf32>
    %316 = math.exp %315 : vector<8x8xf32>
    %cst_126 = arith.constant dense<0.000000e+00> : vector<8xf32>
    %317 = vector.multi_reduction <add>, %316, %cst_126 [1] : vector<8x8xf32> to vector<8xf32>
    %318 = vector.shape_cast %317 : vector<8xf32> to vector<8x1xf32>
    %319 = vector.broadcast %318 : vector<8x1xf32> to vector<8x8xf32>
    %320 = arith.divf %316, %319 : vector<8x8xf32>
    %cst_127 = arith.constant dense<0.000000e+00> : vector<8x8xf32>
    %321 = tpu.matmul %320, %310, %cst_127 {dimension_numbers = #tpu.dot_dimension_numbers<[1], [0], [0], [1], [0, 0, 1, 1], [], []>} : vector<8x8xf32>, vector<8x8xf32>, vector<8x8xf32> -> vector<8x8xf32>
    %322 = vector.extract_strided_slice %297 {offsets = [0, 16], sizes = [8, 8], strides = [1, 1]} : vector<8x24xf32> to vector<8x8xf32>
    %cst_128 = arith.constant dense<0.000000e+00> : vector<8x8xf32>
    %323 = tpu.matmul %322, %322, %cst_128 {dimension_numbers = #tpu.dot_dimension_numbers<[1], [1], [0], [0], [0, 0, 1, 0], [], []>} : vector<8x8xf32>, vector<8x8xf32>, vector<8x8xf32> -> vector<8x8xf32>
    %cst_129 = arith.constant dense<0xFF800000> : vector<8xf32>
    %324 = vector.multi_reduction <maximumf>, %323, %cst_129 [1] : vector<8x8xf32> to vector<8xf32>
    %325 = vector.shape_cast %324 : vector<8xf32> to vector<8x1xf32>
    %326 = vector.broadcast %325 : vector<8x1xf32> to vector<8x8xf32>
    %327 = arith.subf %323, %326 : vector<8x8xf32>
    %328 = math.exp %327 : vector<8x8xf32>
    %cst_130 = arith.constant dense<0.000000e+00> : vector<8xf32>
    %329 = vector.multi_reduction <add>, %328, %cst_130 [1] : vector<8x8xf32> to vector<8xf32>
    %330 = vector.shape_cast %329 : vector<8xf32> to vector<8x1xf32>
    %331 = vector.broadcast %330 : vector<8x1xf32> to vector<8x8xf32>
    %332 = arith.divf %328, %331 : vector<8x8xf32>
    %cst_131 = arith.constant dense<0.000000e+00> : vector<8x8xf32>
    %333 = tpu.matmul %332, %322, %cst_131 {dimension_numbers = #tpu.dot_dimension_numbers<[1], [0], [0], [1], [0, 0, 1, 1], [], []>} : vector<8x8xf32>, vector<8x8xf32>, vector<8x8xf32> -> vector<8x8xf32>
    %334 = tpu.concatenate %309, %321, %333 in 1 : vector<8x8xf32>, vector<8x8xf32>, vector<8x8xf32> -> vector<8x24xf32>
    %cst_132 = arith.constant 0.000000e+00 : f32
    %335 = vector.broadcast %cst_132 : f32 to vector<8x24xf32>
    %336 = arith.maximumf %334, %335 : vector<8x24xf32>
    %cst_133 = arith.constant dense<0.000000e+00> : vector<8x16xf32>
    %337 = tpu.matmul %336, %2, %cst_133 {dimension_numbers = #tpu.dot_dimension_numbers<[1], [0], [0], [1], [0, 0, 1, 1], [], []>} : vector<8x24xf32>, vector<24x16xf32>, vector<8x16xf32> -> vector<8x16xf32>
    %cst_134 = arith.constant dense<0.000000e+00> : vector<8x8xf32>
    %338 = tpu.matmul %337, %337, %cst_134 {dimension_numbers = #tpu.dot_dimension_numbers<[1], [1], [0], [0], [0, 0, 1, 0], [], []>} : vector<8x16xf32>, vector<8x16xf32>, vector<8x8xf32> -> vector<8x8xf32>
    %cst_135 = arith.constant dense<0xFF800000> : vector<8xf32>
    %339 = vector.multi_reduction <maximumf>, %338, %cst_135 [1] : vector<8x8xf32> to vector<8xf32>
    %340 = vector.shape_cast %339 : vector<8xf32> to vector<8x1xf32>
    %341 = vector.broadcast %340 : vector<8x1xf32> to vector<8x8xf32>
    %342 = arith.subf %338, %341 : vector<8x8xf32>
    %343 = math.exp %342 : vector<8x8xf32>
    %cst_136 = arith.constant dense<0.000000e+00> : vector<8xf32>
    %344 = vector.multi_reduction <add>, %343, %cst_136 [1] : vector<8x8xf32> to vector<8xf32>
    %345 = vector.shape_cast %344 : vector<8xf32> to vector<8x1xf32>
    %346 = vector.broadcast %345 : vector<8x1xf32> to vector<8x8xf32>
    %347 = arith.divf %343, %346 : vector<8x8xf32>
    %cst_137 = arith.constant dense<0.000000e+00> : vector<8x16xf32>
    %348 = tpu.matmul %347, %337, %cst_137 {dimension_numbers = #tpu.dot_dimension_numbers<[1], [0], [0], [1], [0, 0, 1, 1], [], []>} : vector<8x8xf32>, vector<8x16xf32>, vector<8x16xf32> -> vector<8x16xf32>
    %cst_138 = arith.constant 0.000000e+00 : f32
    %349 = vector.broadcast %cst_138 : f32 to vector<8x16xf32>
    %350 = arith.maximumf %348, %349 : vector<8x16xf32>
    %cst_139 = arith.constant dense<0xFF800000> : vector<16xf32>
    %351 = vector.multi_reduction <maximumf>, %350, %cst_139 [0] : vector<8x16xf32> to vector<16xf32>
    %352 = vector.shape_cast %351 : vector<16xf32> to vector<1x16xf32>
    %c5 = arith.constant 5 : index
    %c0_140 = arith.constant 0 : index
    %c0_141 = arith.constant 0 : index
    %353 = vector.load %arg1[%c5, %c0_140, %c0_141] : memref<8x8x4xf32, #tpu.memory_space<vmem>>, vector<1x8x4xf32>
    %354 = vector.shape_cast %353 : vector<1x8x4xf32> to vector<8x4xf32>
    %355 = arith.mulf %354, %354 : vector<8x4xf32>
    %cst_142 = arith.constant dense<0.000000e+00> : vector<8xf32>
    %356 = vector.multi_reduction <add>, %355, %cst_142 [1] : vector<8x4xf32> to vector<8xf32>
    %357 = vector.shape_cast %356 : vector<8xf32> to vector<8x1xf32>
    %cst_143 = arith.constant 9.99999996E-13 : f32
    %358 = vector.broadcast %cst_143 : f32 to vector<8x1xf32>
    %359 = arith.addf %357, %358 : vector<8x1xf32>
    %360 = math.rsqrt %359 : vector<8x1xf32>
    %361 = vector.broadcast %360 : vector<8x1xf32> to vector<8x4xf32>
    %362 = arith.mulf %354, %361 : vector<8x4xf32>
    %cst_144 = arith.constant dense<0.000000e+00> : vector<8x8xf32>
    %363 = tpu.matmul %362, %362, %cst_144 {dimension_numbers = #tpu.dot_dimension_numbers<[1], [1], [0], [0], [0, 0, 1, 0], [], []>} : vector<8x4xf32>, vector<8x4xf32>, vector<8x8xf32> -> vector<8x8xf32>
    %364 = arith.mulf %363, %363 : vector<8x8xf32>
    %365 = arith.mulf %364, %364 : vector<8x8xf32>
    %cst_145 = arith.constant dense<0.000000e+00> : vector<8x4xf32>
    %366 = tpu.matmul %365, %354, %cst_145 {dimension_numbers = #tpu.dot_dimension_numbers<[1], [0], [0], [1], [0, 0, 1, 1], [], []>} : vector<8x8xf32>, vector<8x4xf32>, vector<8x4xf32> -> vector<8x4xf32>
    %cst_146 = arith.constant dense<0.000000e+00> : vector<8x24xf32>
    %367 = tpu.matmul %366, %1, %cst_146 {dimension_numbers = #tpu.dot_dimension_numbers<[1], [0], [0], [1], [0, 0, 1, 1], [], []>} : vector<8x4xf32>, vector<4x24xf32>, vector<8x24xf32> -> vector<8x24xf32>
    %368 = vector.extract_strided_slice %367 {offsets = [0, 0], sizes = [8, 8], strides = [1, 1]} : vector<8x24xf32> to vector<8x8xf32>
    %cst_147 = arith.constant dense<0.000000e+00> : vector<8x8xf32>
    %369 = tpu.matmul %368, %368, %cst_147 {dimension_numbers = #tpu.dot_dimension_numbers<[1], [1], [0], [0], [0, 0, 1, 0], [], []>} : vector<8x8xf32>, vector<8x8xf32>, vector<8x8xf32> -> vector<8x8xf32>
    %cst_148 = arith.constant dense<0xFF800000> : vector<8xf32>
    %370 = vector.multi_reduction <maximumf>, %369, %cst_148 [1] : vector<8x8xf32> to vector<8xf32>
    %371 = vector.shape_cast %370 : vector<8xf32> to vector<8x1xf32>
    %372 = vector.broadcast %371 : vector<8x1xf32> to vector<8x8xf32>
    %373 = arith.subf %369, %372 : vector<8x8xf32>
    %374 = math.exp %373 : vector<8x8xf32>
    %cst_149 = arith.constant dense<0.000000e+00> : vector<8xf32>
    %375 = vector.multi_reduction <add>, %374, %cst_149 [1] : vector<8x8xf32> to vector<8xf32>
    %376 = vector.shape_cast %375 : vector<8xf32> to vector<8x1xf32>
    %377 = vector.broadcast %376 : vector<8x1xf32> to vector<8x8xf32>
    %378 = arith.divf %374, %377 : vector<8x8xf32>
    %cst_150 = arith.constant dense<0.000000e+00> : vector<8x8xf32>
    %379 = tpu.matmul %378, %368, %cst_150 {dimension_numbers = #tpu.dot_dimension_numbers<[1], [0], [0], [1], [0, 0, 1, 1], [], []>} : vector<8x8xf32>, vector<8x8xf32>, vector<8x8xf32> -> vector<8x8xf32>
    %380 = vector.extract_strided_slice %367 {offsets = [0, 8], sizes = [8, 8], strides = [1, 1]} : vector<8x24xf32> to vector<8x8xf32>
    %cst_151 = arith.constant dense<0.000000e+00> : vector<8x8xf32>
    %381 = tpu.matmul %380, %380, %cst_151 {dimension_numbers = #tpu.dot_dimension_numbers<[1], [1], [0], [0], [0, 0, 1, 0], [], []>} : vector<8x8xf32>, vector<8x8xf32>, vector<8x8xf32> -> vector<8x8xf32>
    %cst_152 = arith.constant dense<0xFF800000> : vector<8xf32>
    %382 = vector.multi_reduction <maximumf>, %381, %cst_152 [1] : vector<8x8xf32> to vector<8xf32>
    %383 = vector.shape_cast %382 : vector<8xf32> to vector<8x1xf32>
    %384 = vector.broadcast %383 : vector<8x1xf32> to vector<8x8xf32>
    %385 = arith.subf %381, %384 : vector<8x8xf32>
    %386 = math.exp %385 : vector<8x8xf32>
    %cst_153 = arith.constant dense<0.000000e+00> : vector<8xf32>
    %387 = vector.multi_reduction <add>, %386, %cst_153 [1] : vector<8x8xf32> to vector<8xf32>
    %388 = vector.shape_cast %387 : vector<8xf32> to vector<8x1xf32>
    %389 = vector.broadcast %388 : vector<8x1xf32> to vector<8x8xf32>
    %390 = arith.divf %386, %389 : vector<8x8xf32>
    %cst_154 = arith.constant dense<0.000000e+00> : vector<8x8xf32>
    %391 = tpu.matmul %390, %380, %cst_154 {dimension_numbers = #tpu.dot_dimension_numbers<[1], [0], [0], [1], [0, 0, 1, 1], [], []>} : vector<8x8xf32>, vector<8x8xf32>, vector<8x8xf32> -> vector<8x8xf32>
    %392 = vector.extract_strided_slice %367 {offsets = [0, 16], sizes = [8, 8], strides = [1, 1]} : vector<8x24xf32> to vector<8x8xf32>
    %cst_155 = arith.constant dense<0.000000e+00> : vector<8x8xf32>
    %393 = tpu.matmul %392, %392, %cst_155 {dimension_numbers = #tpu.dot_dimension_numbers<[1], [1], [0], [0], [0, 0, 1, 0], [], []>} : vector<8x8xf32>, vector<8x8xf32>, vector<8x8xf32> -> vector<8x8xf32>
    %cst_156 = arith.constant dense<0xFF800000> : vector<8xf32>
    %394 = vector.multi_reduction <maximumf>, %393, %cst_156 [1] : vector<8x8xf32> to vector<8xf32>
    %395 = vector.shape_cast %394 : vector<8xf32> to vector<8x1xf32>
    %396 = vector.broadcast %395 : vector<8x1xf32> to vector<8x8xf32>
    %397 = arith.subf %393, %396 : vector<8x8xf32>
    %398 = math.exp %397 : vector<8x8xf32>
    %cst_157 = arith.constant dense<0.000000e+00> : vector<8xf32>
    %399 = vector.multi_reduction <add>, %398, %cst_157 [1] : vector<8x8xf32> to vector<8xf32>
    %400 = vector.shape_cast %399 : vector<8xf32> to vector<8x1xf32>
    %401 = vector.broadcast %400 : vector<8x1xf32> to vector<8x8xf32>
    %402 = arith.divf %398, %401 : vector<8x8xf32>
    %cst_158 = arith.constant dense<0.000000e+00> : vector<8x8xf32>
    %403 = tpu.matmul %402, %392, %cst_158 {dimension_numbers = #tpu.dot_dimension_numbers<[1], [0], [0], [1], [0, 0, 1, 1], [], []>} : vector<8x8xf32>, vector<8x8xf32>, vector<8x8xf32> -> vector<8x8xf32>
    %404 = tpu.concatenate %379, %391, %403 in 1 : vector<8x8xf32>, vector<8x8xf32>, vector<8x8xf32> -> vector<8x24xf32>
    %cst_159 = arith.constant 0.000000e+00 : f32
    %405 = vector.broadcast %cst_159 : f32 to vector<8x24xf32>
    %406 = arith.maximumf %404, %405 : vector<8x24xf32>
    %cst_160 = arith.constant dense<0.000000e+00> : vector<8x16xf32>
    %407 = tpu.matmul %406, %2, %cst_160 {dimension_numbers = #tpu.dot_dimension_numbers<[1], [0], [0], [1], [0, 0, 1, 1], [], []>} : vector<8x24xf32>, vector<24x16xf32>, vector<8x16xf32> -> vector<8x16xf32>
    %cst_161 = arith.constant dense<0.000000e+00> : vector<8x8xf32>
    %408 = tpu.matmul %407, %407, %cst_161 {dimension_numbers = #tpu.dot_dimension_numbers<[1], [1], [0], [0], [0, 0, 1, 0], [], []>} : vector<8x16xf32>, vector<8x16xf32>, vector<8x8xf32> -> vector<8x8xf32>
    %cst_162 = arith.constant dense<0xFF800000> : vector<8xf32>
    %409 = vector.multi_reduction <maximumf>, %408, %cst_162 [1] : vector<8x8xf32> to vector<8xf32>
    %410 = vector.shape_cast %409 : vector<8xf32> to vector<8x1xf32>
    %411 = vector.broadcast %410 : vector<8x1xf32> to vector<8x8xf32>
    %412 = arith.subf %408, %411 : vector<8x8xf32>
    %413 = math.exp %412 : vector<8x8xf32>
    %cst_163 = arith.constant dense<0.000000e+00> : vector<8xf32>
    %414 = vector.multi_reduction <add>, %413, %cst_163 [1] : vector<8x8xf32> to vector<8xf32>
    %415 = vector.shape_cast %414 : vector<8xf32> to vector<8x1xf32>
    %416 = vector.broadcast %415 : vector<8x1xf32> to vector<8x8xf32>
    %417 = arith.divf %413, %416 : vector<8x8xf32>
    %cst_164 = arith.constant dense<0.000000e+00> : vector<8x16xf32>
    %418 = tpu.matmul %417, %407, %cst_164 {dimension_numbers = #tpu.dot_dimension_numbers<[1], [0], [0], [1], [0, 0, 1, 1], [], []>} : vector<8x8xf32>, vector<8x16xf32>, vector<8x16xf32> -> vector<8x16xf32>
    %cst_165 = arith.constant 0.000000e+00 : f32
    %419 = vector.broadcast %cst_165 : f32 to vector<8x16xf32>
    %420 = arith.maximumf %418, %419 : vector<8x16xf32>
    %cst_166 = arith.constant dense<0xFF800000> : vector<16xf32>
    %421 = vector.multi_reduction <maximumf>, %420, %cst_166 [0] : vector<8x16xf32> to vector<16xf32>
    %422 = vector.shape_cast %421 : vector<16xf32> to vector<1x16xf32>
    %c6 = arith.constant 6 : index
    %c0_167 = arith.constant 0 : index
    %c0_168 = arith.constant 0 : index
    %423 = vector.load %arg1[%c6, %c0_167, %c0_168] : memref<8x8x4xf32, #tpu.memory_space<vmem>>, vector<1x8x4xf32>
    %424 = vector.shape_cast %423 : vector<1x8x4xf32> to vector<8x4xf32>
    %425 = arith.mulf %424, %424 : vector<8x4xf32>
    %cst_169 = arith.constant dense<0.000000e+00> : vector<8xf32>
    %426 = vector.multi_reduction <add>, %425, %cst_169 [1] : vector<8x4xf32> to vector<8xf32>
    %427 = vector.shape_cast %426 : vector<8xf32> to vector<8x1xf32>
    %cst_170 = arith.constant 9.99999996E-13 : f32
    %428 = vector.broadcast %cst_170 : f32 to vector<8x1xf32>
    %429 = arith.addf %427, %428 : vector<8x1xf32>
    %430 = math.rsqrt %429 : vector<8x1xf32>
    %431 = vector.broadcast %430 : vector<8x1xf32> to vector<8x4xf32>
    %432 = arith.mulf %424, %431 : vector<8x4xf32>
    %cst_171 = arith.constant dense<0.000000e+00> : vector<8x8xf32>
    %433 = tpu.matmul %432, %432, %cst_171 {dimension_numbers = #tpu.dot_dimension_numbers<[1], [1], [0], [0], [0, 0, 1, 0], [], []>} : vector<8x4xf32>, vector<8x4xf32>, vector<8x8xf32> -> vector<8x8xf32>
    %434 = arith.mulf %433, %433 : vector<8x8xf32>
    %435 = arith.mulf %434, %434 : vector<8x8xf32>
    %cst_172 = arith.constant dense<0.000000e+00> : vector<8x4xf32>
    %436 = tpu.matmul %435, %424, %cst_172 {dimension_numbers = #tpu.dot_dimension_numbers<[1], [0], [0], [1], [0, 0, 1, 1], [], []>} : vector<8x8xf32>, vector<8x4xf32>, vector<8x4xf32> -> vector<8x4xf32>
    %cst_173 = arith.constant dense<0.000000e+00> : vector<8x24xf32>
    %437 = tpu.matmul %436, %1, %cst_173 {dimension_numbers = #tpu.dot_dimension_numbers<[1], [0], [0], [1], [0, 0, 1, 1], [], []>} : vector<8x4xf32>, vector<4x24xf32>, vector<8x24xf32> -> vector<8x24xf32>
    %438 = vector.extract_strided_slice %437 {offsets = [0, 0], sizes = [8, 8], strides = [1, 1]} : vector<8x24xf32> to vector<8x8xf32>
    %cst_174 = arith.constant dense<0.000000e+00> : vector<8x8xf32>
    %439 = tpu.matmul %438, %438, %cst_174 {dimension_numbers = #tpu.dot_dimension_numbers<[1], [1], [0], [0], [0, 0, 1, 0], [], []>} : vector<8x8xf32>, vector<8x8xf32>, vector<8x8xf32> -> vector<8x8xf32>
    %cst_175 = arith.constant dense<0xFF800000> : vector<8xf32>
    %440 = vector.multi_reduction <maximumf>, %439, %cst_175 [1] : vector<8x8xf32> to vector<8xf32>
    %441 = vector.shape_cast %440 : vector<8xf32> to vector<8x1xf32>
    %442 = vector.broadcast %441 : vector<8x1xf32> to vector<8x8xf32>
    %443 = arith.subf %439, %442 : vector<8x8xf32>
    %444 = math.exp %443 : vector<8x8xf32>
    %cst_176 = arith.constant dense<0.000000e+00> : vector<8xf32>
    %445 = vector.multi_reduction <add>, %444, %cst_176 [1] : vector<8x8xf32> to vector<8xf32>
    %446 = vector.shape_cast %445 : vector<8xf32> to vector<8x1xf32>
    %447 = vector.broadcast %446 : vector<8x1xf32> to vector<8x8xf32>
    %448 = arith.divf %444, %447 : vector<8x8xf32>
    %cst_177 = arith.constant dense<0.000000e+00> : vector<8x8xf32>
    %449 = tpu.matmul %448, %438, %cst_177 {dimension_numbers = #tpu.dot_dimension_numbers<[1], [0], [0], [1], [0, 0, 1, 1], [], []>} : vector<8x8xf32>, vector<8x8xf32>, vector<8x8xf32> -> vector<8x8xf32>
    %450 = vector.extract_strided_slice %437 {offsets = [0, 8], sizes = [8, 8], strides = [1, 1]} : vector<8x24xf32> to vector<8x8xf32>
    %cst_178 = arith.constant dense<0.000000e+00> : vector<8x8xf32>
    %451 = tpu.matmul %450, %450, %cst_178 {dimension_numbers = #tpu.dot_dimension_numbers<[1], [1], [0], [0], [0, 0, 1, 0], [], []>} : vector<8x8xf32>, vector<8x8xf32>, vector<8x8xf32> -> vector<8x8xf32>
    %cst_179 = arith.constant dense<0xFF800000> : vector<8xf32>
    %452 = vector.multi_reduction <maximumf>, %451, %cst_179 [1] : vector<8x8xf32> to vector<8xf32>
    %453 = vector.shape_cast %452 : vector<8xf32> to vector<8x1xf32>
    %454 = vector.broadcast %453 : vector<8x1xf32> to vector<8x8xf32>
    %455 = arith.subf %451, %454 : vector<8x8xf32>
    %456 = math.exp %455 : vector<8x8xf32>
    %cst_180 = arith.constant dense<0.000000e+00> : vector<8xf32>
    %457 = vector.multi_reduction <add>, %456, %cst_180 [1] : vector<8x8xf32> to vector<8xf32>
    %458 = vector.shape_cast %457 : vector<8xf32> to vector<8x1xf32>
    %459 = vector.broadcast %458 : vector<8x1xf32> to vector<8x8xf32>
    %460 = arith.divf %456, %459 : vector<8x8xf32>
    %cst_181 = arith.constant dense<0.000000e+00> : vector<8x8xf32>
    %461 = tpu.matmul %460, %450, %cst_181 {dimension_numbers = #tpu.dot_dimension_numbers<[1], [0], [0], [1], [0, 0, 1, 1], [], []>} : vector<8x8xf32>, vector<8x8xf32>, vector<8x8xf32> -> vector<8x8xf32>
    %462 = vector.extract_strided_slice %437 {offsets = [0, 16], sizes = [8, 8], strides = [1, 1]} : vector<8x24xf32> to vector<8x8xf32>
    %cst_182 = arith.constant dense<0.000000e+00> : vector<8x8xf32>
    %463 = tpu.matmul %462, %462, %cst_182 {dimension_numbers = #tpu.dot_dimension_numbers<[1], [1], [0], [0], [0, 0, 1, 0], [], []>} : vector<8x8xf32>, vector<8x8xf32>, vector<8x8xf32> -> vector<8x8xf32>
    %cst_183 = arith.constant dense<0xFF800000> : vector<8xf32>
    %464 = vector.multi_reduction <maximumf>, %463, %cst_183 [1] : vector<8x8xf32> to vector<8xf32>
    %465 = vector.shape_cast %464 : vector<8xf32> to vector<8x1xf32>
    %466 = vector.broadcast %465 : vector<8x1xf32> to vector<8x8xf32>
    %467 = arith.subf %463, %466 : vector<8x8xf32>
    %468 = math.exp %467 : vector<8x8xf32>
    %cst_184 = arith.constant dense<0.000000e+00> : vector<8xf32>
    %469 = vector.multi_reduction <add>, %468, %cst_184 [1] : vector<8x8xf32> to vector<8xf32>
    %470 = vector.shape_cast %469 : vector<8xf32> to vector<8x1xf32>
    %471 = vector.broadcast %470 : vector<8x1xf32> to vector<8x8xf32>
    %472 = arith.divf %468, %471 : vector<8x8xf32>
    %cst_185 = arith.constant dense<0.000000e+00> : vector<8x8xf32>
    %473 = tpu.matmul %472, %462, %cst_185 {dimension_numbers = #tpu.dot_dimension_numbers<[1], [0], [0], [1], [0, 0, 1, 1], [], []>} : vector<8x8xf32>, vector<8x8xf32>, vector<8x8xf32> -> vector<8x8xf32>
    %474 = tpu.concatenate %449, %461, %473 in 1 : vector<8x8xf32>, vector<8x8xf32>, vector<8x8xf32> -> vector<8x24xf32>
    %cst_186 = arith.constant 0.000000e+00 : f32
    %475 = vector.broadcast %cst_186 : f32 to vector<8x24xf32>
    %476 = arith.maximumf %474, %475 : vector<8x24xf32>
    %cst_187 = arith.constant dense<0.000000e+00> : vector<8x16xf32>
    %477 = tpu.matmul %476, %2, %cst_187 {dimension_numbers = #tpu.dot_dimension_numbers<[1], [0], [0], [1], [0, 0, 1, 1], [], []>} : vector<8x24xf32>, vector<24x16xf32>, vector<8x16xf32> -> vector<8x16xf32>
    %cst_188 = arith.constant dense<0.000000e+00> : vector<8x8xf32>
    %478 = tpu.matmul %477, %477, %cst_188 {dimension_numbers = #tpu.dot_dimension_numbers<[1], [1], [0], [0], [0, 0, 1, 0], [], []>} : vector<8x16xf32>, vector<8x16xf32>, vector<8x8xf32> -> vector<8x8xf32>
    %cst_189 = arith.constant dense<0xFF800000> : vector<8xf32>
    %479 = vector.multi_reduction <maximumf>, %478, %cst_189 [1] : vector<8x8xf32> to vector<8xf32>
    %480 = vector.shape_cast %479 : vector<8xf32> to vector<8x1xf32>
    %481 = vector.broadcast %480 : vector<8x1xf32> to vector<8x8xf32>
    %482 = arith.subf %478, %481 : vector<8x8xf32>
    %483 = math.exp %482 : vector<8x8xf32>
    %cst_190 = arith.constant dense<0.000000e+00> : vector<8xf32>
    %484 = vector.multi_reduction <add>, %483, %cst_190 [1] : vector<8x8xf32> to vector<8xf32>
    %485 = vector.shape_cast %484 : vector<8xf32> to vector<8x1xf32>
    %486 = vector.broadcast %485 : vector<8x1xf32> to vector<8x8xf32>
    %487 = arith.divf %483, %486 : vector<8x8xf32>
    %cst_191 = arith.constant dense<0.000000e+00> : vector<8x16xf32>
    %488 = tpu.matmul %487, %477, %cst_191 {dimension_numbers = #tpu.dot_dimension_numbers<[1], [0], [0], [1], [0, 0, 1, 1], [], []>} : vector<8x8xf32>, vector<8x16xf32>, vector<8x16xf32> -> vector<8x16xf32>
    %cst_192 = arith.constant 0.000000e+00 : f32
    %489 = vector.broadcast %cst_192 : f32 to vector<8x16xf32>
    %490 = arith.maximumf %488, %489 : vector<8x16xf32>
    %cst_193 = arith.constant dense<0xFF800000> : vector<16xf32>
    %491 = vector.multi_reduction <maximumf>, %490, %cst_193 [0] : vector<8x16xf32> to vector<16xf32>
    %492 = vector.shape_cast %491 : vector<16xf32> to vector<1x16xf32>
    %c7 = arith.constant 7 : index
    %c0_194 = arith.constant 0 : index
    %c0_195 = arith.constant 0 : index
    %493 = vector.load %arg1[%c7, %c0_194, %c0_195] : memref<8x8x4xf32, #tpu.memory_space<vmem>>, vector<1x8x4xf32>
    %494 = vector.shape_cast %493 : vector<1x8x4xf32> to vector<8x4xf32>
    %495 = arith.mulf %494, %494 : vector<8x4xf32>
    %cst_196 = arith.constant dense<0.000000e+00> : vector<8xf32>
    %496 = vector.multi_reduction <add>, %495, %cst_196 [1] : vector<8x4xf32> to vector<8xf32>
    %497 = vector.shape_cast %496 : vector<8xf32> to vector<8x1xf32>
    %cst_197 = arith.constant 9.99999996E-13 : f32
    %498 = vector.broadcast %cst_197 : f32 to vector<8x1xf32>
    %499 = arith.addf %497, %498 : vector<8x1xf32>
    %500 = math.rsqrt %499 : vector<8x1xf32>
    %501 = vector.broadcast %500 : vector<8x1xf32> to vector<8x4xf32>
    %502 = arith.mulf %494, %501 : vector<8x4xf32>
    %cst_198 = arith.constant dense<0.000000e+00> : vector<8x8xf32>
    %503 = tpu.matmul %502, %502, %cst_198 {dimension_numbers = #tpu.dot_dimension_numbers<[1], [1], [0], [0], [0, 0, 1, 0], [], []>} : vector<8x4xf32>, vector<8x4xf32>, vector<8x8xf32> -> vector<8x8xf32>
    %504 = arith.mulf %503, %503 : vector<8x8xf32>
    %505 = arith.mulf %504, %504 : vector<8x8xf32>
    %cst_199 = arith.constant dense<0.000000e+00> : vector<8x4xf32>
    %506 = tpu.matmul %505, %494, %cst_199 {dimension_numbers = #tpu.dot_dimension_numbers<[1], [0], [0], [1], [0, 0, 1, 1], [], []>} : vector<8x8xf32>, vector<8x4xf32>, vector<8x4xf32> -> vector<8x4xf32>
    %cst_200 = arith.constant dense<0.000000e+00> : vector<8x24xf32>
    %507 = tpu.matmul %506, %1, %cst_200 {dimension_numbers = #tpu.dot_dimension_numbers<[1], [0], [0], [1], [0, 0, 1, 1], [], []>} : vector<8x4xf32>, vector<4x24xf32>, vector<8x24xf32> -> vector<8x24xf32>
    %508 = vector.extract_strided_slice %507 {offsets = [0, 0], sizes = [8, 8], strides = [1, 1]} : vector<8x24xf32> to vector<8x8xf32>
    %cst_201 = arith.constant dense<0.000000e+00> : vector<8x8xf32>
    %509 = tpu.matmul %508, %508, %cst_201 {dimension_numbers = #tpu.dot_dimension_numbers<[1], [1], [0], [0], [0, 0, 1, 0], [], []>} : vector<8x8xf32>, vector<8x8xf32>, vector<8x8xf32> -> vector<8x8xf32>
    %cst_202 = arith.constant dense<0xFF800000> : vector<8xf32>
    %510 = vector.multi_reduction <maximumf>, %509, %cst_202 [1] : vector<8x8xf32> to vector<8xf32>
    %511 = vector.shape_cast %510 : vector<8xf32> to vector<8x1xf32>
    %512 = vector.broadcast %511 : vector<8x1xf32> to vector<8x8xf32>
    %513 = arith.subf %509, %512 : vector<8x8xf32>
    %514 = math.exp %513 : vector<8x8xf32>
    %cst_203 = arith.constant dense<0.000000e+00> : vector<8xf32>
    %515 = vector.multi_reduction <add>, %514, %cst_203 [1] : vector<8x8xf32> to vector<8xf32>
    %516 = vector.shape_cast %515 : vector<8xf32> to vector<8x1xf32>
    %517 = vector.broadcast %516 : vector<8x1xf32> to vector<8x8xf32>
    %518 = arith.divf %514, %517 : vector<8x8xf32>
    %cst_204 = arith.constant dense<0.000000e+00> : vector<8x8xf32>
    %519 = tpu.matmul %518, %508, %cst_204 {dimension_numbers = #tpu.dot_dimension_numbers<[1], [0], [0], [1], [0, 0, 1, 1], [], []>} : vector<8x8xf32>, vector<8x8xf32>, vector<8x8xf32> -> vector<8x8xf32>
    %520 = vector.extract_strided_slice %507 {offsets = [0, 8], sizes = [8, 8], strides = [1, 1]} : vector<8x24xf32> to vector<8x8xf32>
    %cst_205 = arith.constant dense<0.000000e+00> : vector<8x8xf32>
    %521 = tpu.matmul %520, %520, %cst_205 {dimension_numbers = #tpu.dot_dimension_numbers<[1], [1], [0], [0], [0, 0, 1, 0], [], []>} : vector<8x8xf32>, vector<8x8xf32>, vector<8x8xf32> -> vector<8x8xf32>
    %cst_206 = arith.constant dense<0xFF800000> : vector<8xf32>
    %522 = vector.multi_reduction <maximumf>, %521, %cst_206 [1] : vector<8x8xf32> to vector<8xf32>
    %523 = vector.shape_cast %522 : vector<8xf32> to vector<8x1xf32>
    %524 = vector.broadcast %523 : vector<8x1xf32> to vector<8x8xf32>
    %525 = arith.subf %521, %524 : vector<8x8xf32>
    %526 = math.exp %525 : vector<8x8xf32>
    %cst_207 = arith.constant dense<0.000000e+00> : vector<8xf32>
    %527 = vector.multi_reduction <add>, %526, %cst_207 [1] : vector<8x8xf32> to vector<8xf32>
    %528 = vector.shape_cast %527 : vector<8xf32> to vector<8x1xf32>
    %529 = vector.broadcast %528 : vector<8x1xf32> to vector<8x8xf32>
    %530 = arith.divf %526, %529 : vector<8x8xf32>
    %cst_208 = arith.constant dense<0.000000e+00> : vector<8x8xf32>
    %531 = tpu.matmul %530, %520, %cst_208 {dimension_numbers = #tpu.dot_dimension_numbers<[1], [0], [0], [1], [0, 0, 1, 1], [], []>} : vector<8x8xf32>, vector<8x8xf32>, vector<8x8xf32> -> vector<8x8xf32>
    %532 = vector.extract_strided_slice %507 {offsets = [0, 16], sizes = [8, 8], strides = [1, 1]} : vector<8x24xf32> to vector<8x8xf32>
    %cst_209 = arith.constant dense<0.000000e+00> : vector<8x8xf32>
    %533 = tpu.matmul %532, %532, %cst_209 {dimension_numbers = #tpu.dot_dimension_numbers<[1], [1], [0], [0], [0, 0, 1, 0], [], []>} : vector<8x8xf32>, vector<8x8xf32>, vector<8x8xf32> -> vector<8x8xf32>
    %cst_210 = arith.constant dense<0xFF800000> : vector<8xf32>
    %534 = vector.multi_reduction <maximumf>, %533, %cst_210 [1] : vector<8x8xf32> to vector<8xf32>
    %535 = vector.shape_cast %534 : vector<8xf32> to vector<8x1xf32>
    %536 = vector.broadcast %535 : vector<8x1xf32> to vector<8x8xf32>
    %537 = arith.subf %533, %536 : vector<8x8xf32>
    %538 = math.exp %537 : vector<8x8xf32>
    %cst_211 = arith.constant dense<0.000000e+00> : vector<8xf32>
    %539 = vector.multi_reduction <add>, %538, %cst_211 [1] : vector<8x8xf32> to vector<8xf32>
    %540 = vector.shape_cast %539 : vector<8xf32> to vector<8x1xf32>
    %541 = vector.broadcast %540 : vector<8x1xf32> to vector<8x8xf32>
    %542 = arith.divf %538, %541 : vector<8x8xf32>
    %cst_212 = arith.constant dense<0.000000e+00> : vector<8x8xf32>
    %543 = tpu.matmul %542, %532, %cst_212 {dimension_numbers = #tpu.dot_dimension_numbers<[1], [0], [0], [1], [0, 0, 1, 1], [], []>} : vector<8x8xf32>, vector<8x8xf32>, vector<8x8xf32> -> vector<8x8xf32>
    %544 = tpu.concatenate %519, %531, %543 in 1 : vector<8x8xf32>, vector<8x8xf32>, vector<8x8xf32> -> vector<8x24xf32>
    %cst_213 = arith.constant 0.000000e+00 : f32
    %545 = vector.broadcast %cst_213 : f32 to vector<8x24xf32>
    %546 = arith.maximumf %544, %545 : vector<8x24xf32>
    %cst_214 = arith.constant dense<0.000000e+00> : vector<8x16xf32>
    %547 = tpu.matmul %546, %2, %cst_214 {dimension_numbers = #tpu.dot_dimension_numbers<[1], [0], [0], [1], [0, 0, 1, 1], [], []>} : vector<8x24xf32>, vector<24x16xf32>, vector<8x16xf32> -> vector<8x16xf32>
    %cst_215 = arith.constant dense<0.000000e+00> : vector<8x8xf32>
    %548 = tpu.matmul %547, %547, %cst_215 {dimension_numbers = #tpu.dot_dimension_numbers<[1], [1], [0], [0], [0, 0, 1, 0], [], []>} : vector<8x16xf32>, vector<8x16xf32>, vector<8x8xf32> -> vector<8x8xf32>
    %cst_216 = arith.constant dense<0xFF800000> : vector<8xf32>
    %549 = vector.multi_reduction <maximumf>, %548, %cst_216 [1] : vector<8x8xf32> to vector<8xf32>
    %550 = vector.shape_cast %549 : vector<8xf32> to vector<8x1xf32>
    %551 = vector.broadcast %550 : vector<8x1xf32> to vector<8x8xf32>
    %552 = arith.subf %548, %551 : vector<8x8xf32>
    %553 = math.exp %552 : vector<8x8xf32>
    %cst_217 = arith.constant dense<0.000000e+00> : vector<8xf32>
    %554 = vector.multi_reduction <add>, %553, %cst_217 [1] : vector<8x8xf32> to vector<8xf32>
    %555 = vector.shape_cast %554 : vector<8xf32> to vector<8x1xf32>
    %556 = vector.broadcast %555 : vector<8x1xf32> to vector<8x8xf32>
    %557 = arith.divf %553, %556 : vector<8x8xf32>
    %cst_218 = arith.constant dense<0.000000e+00> : vector<8x16xf32>
    %558 = tpu.matmul %557, %547, %cst_218 {dimension_numbers = #tpu.dot_dimension_numbers<[1], [0], [0], [1], [0, 0, 1, 1], [], []>} : vector<8x8xf32>, vector<8x16xf32>, vector<8x16xf32> -> vector<8x16xf32>
    %cst_219 = arith.constant 0.000000e+00 : f32
    %559 = vector.broadcast %cst_219 : f32 to vector<8x16xf32>
    %560 = arith.maximumf %558, %559 : vector<8x16xf32>
    %cst_220 = arith.constant dense<0xFF800000> : vector<16xf32>
    %561 = vector.multi_reduction <maximumf>, %560, %cst_220 [0] : vector<8x16xf32> to vector<16xf32>
    %562 = vector.shape_cast %561 : vector<16xf32> to vector<1x16xf32>
    %563 = tpu.concatenate %72, %142, %212, %282, %352, %422, %492, %562 in 0 : vector<1x16xf32>, vector<1x16xf32>, vector<1x16xf32>, vector<1x16xf32>, vector<1x16xf32>, vector<1x16xf32>, vector<1x16xf32>, vector<1x16xf32> -> vector<8x16xf32>
    %c0_221 = arith.constant 0 : index
    %c0_222 = arith.constant 0 : index
    %564 = vector.load %arg6[%c0_221, %c0_222] : memref<16x96xf32, #tpu.memory_space<vmem>>, vector<16x96xf32>
    %cst_223 = arith.constant dense<0.000000e+00> : vector<8x96xf32>
    %565 = tpu.matmul %563, %564, %cst_223 {dimension_numbers = #tpu.dot_dimension_numbers<[1], [0], [0], [1], [0, 0, 1, 1], [], []>} : vector<8x16xf32>, vector<16x96xf32>, vector<8x96xf32> -> vector<8x96xf32>
    %c0_224 = arith.constant 0 : index
    %c0_225 = arith.constant 0 : index
    %566 = vector.load %arg7[%c0_224, %c0_225] : memref<1x96xf32, #tpu.memory_space<vmem>>, vector<1x96xf32>
    %567 = vector.broadcast %566 : vector<1x96xf32> to vector<8x96xf32>
    %568 = arith.addf %565, %567 : vector<8x96xf32>
    %569 = vector.extract_strided_slice %0 {offsets = [0, 0], sizes = [8, 2], strides = [1, 1]} : vector<8x8xf32> to vector<8x2xf32>
    %c0_226 = arith.constant 0 : index
    %c0_227 = arith.constant 0 : index
    %570 = vector.load %arg8[%c0_226, %c0_227] : memref<2x128xf32, #tpu.memory_space<vmem>>, vector<2x128xf32>
    %cst_228 = arith.constant dense<0.000000e+00> : vector<8x128xf32>
    %571 = tpu.matmul %569, %570, %cst_228 {dimension_numbers = #tpu.dot_dimension_numbers<[1], [0], [0], [1], [0, 0, 1, 1], [], []>} : vector<8x2xf32>, vector<2x128xf32>, vector<8x128xf32> -> vector<8x128xf32>
    %c0_229 = arith.constant 0 : index
    %c0_230 = arith.constant 0 : index
    %572 = vector.load %arg9[%c0_229, %c0_230] : memref<1x128xf32, #tpu.memory_space<vmem>>, vector<1x128xf32>
    %573 = vector.broadcast %572 : vector<1x128xf32> to vector<8x128xf32>
    %574 = arith.addf %571, %573 : vector<8x128xf32>
    %c0_i32 = arith.constant 0 : i32
    %575 = arith.cmpi eq, %arg0, %c0_i32 : i32
    %576 = arith.extui %575 : i1 to i32
    %c0_i32_231 = arith.constant 0 : i32
    %577 = arith.cmpi ne, %576, %c0_i32_231 : i32
    scf.if %577 {
      %c0_289 = arith.constant 0 : index
      %c0_290 = arith.constant 0 : index
      %897 = vector.load %arg3[%c0_289, %c0_290] : memref<1x32xf32, #tpu.memory_space<vmem>>, vector<1x32xf32>
      %c0_291 = arith.constant 0 : index
      %c0_292 = arith.constant 0 : index
      %898 = vector.load %arg15[%c0_291, %c0_292] : memref<1x32xf32, #tpu.memory_space<vmem>>, vector<1x32xf32>
      tpu.vector_store %arg15[%c0_291, %c0_292], %897 {strides = array<i32>} : memref<1x32xf32, #tpu.memory_space<vmem>>, vector<1x32xf32>,
    } else {
    }
    %c0_232 = arith.constant 0 : index
    %c0_233 = arith.constant 0 : index
    %578 = vector.load %arg10[%c0_232, %c0_233] : memref<32x96xf32, #tpu.memory_space<vmem>>, vector<32x96xf32>
    %c0_234 = arith.constant 0 : index
    %c0_235 = arith.constant 0 : index
    %579 = vector.load %arg11[%c0_234, %c0_235] : memref<1x96xf32, #tpu.memory_space<vmem>>, vector<1x96xf32>
    %c0_236 = arith.constant 0 : index
    %c0_237 = arith.constant 0 : index
    %580 = vector.load %arg12[%c0_236, %c0_237] : memref<32x128xf32, #tpu.memory_space<vmem>>, vector<32x128xf32>
    %c0_238 = arith.constant 0 : index
    %c0_239 = arith.constant 0 : index
    %581 = vector.load %arg15[%c0_238, %c0_239] : memref<1x32xf32, #tpu.memory_space<vmem>>, vector<1x32xf32>
    %582 = vector.extract_strided_slice %568 {offsets = [0, 0], sizes = [1, 96], strides = [1, 1]} : vector<8x96xf32> to vector<1x96xf32>
    %cst_240 = arith.constant dense<0.000000e+00> : vector<1x96xf32>
    %583 = tpu.matmul %581, %578, %cst_240 {dimension_numbers = #tpu.dot_dimension_numbers<[1], [0], [0], [1], [0, 0, 1, 1], [], []>} : vector<1x32xf32>, vector<32x96xf32>, vector<1x96xf32> -> vector<1x96xf32>
    %584 = arith.addf %583, %579 : vector<1x96xf32>
    %585 = vector.extract_strided_slice %582 {offsets = [0, 0], sizes = [1, 32], strides = [1, 1]} : vector<1x96xf32> to vector<1x32xf32>
    %586 = vector.extract_strided_slice %584 {offsets = [0, 0], sizes = [1, 32], strides = [1, 1]} : vector<1x96xf32> to vector<1x32xf32>
    %587 = arith.addf %585, %586 : vector<1x32xf32>
    %588 = arith.negf %587 : vector<1x32xf32>
    %589 = math.exp %588 : vector<1x32xf32>
    %cst_241 = arith.constant 1.000000e+00 : f32
    %590 = vector.broadcast %cst_241 : f32 to vector<1x32xf32>
    %591 = arith.addf %590, %589 : vector<1x32xf32>
    %592 = arith.divf %590, %591 : vector<1x32xf32>
    %593 = vector.extract_strided_slice %582 {offsets = [0, 32], sizes = [1, 32], strides = [1, 1]} : vector<1x96xf32> to vector<1x32xf32>
    %594 = vector.extract_strided_slice %584 {offsets = [0, 32], sizes = [1, 32], strides = [1, 1]} : vector<1x96xf32> to vector<1x32xf32>
    %595 = arith.addf %593, %594 : vector<1x32xf32>
    %596 = arith.negf %595 : vector<1x32xf32>
    %597 = math.exp %596 : vector<1x32xf32>
    %cst_242 = arith.constant 1.000000e+00 : f32
    %598 = vector.broadcast %cst_242 : f32 to vector<1x32xf32>
    %599 = arith.addf %598, %597 : vector<1x32xf32>
    %600 = arith.divf %598, %599 : vector<1x32xf32>
    %601 = vector.extract_strided_slice %582 {offsets = [0, 64], sizes = [1, 32], strides = [1, 1]} : vector<1x96xf32> to vector<1x32xf32>
    %602 = vector.extract_strided_slice %584 {offsets = [0, 64], sizes = [1, 32], strides = [1, 1]} : vector<1x96xf32> to vector<1x32xf32>
    %603 = arith.mulf %592, %602 : vector<1x32xf32>
    %604 = arith.addf %601, %603 : vector<1x32xf32>
    %605 = math.tanh %604 : vector<1x32xf32>
    %cst_243 = arith.constant 1.000000e+00 : f32
    %606 = vector.broadcast %cst_243 : f32 to vector<1x32xf32>
    %607 = arith.subf %606, %600 : vector<1x32xf32>
    %608 = arith.mulf %607, %605 : vector<1x32xf32>
    %609 = arith.mulf %600, %581 : vector<1x32xf32>
    %610 = arith.addf %608, %609 : vector<1x32xf32>
    %cst_244 = arith.constant dense<0.000000e+00> : vector<1x128xf32>
    %611 = tpu.matmul %610, %580, %cst_244 {dimension_numbers = #tpu.dot_dimension_numbers<[1], [0], [0], [1], [0, 0, 1, 1], [], []>} : vector<1x32xf32>, vector<32x128xf32>, vector<1x128xf32> -> vector<1x128xf32>
    %612 = vector.extract_strided_slice %574 {offsets = [0, 0], sizes = [1, 128], strides = [1, 1]} : vector<8x128xf32> to vector<1x128xf32>
    %613 = arith.addf %611, %612 : vector<1x128xf32>
    %614 = vector.extract_strided_slice %568 {offsets = [1, 0], sizes = [1, 96], strides = [1, 1]} : vector<8x96xf32> to vector<1x96xf32>
    %cst_245 = arith.constant dense<0.000000e+00> : vector<1x96xf32>
    %615 = tpu.matmul %610, %578, %cst_245 {dimension_numbers = #tpu.dot_dimension_numbers<[1], [0], [0], [1], [0, 0, 1, 1], [], []>} : vector<1x32xf32>, vector<32x96xf32>, vector<1x96xf32> -> vector<1x96xf32>
    %616 = arith.addf %615, %579 : vector<1x96xf32>
    %617 = vector.extract_strided_slice %614 {offsets = [0, 0], sizes = [1, 32], strides = [1, 1]} : vector<1x96xf32> to vector<1x32xf32>
    %618 = vector.extract_strided_slice %616 {offsets = [0, 0], sizes = [1, 32], strides = [1, 1]} : vector<1x96xf32> to vector<1x32xf32>
    %619 = arith.addf %617, %618 : vector<1x32xf32>
    %620 = arith.negf %619 : vector<1x32xf32>
    %621 = math.exp %620 : vector<1x32xf32>
    %cst_246 = arith.constant 1.000000e+00 : f32
    %622 = vector.broadcast %cst_246 : f32 to vector<1x32xf32>
    %623 = arith.addf %622, %621 : vector<1x32xf32>
    %624 = arith.divf %622, %623 : vector<1x32xf32>
    %625 = vector.extract_strided_slice %614 {offsets = [0, 32], sizes = [1, 32], strides = [1, 1]} : vector<1x96xf32> to vector<1x32xf32>
    %626 = vector.extract_strided_slice %616 {offsets = [0, 32], sizes = [1, 32], strides = [1, 1]} : vector<1x96xf32> to vector<1x32xf32>
    %627 = arith.addf %625, %626 : vector<1x32xf32>
    %628 = arith.negf %627 : vector<1x32xf32>
    %629 = math.exp %628 : vector<1x32xf32>
    %cst_247 = arith.constant 1.000000e+00 : f32
    %630 = vector.broadcast %cst_247 : f32 to vector<1x32xf32>
    %631 = arith.addf %630, %629 : vector<1x32xf32>
    %632 = arith.divf %630, %631 : vector<1x32xf32>
    %633 = vector.extract_strided_slice %614 {offsets = [0, 64], sizes = [1, 32], strides = [1, 1]} : vector<1x96xf32> to vector<1x32xf32>
    %634 = vector.extract_strided_slice %616 {offsets = [0, 64], sizes = [1, 32], strides = [1, 1]} : vector<1x96xf32> to vector<1x32xf32>
    %635 = arith.mulf %624, %634 : vector<1x32xf32>
    %636 = arith.addf %633, %635 : vector<1x32xf32>
    %637 = math.tanh %636 : vector<1x32xf32>
    %cst_248 = arith.constant 1.000000e+00 : f32
    %638 = vector.broadcast %cst_248 : f32 to vector<1x32xf32>
    %639 = arith.subf %638, %632 : vector<1x32xf32>
    %640 = arith.mulf %639, %637 : vector<1x32xf32>
    %641 = arith.mulf %632, %610 : vector<1x32xf32>
    %642 = arith.addf %640, %641 : vector<1x32xf32>
    %cst_249 = arith.constant dense<0.000000e+00> : vector<1x128xf32>
    %643 = tpu.matmul %642, %580, %cst_249 {dimension_numbers = #tpu.dot_dimension_numbers<[1], [0], [0], [1], [0, 0, 1, 1], [], []>} : vector<1x32xf32>, vector<32x128xf32>, vector<1x128xf32> -> vector<1x128xf32>
    %644 = vector.extract_strided_slice %574 {offsets = [1, 0], sizes = [1, 128], strides = [1, 1]} : vector<8x128xf32> to vector<1x128xf32>
    %645 = arith.addf %643, %644 : vector<1x128xf32>
    %646 = vector.extract_strided_slice %568 {offsets = [2, 0], sizes = [1, 96], strides = [1, 1]} : vector<8x96xf32> to vector<1x96xf32>
    %cst_250 = arith.constant dense<0.000000e+00> : vector<1x96xf32>
    %647 = tpu.matmul %642, %578, %cst_250 {dimension_numbers = #tpu.dot_dimension_numbers<[1], [0], [0], [1], [0, 0, 1, 1], [], []>} : vector<1x32xf32>, vector<32x96xf32>, vector<1x96xf32> -> vector<1x96xf32>
    %648 = arith.addf %647, %579 : vector<1x96xf32>
    %649 = vector.extract_strided_slice %646 {offsets = [0, 0], sizes = [1, 32], strides = [1, 1]} : vector<1x96xf32> to vector<1x32xf32>
    %650 = vector.extract_strided_slice %648 {offsets = [0, 0], sizes = [1, 32], strides = [1, 1]} : vector<1x96xf32> to vector<1x32xf32>
    %651 = arith.addf %649, %650 : vector<1x32xf32>
    %652 = arith.negf %651 : vector<1x32xf32>
    %653 = math.exp %652 : vector<1x32xf32>
    %cst_251 = arith.constant 1.000000e+00 : f32
    %654 = vector.broadcast %cst_251 : f32 to vector<1x32xf32>
    %655 = arith.addf %654, %653 : vector<1x32xf32>
    %656 = arith.divf %654, %655 : vector<1x32xf32>
    %657 = vector.extract_strided_slice %646 {offsets = [0, 32], sizes = [1, 32], strides = [1, 1]} : vector<1x96xf32> to vector<1x32xf32>
    %658 = vector.extract_strided_slice %648 {offsets = [0, 32], sizes = [1, 32], strides = [1, 1]} : vector<1x96xf32> to vector<1x32xf32>
    %659 = arith.addf %657, %658 : vector<1x32xf32>
    %660 = arith.negf %659 : vector<1x32xf32>
    %661 = math.exp %660 : vector<1x32xf32>
    %cst_252 = arith.constant 1.000000e+00 : f32
    %662 = vector.broadcast %cst_252 : f32 to vector<1x32xf32>
    %663 = arith.addf %662, %661 : vector<1x32xf32>
    %664 = arith.divf %662, %663 : vector<1x32xf32>
    %665 = vector.extract_strided_slice %646 {offsets = [0, 64], sizes = [1, 32], strides = [1, 1]} : vector<1x96xf32> to vector<1x32xf32>
    %666 = vector.extract_strided_slice %648 {offsets = [0, 64], sizes = [1, 32], strides = [1, 1]} : vector<1x96xf32> to vector<1x32xf32>
    %667 = arith.mulf %656, %666 : vector<1x32xf32>
    %668 = arith.addf %665, %667 : vector<1x32xf32>
    %669 = math.tanh %668 : vector<1x32xf32>
    %cst_253 = arith.constant 1.000000e+00 : f32
    %670 = vector.broadcast %cst_253 : f32 to vector<1x32xf32>
    %671 = arith.subf %670, %664 : vector<1x32xf32>
    %672 = arith.mulf %671, %669 : vector<1x32xf32>
    %673 = arith.mulf %664, %642 : vector<1x32xf32>
    %674 = arith.addf %672, %673 : vector<1x32xf32>
    %cst_254 = arith.constant dense<0.000000e+00> : vector<1x128xf32>
    %675 = tpu.matmul %674, %580, %cst_254 {dimension_numbers = #tpu.dot_dimension_numbers<[1], [0], [0], [1], [0, 0, 1, 1], [], []>} : vector<1x32xf32>, vector<32x128xf32>, vector<1x128xf32> -> vector<1x128xf32>
    %676 = vector.extract_strided_slice %574 {offsets = [2, 0], sizes = [1, 128], strides = [1, 1]} : vector<8x128xf32> to vector<1x128xf32>
    %677 = arith.addf %675, %676 : vector<1x128xf32>
    %678 = vector.extract_strided_slice %568 {offsets = [3, 0], sizes = [1, 96], strides = [1, 1]} : vector<8x96xf32> to vector<1x96xf32>
    %cst_255 = arith.constant dense<0.000000e+00> : vector<1x96xf32>
    %679 = tpu.matmul %674, %578, %cst_255 {dimension_numbers = #tpu.dot_dimension_numbers<[1], [0], [0], [1], [0, 0, 1, 1], [], []>} : vector<1x32xf32>, vector<32x96xf32>, vector<1x96xf32> -> vector<1x96xf32>
    %680 = arith.addf %679, %579 : vector<1x96xf32>
    %681 = vector.extract_strided_slice %678 {offsets = [0, 0], sizes = [1, 32], strides = [1, 1]} : vector<1x96xf32> to vector<1x32xf32>
    %682 = vector.extract_strided_slice %680 {offsets = [0, 0], sizes = [1, 32], strides = [1, 1]} : vector<1x96xf32> to vector<1x32xf32>
    %683 = arith.addf %681, %682 : vector<1x32xf32>
    %684 = arith.negf %683 : vector<1x32xf32>
    %685 = math.exp %684 : vector<1x32xf32>
    %cst_256 = arith.constant 1.000000e+00 : f32
    %686 = vector.broadcast %cst_256 : f32 to vector<1x32xf32>
    %687 = arith.addf %686, %685 : vector<1x32xf32>
    %688 = arith.divf %686, %687 : vector<1x32xf32>
    %689 = vector.extract_strided_slice %678 {offsets = [0, 32], sizes = [1, 32], strides = [1, 1]} : vector<1x96xf32> to vector<1x32xf32>
    %690 = vector.extract_strided_slice %680 {offsets = [0, 32], sizes = [1, 32], strides = [1, 1]} : vector<1x96xf32> to vector<1x32xf32>
    %691 = arith.addf %689, %690 : vector<1x32xf32>
    %692 = arith.negf %691 : vector<1x32xf32>
    %693 = math.exp %692 : vector<1x32xf32>
    %cst_257 = arith.constant 1.000000e+00 : f32
    %694 = vector.broadcast %cst_257 : f32 to vector<1x32xf32>
    %695 = arith.addf %694, %693 : vector<1x32xf32>
    %696 = arith.divf %694, %695 : vector<1x32xf32>
    %697 = vector.extract_strided_slice %678 {offsets = [0, 64], sizes = [1, 32], strides = [1, 1]} : vector<1x96xf32> to vector<1x32xf32>
    %698 = vector.extract_strided_slice %680 {offsets = [0, 64], sizes = [1, 32], strides = [1, 1]} : vector<1x96xf32> to vector<1x32xf32>
    %699 = arith.mulf %688, %698 : vector<1x32xf32>
    %700 = arith.addf %697, %699 : vector<1x32xf32>
    %701 = math.tanh %700 : vector<1x32xf32>
    %cst_258 = arith.constant 1.000000e+00 : f32
    %702 = vector.broadcast %cst_258 : f32 to vector<1x32xf32>
    %703 = arith.subf %702, %696 : vector<1x32xf32>
    %704 = arith.mulf %703, %701 : vector<1x32xf32>
    %705 = arith.mulf %696, %674 : vector<1x32xf32>
    %706 = arith.addf %704, %705 : vector<1x32xf32>
    %cst_259 = arith.constant dense<0.000000e+00> : vector<1x128xf32>
    %707 = tpu.matmul %706, %580, %cst_259 {dimension_numbers = #tpu.dot_dimension_numbers<[1], [0], [0], [1], [0, 0, 1, 1], [], []>} : vector<1x32xf32>, vector<32x128xf32>, vector<1x128xf32> -> vector<1x128xf32>
    %708 = vector.extract_strided_slice %574 {offsets = [3, 0], sizes = [1, 128], strides = [1, 1]} : vector<8x128xf32> to vector<1x128xf32>
    %709 = arith.addf %707, %708 : vector<1x128xf32>
    %710 = vector.extract_strided_slice %568 {offsets = [4, 0], sizes = [1, 96], strides = [1, 1]} : vector<8x96xf32> to vector<1x96xf32>
    %cst_260 = arith.constant dense<0.000000e+00> : vector<1x96xf32>
    %711 = tpu.matmul %706, %578, %cst_260 {dimension_numbers = #tpu.dot_dimension_numbers<[1], [0], [0], [1], [0, 0, 1, 1], [], []>} : vector<1x32xf32>, vector<32x96xf32>, vector<1x96xf32> -> vector<1x96xf32>
    %712 = arith.addf %711, %579 : vector<1x96xf32>
    %713 = vector.extract_strided_slice %710 {offsets = [0, 0], sizes = [1, 32], strides = [1, 1]} : vector<1x96xf32> to vector<1x32xf32>
    %714 = vector.extract_strided_slice %712 {offsets = [0, 0], sizes = [1, 32], strides = [1, 1]} : vector<1x96xf32> to vector<1x32xf32>
    %715 = arith.addf %713, %714 : vector<1x32xf32>
    %716 = arith.negf %715 : vector<1x32xf32>
    %717 = math.exp %716 : vector<1x32xf32>
    %cst_261 = arith.constant 1.000000e+00 : f32
    %718 = vector.broadcast %cst_261 : f32 to vector<1x32xf32>
    %719 = arith.addf %718, %717 : vector<1x32xf32>
    %720 = arith.divf %718, %719 : vector<1x32xf32>
    %721 = vector.extract_strided_slice %710 {offsets = [0, 32], sizes = [1, 32], strides = [1, 1]} : vector<1x96xf32> to vector<1x32xf32>
    %722 = vector.extract_strided_slice %712 {offsets = [0, 32], sizes = [1, 32], strides = [1, 1]} : vector<1x96xf32> to vector<1x32xf32>
    %723 = arith.addf %721, %722 : vector<1x32xf32>
    %724 = arith.negf %723 : vector<1x32xf32>
    %725 = math.exp %724 : vector<1x32xf32>
    %cst_262 = arith.constant 1.000000e+00 : f32
    %726 = vector.broadcast %cst_262 : f32 to vector<1x32xf32>
    %727 = arith.addf %726, %725 : vector<1x32xf32>
    %728 = arith.divf %726, %727 : vector<1x32xf32>
    %729 = vector.extract_strided_slice %710 {offsets = [0, 64], sizes = [1, 32], strides = [1, 1]} : vector<1x96xf32> to vector<1x32xf32>
    %730 = vector.extract_strided_slice %712 {offsets = [0, 64], sizes = [1, 32], strides = [1, 1]} : vector<1x96xf32> to vector<1x32xf32>
    %731 = arith.mulf %720, %730 : vector<1x32xf32>
    %732 = arith.addf %729, %731 : vector<1x32xf32>
    %733 = math.tanh %732 : vector<1x32xf32>
    %cst_263 = arith.constant 1.000000e+00 : f32
    %734 = vector.broadcast %cst_263 : f32 to vector<1x32xf32>
    %735 = arith.subf %734, %728 : vector<1x32xf32>
    %736 = arith.mulf %735, %733 : vector<1x32xf32>
    %737 = arith.mulf %728, %706 : vector<1x32xf32>
    %738 = arith.addf %736, %737 : vector<1x32xf32>
    %cst_264 = arith.constant dense<0.000000e+00> : vector<1x128xf32>
    %739 = tpu.matmul %738, %580, %cst_264 {dimension_numbers = #tpu.dot_dimension_numbers<[1], [0], [0], [1], [0, 0, 1, 1], [], []>} : vector<1x32xf32>, vector<32x128xf32>, vector<1x128xf32> -> vector<1x128xf32>
    %740 = vector.extract_strided_slice %574 {offsets = [4, 0], sizes = [1, 128], strides = [1, 1]} : vector<8x128xf32> to vector<1x128xf32>
    %741 = arith.addf %739, %740 : vector<1x128xf32>
    %742 = vector.extract_strided_slice %568 {offsets = [5, 0], sizes = [1, 96], strides = [1, 1]} : vector<8x96xf32> to vector<1x96xf32>
    %cst_265 = arith.constant dense<0.000000e+00> : vector<1x96xf32>
    %743 = tpu.matmul %738, %578, %cst_265 {dimension_numbers = #tpu.dot_dimension_numbers<[1], [0], [0], [1], [0, 0, 1, 1], [], []>} : vector<1x32xf32>, vector<32x96xf32>, vector<1x96xf32> -> vector<1x96xf32>
    %744 = arith.addf %743, %579 : vector<1x96xf32>
    %745 = vector.extract_strided_slice %742 {offsets = [0, 0], sizes = [1, 32], strides = [1, 1]} : vector<1x96xf32> to vector<1x32xf32>
    %746 = vector.extract_strided_slice %744 {offsets = [0, 0], sizes = [1, 32], strides = [1, 1]} : vector<1x96xf32> to vector<1x32xf32>
    %747 = arith.addf %745, %746 : vector<1x32xf32>
    %748 = arith.negf %747 : vector<1x32xf32>
    %749 = math.exp %748 : vector<1x32xf32>
    %cst_266 = arith.constant 1.000000e+00 : f32
    %750 = vector.broadcast %cst_266 : f32 to vector<1x32xf32>
    %751 = arith.addf %750, %749 : vector<1x32xf32>
    %752 = arith.divf %750, %751 : vector<1x32xf32>
    %753 = vector.extract_strided_slice %742 {offsets = [0, 32], sizes = [1, 32], strides = [1, 1]} : vector<1x96xf32> to vector<1x32xf32>
    %754 = vector.extract_strided_slice %744 {offsets = [0, 32], sizes = [1, 32], strides = [1, 1]} : vector<1x96xf32> to vector<1x32xf32>
    %755 = arith.addf %753, %754 : vector<1x32xf32>
    %756 = arith.negf %755 : vector<1x32xf32>
    %757 = math.exp %756 : vector<1x32xf32>
    %cst_267 = arith.constant 1.000000e+00 : f32
    %758 = vector.broadcast %cst_267 : f32 to vector<1x32xf32>
    %759 = arith.addf %758, %757 : vector<1x32xf32>
    %760 = arith.divf %758, %759 : vector<1x32xf32>
    %761 = vector.extract_strided_slice %742 {offsets = [0, 64], sizes = [1, 32], strides = [1, 1]} : vector<1x96xf32> to vector<1x32xf32>
    %762 = vector.extract_strided_slice %744 {offsets = [0, 64], sizes = [1, 32], strides = [1, 1]} : vector<1x96xf32> to vector<1x32xf32>
    %763 = arith.mulf %752, %762 : vector<1x32xf32>
    %764 = arith.addf %761, %763 : vector<1x32xf32>
    %765 = math.tanh %764 : vector<1x32xf32>
    %cst_268 = arith.constant 1.000000e+00 : f32
    %766 = vector.broadcast %cst_268 : f32 to vector<1x32xf32>
    %767 = arith.subf %766, %760 : vector<1x32xf32>
    %768 = arith.mulf %767, %765 : vector<1x32xf32>
    %769 = arith.mulf %760, %738 : vector<1x32xf32>
    %770 = arith.addf %768, %769 : vector<1x32xf32>
    %cst_269 = arith.constant dense<0.000000e+00> : vector<1x128xf32>
    %771 = tpu.matmul %770, %580, %cst_269 {dimension_numbers = #tpu.dot_dimension_numbers<[1], [0], [0], [1], [0, 0, 1, 1], [], []>} : vector<1x32xf32>, vector<32x128xf32>, vector<1x128xf32> -> vector<1x128xf32>
    %772 = vector.extract_strided_slice %574 {offsets = [5, 0], sizes = [1, 128], strides = [1, 1]} : vector<8x128xf32> to vector<1x128xf32>
    %773 = arith.addf %771, %772 : vector<1x128xf32>
    %774 = vector.extract_strided_slice %568 {offsets = [6, 0], sizes = [1, 96], strides = [1, 1]} : vector<8x96xf32> to vector<1x96xf32>
    %cst_270 = arith.constant dense<0.000000e+00> : vector<1x96xf32>
    %775 = tpu.matmul %770, %578, %cst_270 {dimension_numbers = #tpu.dot_dimension_numbers<[1], [0], [0], [1], [0, 0, 1, 1], [], []>} : vector<1x32xf32>, vector<32x96xf32>, vector<1x96xf32> -> vector<1x96xf32>
    %776 = arith.addf %775, %579 : vector<1x96xf32>
    %777 = vector.extract_strided_slice %774 {offsets = [0, 0], sizes = [1, 32], strides = [1, 1]} : vector<1x96xf32> to vector<1x32xf32>
    %778 = vector.extract_strided_slice %776 {offsets = [0, 0], sizes = [1, 32], strides = [1, 1]} : vector<1x96xf32> to vector<1x32xf32>
    %779 = arith.addf %777, %778 : vector<1x32xf32>
    %780 = arith.negf %779 : vector<1x32xf32>
    %781 = math.exp %780 : vector<1x32xf32>
    %cst_271 = arith.constant 1.000000e+00 : f32
    %782 = vector.broadcast %cst_271 : f32 to vector<1x32xf32>
    %783 = arith.addf %782, %781 : vector<1x32xf32>
    %784 = arith.divf %782, %783 : vector<1x32xf32>
    %785 = vector.extract_strided_slice %774 {offsets = [0, 32], sizes = [1, 32], strides = [1, 1]} : vector<1x96xf32> to vector<1x32xf32>
    %786 = vector.extract_strided_slice %776 {offsets = [0, 32], sizes = [1, 32], strides = [1, 1]} : vector<1x96xf32> to vector<1x32xf32>
    %787 = arith.addf %785, %786 : vector<1x32xf32>
    %788 = arith.negf %787 : vector<1x32xf32>
    %789 = math.exp %788 : vector<1x32xf32>
    %cst_272 = arith.constant 1.000000e+00 : f32
    %790 = vector.broadcast %cst_272 : f32 to vector<1x32xf32>
    %791 = arith.addf %790, %789 : vector<1x32xf32>
    %792 = arith.divf %790, %791 : vector<1x32xf32>
    %793 = vector.extract_strided_slice %774 {offsets = [0, 64], sizes = [1, 32], strides = [1, 1]} : vector<1x96xf32> to vector<1x32xf32>
    %794 = vector.extract_strided_slice %776 {offsets = [0, 64], sizes = [1, 32], strides = [1, 1]} : vector<1x96xf32> to vector<1x32xf32>
    %795 = arith.mulf %784, %794 : vector<1x32xf32>
    %796 = arith.addf %793, %795 : vector<1x32xf32>
    %797 = math.tanh %796 : vector<1x32xf32>
    %cst_273 = arith.constant 1.000000e+00 : f32
    %798 = vector.broadcast %cst_273 : f32 to vector<1x32xf32>
    %799 = arith.subf %798, %792 : vector<1x32xf32>
    %800 = arith.mulf %799, %797 : vector<1x32xf32>
    %801 = arith.mulf %792, %770 : vector<1x32xf32>
    %802 = arith.addf %800, %801 : vector<1x32xf32>
    %cst_274 = arith.constant dense<0.000000e+00> : vector<1x128xf32>
    %803 = tpu.matmul %802, %580, %cst_274 {dimension_numbers = #tpu.dot_dimension_numbers<[1], [0], [0], [1], [0, 0, 1, 1], [], []>} : vector<1x32xf32>, vector<32x128xf32>, vector<1x128xf32> -> vector<1x128xf32>
    %804 = vector.extract_strided_slice %574 {offsets = [6, 0], sizes = [1, 128], strides = [1, 1]} : vector<8x128xf32> to vector<1x128xf32>
    %805 = arith.addf %803, %804 : vector<1x128xf32>
    %806 = vector.extract_strided_slice %568 {offsets = [7, 0], sizes = [1, 96], strides = [1, 1]} : vector<8x96xf32> to vector<1x96xf32>
    %cst_275 = arith.constant dense<0.000000e+00> : vector<1x96xf32>
    %807 = tpu.matmul %802, %578, %cst_275 {dimension_numbers = #tpu.dot_dimension_numbers<[1], [0], [0], [1], [0, 0, 1, 1], [], []>} : vector<1x32xf32>, vector<32x96xf32>, vector<1x96xf32> -> vector<1x96xf32>
    %808 = arith.addf %807, %579 : vector<1x96xf32>
    %809 = vector.extract_strided_slice %806 {offsets = [0, 0], sizes = [1, 32], strides = [1, 1]} : vector<1x96xf32> to vector<1x32xf32>
    %810 = vector.extract_strided_slice %808 {offsets = [0, 0], sizes = [1, 32], strides = [1, 1]} : vector<1x96xf32> to vector<1x32xf32>
    %811 = arith.addf %809, %810 : vector<1x32xf32>
    %812 = arith.negf %811 : vector<1x32xf32>
    %813 = math.exp %812 : vector<1x32xf32>
    %cst_276 = arith.constant 1.000000e+00 : f32
    %814 = vector.broadcast %cst_276 : f32 to vector<1x32xf32>
    %815 = arith.addf %814, %813 : vector<1x32xf32>
    %816 = arith.divf %814, %815 : vector<1x32xf32>
    %817 = vector.extract_strided_slice %806 {offsets = [0, 32], sizes = [1, 32], strides = [1, 1]} : vector<1x96xf32> to vector<1x32xf32>
    %818 = vector.extract_strided_slice %808 {offsets = [0, 32], sizes = [1, 32], strides = [1, 1]} : vector<1x96xf32> to vector<1x32xf32>
    %819 = arith.addf %817, %818 : vector<1x32xf32>
    %820 = arith.negf %819 : vector<1x32xf32>
    %821 = math.exp %820 : vector<1x32xf32>
    %cst_277 = arith.constant 1.000000e+00 : f32
    %822 = vector.broadcast %cst_277 : f32 to vector<1x32xf32>
    %823 = arith.addf %822, %821 : vector<1x32xf32>
    %824 = arith.divf %822, %823 : vector<1x32xf32>
    %825 = vector.extract_strided_slice %806 {offsets = [0, 64], sizes = [1, 32], strides = [1, 1]} : vector<1x96xf32> to vector<1x32xf32>
    %826 = vector.extract_strided_slice %808 {offsets = [0, 64], sizes = [1, 32], strides = [1, 1]} : vector<1x96xf32> to vector<1x32xf32>
    %827 = arith.mulf %816, %826 : vector<1x32xf32>
    %828 = arith.addf %825, %827 : vector<1x32xf32>
    %829 = math.tanh %828 : vector<1x32xf32>
    %cst_278 = arith.constant 1.000000e+00 : f32
    %830 = vector.broadcast %cst_278 : f32 to vector<1x32xf32>
    %831 = arith.subf %830, %824 : vector<1x32xf32>
    %832 = arith.mulf %831, %829 : vector<1x32xf32>
    %833 = arith.mulf %824, %802 : vector<1x32xf32>
    %834 = arith.addf %832, %833 : vector<1x32xf32>
    %cst_279 = arith.constant dense<0.000000e+00> : vector<1x128xf32>
    %835 = tpu.matmul %834, %580, %cst_279 {dimension_numbers = #tpu.dot_dimension_numbers<[1], [0], [0], [1], [0, 0, 1, 1], [], []>} : vector<1x32xf32>, vector<32x128xf32>, vector<1x128xf32> -> vector<1x128xf32>
    %836 = vector.extract_strided_slice %574 {offsets = [7, 0], sizes = [1, 128], strides = [1, 1]} : vector<8x128xf32> to vector<1x128xf32>
    %837 = arith.addf %835, %836 : vector<1x128xf32>
    %c0_280 = arith.constant 0 : index
    %c0_281 = arith.constant 0 : index
    %838 = vector.load %arg15[%c0_280, %c0_281] : memref<1x32xf32, #tpu.memory_space<vmem>>, vector<1x32xf32>
    tpu.vector_store %arg15[%c0_280, %c0_281], %834 {strides = array<i32>} : memref<1x32xf32, #tpu.memory_space<vmem>>, vector<1x32xf32>,
    %839 = tpu.concatenate %613, %645, %677, %709, %741, %773, %805, %837 in 0 : vector<1x128xf32>, vector<1x128xf32>, vector<1x128xf32>, vector<1x128xf32>, vector<1x128xf32>, vector<1x128xf32>, vector<1x128xf32>, vector<1x128xf32> -> vector<8x128xf32>
    %c0_282 = arith.constant 0 : index
    %c0_283 = arith.constant 0 : index
    %840 = vector.load %arg13[%c0_282, %c0_283] : memref<8x128xf32, #tpu.memory_space<vmem>>, vector<8x128xf32>
    tpu.vector_store %arg13[%c0_282, %c0_283], %839 {strides = array<i32>} : memref<8x128xf32, #tpu.memory_space<vmem>>, vector<8x128xf32>,
    %841 = vector.extract_strided_slice %839 {offsets = [0, 8], sizes = [8, 1], strides = [1, 1]} : vector<8x128xf32> to vector<8x1xf32>
    %842 = arith.negf %841 : vector<8x1xf32>
    %843 = math.exp %842 : vector<8x1xf32>
    %cst_284 = arith.constant 1.000000e+00 : f32
    %844 = vector.broadcast %cst_284 : f32 to vector<8x1xf32>
    %845 = arith.addf %844, %843 : vector<8x1xf32>
    %846 = arith.divf %844, %845 : vector<8x1xf32>
    %847 = vector.extract_strided_slice %839 {offsets = [0, 9], sizes = [8, 1], strides = [1, 1]} : vector<8x128xf32> to vector<8x1xf32>
    %848 = arith.negf %847 : vector<8x1xf32>
    %849 = math.exp %848 : vector<8x1xf32>
    %cst_285 = arith.constant 1.000000e+00 : f32
    %850 = vector.broadcast %cst_285 : f32 to vector<8x1xf32>
    %851 = arith.addf %850, %849 : vector<8x1xf32>
    %852 = arith.divf %850, %851 : vector<8x1xf32>
    %853 = vector.extract_strided_slice %0 {offsets = [0, 2], sizes = [8, 1], strides = [1, 1]} : vector<8x8xf32> to vector<8x1xf32>
    %854 = vector.extract_strided_slice %0 {offsets = [0, 3], sizes = [8, 1], strides = [1, 1]} : vector<8x8xf32> to vector<8x1xf32>
    %855 = vector.extract_strided_slice %0 {offsets = [0, 4], sizes = [8, 1], strides = [1, 1]} : vector<8x8xf32> to vector<8x1xf32>
    %856 = vector.extract_strided_slice %0 {offsets = [0, 5], sizes = [8, 1], strides = [1, 1]} : vector<8x8xf32> to vector<8x1xf32>
    %857 = arith.mulf %846, %853 : vector<8x1xf32>
    %858 = arith.divf %855, %856 : vector<8x1xf32>
    %859 = arith.mulf %857, %858 : vector<8x1xf32>
    %860 = arith.mulf %852, %853 : vector<8x1xf32>
    %861 = arith.subf %859, %860 : vector<8x1xf32>
    %862 = arith.mulf %852, %853 : vector<8x1xf32>
    %863 = arith.addf %853, %861 : vector<8x1xf32>
    %864 = arith.addf %854, %862 : vector<8x1xf32>
    %865 = arith.subf %856, %863 : vector<8x1xf32>
    %866 = arith.subf %865, %864 : vector<8x1xf32>
    %867 = arith.mulf %846, %863 : vector<8x1xf32>
    %868 = arith.divf %866, %856 : vector<8x1xf32>
    %869 = arith.mulf %867, %868 : vector<8x1xf32>
    %870 = arith.mulf %852, %863 : vector<8x1xf32>
    %871 = arith.subf %869, %870 : vector<8x1xf32>
    %872 = arith.mulf %852, %863 : vector<8x1xf32>
    %873 = arith.addf %863, %871 : vector<8x1xf32>
    %874 = arith.addf %864, %872 : vector<8x1xf32>
    %875 = arith.subf %856, %873 : vector<8x1xf32>
    %876 = arith.subf %875, %874 : vector<8x1xf32>
    %877 = arith.mulf %846, %873 : vector<8x1xf32>
    %878 = arith.divf %876, %856 : vector<8x1xf32>
    %879 = arith.mulf %877, %878 : vector<8x1xf32>
    %880 = arith.mulf %852, %873 : vector<8x1xf32>
    %881 = arith.subf %879, %880 : vector<8x1xf32>
    %882 = arith.mulf %852, %873 : vector<8x1xf32>
    %883 = arith.addf %873, %881 : vector<8x1xf32>
    %884 = arith.addf %874, %882 : vector<8x1xf32>
    %885 = arith.subf %856, %883 : vector<8x1xf32>
    %886 = arith.subf %885, %884 : vector<8x1xf32>
    %887 = arith.mulf %846, %883 : vector<8x1xf32>
    %888 = arith.divf %886, %856 : vector<8x1xf32>
    %889 = arith.mulf %887, %888 : vector<8x1xf32>
    %890 = arith.mulf %852, %883 : vector<8x1xf32>
    %891 = arith.subf %889, %890 : vector<8x1xf32>
    %892 = arith.mulf %852, %883 : vector<8x1xf32>
    %893 = tpu.concatenate %861, %871, %881, %891, %862, %872, %882, %892 in 1 : vector<8x1xf32>, vector<8x1xf32>, vector<8x1xf32>, vector<8x1xf32>, vector<8x1xf32>, vector<8x1xf32>, vector<8x1xf32>, vector<8x1xf32> -> vector<8x8xf32>
    %cst_286 = arith.constant 0.000000e+00 : f32
    %894 = vector.broadcast %cst_286 : f32 to vector<8x120xf32>
    %895 = tpu.concatenate %893, %894 in 1 : vector<8x8xf32>, vector<8x120xf32> -> vector<8x128xf32>
    %c0_287 = arith.constant 0 : index
    %c0_288 = arith.constant 0 : index
    %896 = vector.load %arg14[%c0_287, %c0_288] : memref<8x128xf32, #tpu.memory_space<vmem>>, vector<8x128xf32>
    tpu.vector_store %arg14[%c0_287, %c0_288], %895 {strides = array<i32>} : memref<8x128xf32, #tpu.memory_space<vmem>>, vector<8x128xf32>,
    return
  }
  func.func @transform_0(%arg0: i32) -> (i32, i32, i32) {
    %c0_i32 = arith.constant 0 : i32
    %c0_i32_0 = arith.constant 0 : i32
    %c0_i32_1 = arith.constant 0 : i32
    return %arg0, %c0_i32, %c0_i32_0 : i32, i32, i32
  }
  func.func @transform_1(%arg0: i32) -> (i32, i32) {
    %c0_i32 = arith.constant 0 : i32
    %c0_i32_0 = arith.constant 0 : i32
    return %arg0, %c0_i32 : i32, i32
  }
  func.func @transform_2(%arg0: i32) -> (i32, i32) {
    %c0_i32 = arith.constant 0 : i32
    %c0_i32_0 = arith.constant 0 : i32
    %c0_i32_1 = arith.constant 0 : i32
    return %c0_i32, %c0_i32_0 : i32, i32
  }
  func.func @transform_3(%arg0: i32) -> (i32, i32) {
    %c0_i32 = arith.constant 0 : i32
    %c0_i32_0 = arith.constant 0 : i32
    %c0_i32_1 = arith.constant 0 : i32
    return %c0_i32, %c0_i32_0 : i32, i32
  }
  func.func @transform_4(%arg0: i32) -> (i32, i32) {
    %c0_i32 = arith.constant 0 : i32
    %c0_i32_0 = arith.constant 0 : i32
    %c0_i32_1 = arith.constant 0 : i32
    return %c0_i32, %c0_i32_0 : i32, i32
  }
  func.func @transform_5(%arg0: i32) -> (i32, i32) {
    %c0_i32 = arith.constant 0 : i32
    %c0_i32_0 = arith.constant 0 : i32
    %c0_i32_1 = arith.constant 0 : i32
    return %c0_i32, %c0_i32_0 : i32, i32
  }
  func.func @transform_6(%arg0: i32) -> (i32, i32) {
    %c0_i32 = arith.constant 0 : i32
    %c0_i32_0 = arith.constant 0 : i32
    %c0_i32_1 = arith.constant 0 : i32
    return %c0_i32, %c0_i32_0 : i32, i32
  }
  func.func @transform_7(%arg0: i32) -> (i32, i32) {
    %c0_i32 = arith.constant 0 : i32
    %c0_i32_0 = arith.constant 0 : i32
    %c0_i32_1 = arith.constant 0 : i32
    return %c0_i32, %c0_i32_0 : i32, i32
  }
  func.func @transform_8(%arg0: i32) -> (i32, i32) {
    %c0_i32 = arith.constant 0 : i32
    %c0_i32_0 = arith.constant 0 : i32
    %c0_i32_1 = arith.constant 0 : i32
    return %c0_i32, %c0_i32_0 : i32, i32
  }
  func.func @transform_9(%arg0: i32) -> (i32, i32) {
    %c0_i32 = arith.constant 0 : i32
    %c0_i32_0 = arith.constant 0 : i32
    %c0_i32_1 = arith.constant 0 : i32
    return %c0_i32, %c0_i32_0 : i32, i32
  }
  func.func @transform_10(%arg0: i32) -> (i32, i32) {
    %c0_i32 = arith.constant 0 : i32
    %c0_i32_0 = arith.constant 0 : i32
    %c0_i32_1 = arith.constant 0 : i32
    return %c0_i32, %c0_i32_0 : i32, i32
  }
  func.func @transform_11(%arg0: i32) -> (i32, i32) {
    %c0_i32 = arith.constant 0 : i32
    %c0_i32_0 = arith.constant 0 : i32
    %c0_i32_1 = arith.constant 0 : i32
    return %c0_i32, %c0_i32_0 : i32, i32
  }
  func.func @transform_12(%arg0: i32) -> (i32, i32) {
    %c0_i32 = arith.constant 0 : i32
    %c0_i32_0 = arith.constant 0 : i32
    return %arg0, %c0_i32 : i32, i32
  }
  func.func @transform_13(%arg0: i32) -> (i32, i32) {
    %c0_i32 = arith.constant 0 : i32
    %c0_i32_0 = arith.constant 0 : i32
    return %arg0, %c0_i32 : i32, i32
  }
}

</mosaic_0001>

<bundles_post_ra>
// kernel: gat_forward.1
= control target key start
LH: loop header
LB: loop body
LE: loop exit
PB: predicated region body
PF: predicated region fallthrough
CT: control target
= control target key end

     0   :  { %vm50_vm0 = vcmask 31744   ;;  %v11056_v3 = vmov 0.0   ;;  %vm11057_vm1 = vmmov 0   ;;  %vm132_vm2 = vcmask 64512   ;;  %s11058_s29 = smov 112   ;;  %s11059_s30 = smov 120   ;;  %s12149_s0 = inlined_call_operand.vmem [shape: f32[8,8,4], index: 0, kind: input, shape index: {}]   ;;  %s12150_s3 = inlined_call_operand.vmem [shape: f32[4,24], index: 3, kind: input, shape index: {}]   ;;  %s12151_s4 = inlined_call_operand.vmem [shape: f32[24,16], index: 4, kind: input, shape index: {}]   ;;  %s12152_s5 = inlined_call_operand.vmem [shape: f32[16,96], index: 5, kind: input, shape index: {}]   ;;  %s12153_s2 = inlined_call_operand.vmem [shape: f32[1,32], index: 2, kind: input, shape index: {}]   ;;  %s12154_s9 = inlined_call_operand.vmem [shape: f32[32,96], index: 9, kind: input, shape index: {}]   ;;  %s12155_s10 = inlined_call_operand.vmem [shape: f32[1,96], index: 10, kind: input, shape index: {}]   ;;  %s12156_s6 = inlined_call_operand.vmem [shape: f32[1,96], index: 6, kind: input, shape index: {}]   ;;  %s12157_s7 = inlined_call_operand.vmem [shape: f32[2,128], index: 7, kind: input, shape index: {}]   ;;  %s12158_s1 = inlined_call_operand.vmem [shape: f32[8,8], index: 1, kind: input, shape index: {}]   ;;  %s12159_s11 = inlined_call_operand.vmem [shape: f32[32,128], index: 11, kind: input, shape index: {}]   ;;  %s12160_s8 = inlined_call_operand.vmem [shape: f32[1,128], index: 8, kind: input, shape index: {}]   ;;  %s12161_s12 = inlined_call_operand.vmem [shape: f32[8,128], index: 12, kind: output, shape index: {0}]   ;;  %s12162_s13 = inlined_call_operand.vmem [shape: f32[8,128], index: 13, kind: output, shape index: {1}]  }
   0x1   :  { %v48_v0 = vld [vmem:[%s12149_s0] sm:$0xff]  ;;  %10009 = vmatprep.subr.mxu0 %v11056_v3  ;;  %10014 = vmatprep.subr.mxu1 %v11056_v3  ;;  %vm209_vm3 = vcmask 1043456   ;;  %v11060_v54 = vmov 0.0|0.0   ;;  %v46_v56 = vld [vmem:[%s12151_s4 + $0x8] sm:$0xff]  ;;  %v11226_v58 = vld [vmem:[%s12151_s4 + $0x10] sm:$0xff]  ;;  %s11061_s20 = smov 8  }
   0x2   :  { %v49_v1 = vmul.f32 %v48_v0, %v48_v0  ;;  %10015 = vmatpush3.msra.mxu1 %v48_v0  ;;  %10011 = vmatprep.mubr.msk.f32.mxu0 %vm11057_vm1, %v11056_v3  ;;  %v11167_v12 = vld [vmem:[%s12150_s3] sm:$0xf]  ;;  %s11062_s21 = smov 16   ;;  %vm767_vm4 = vcmask 130048   ;;  %vm770_vm5 = vcmask 195584   ;;  %vm7687_vm6 = vcmask 1040384  }
   0x3   :  { %10019 = vmatprep.subr.mxu1 %v11056_v3  ;;  %10016 = vmatprep.mubr.msk.f32.mxu1 %vm11057_vm1, %v11056_v3  ;;  %v45_v55 = vld [vmem:[%s12151_s4] sm:$0xff]  ;;  %vm7689_vm7 = vcmask 1041408   ;;  %vm7691_vm8 = vcmask 1042432   ;;  %vm7694_vm9 = vcmask 1044480   ;;  %vm7696_vm10 = vcmask 1045504   ;;  %s11064_s18 = smov 32  }
   0x4   :  { %v51_v2 = vsel %vm50_vm0, %v49_v1, 0.0  ;;  %v11219_v57 = vpack.c.bf16 %v46_v56, %v45_v55  ;;  %vm7872_vm11 = vcmask 253952   ;;  %vm7698_vm12 = vcmask 1046528   ;;  %s11067_s28 = smov 6   ;;  %s11068_s14 = smov 7  }
   0x5   :  { %52 = vadd.xlane.f32.xlu0 %v51_v2  ;;  %vm7884_vm13 = vcmask 261120   ;;  %vm7790_vm14 = vcmask 15360   ;;  %vm9316_vm15 = vcmask 261127   ;;  %s11073_s17 = smov 124   ;;  %s11077_s19 = smov 126  }
  0x92   :  { %v53_v4 = vpop.xlane.xlu0 %52 }
  0x93   :  { %v54_v5 = vadd.f32 1e-12, %v53_v4 }
  0x95   :  { %10854 = vrsqrt.f32 %v54_v5  ;;  %v9553_v5 = vld [vmem:[%s12149_s0 + $0x8] sm:$0xff] }
  0x9f   :  { %v10855_v6 = vpop.eup %10854 }
  0xa0   :  { %v56_v7 = vmul.f32 %v10855_v6, %v48_v0  ;;  %v1011_v6 = vmul.f32 %v9553_v5, %v9553_v5 }
  0xa2   :  { %10010 = vmatpush3.xpose.msk.msra.mxu0 %vm50_vm0, %v56_v7 }
  0xa3   :  { %10024 = vmatprep.subr.mxu0 %v11056_v3 }
  0xa5   :  { %10012 = vmatmul.mubr.msk.f32.vlgmr.msra.gmra.mrb[0].mxu0 %vm50_vm0, %v56_v7  ;;  %v1012_v7 = vsel %vm50_vm0, %v1011_v6, 0.0 }
  0xa6   :  { %10026 = vmatprep.mubr.msk.f32.mxu0 %vm11057_vm1, %v11056_v3 }
 0x178   :  { %v126_v8 = vpop.f32.mrb[0].mxu0 }
 0x179   :  { %v130_v9 = vmul.f32 %v126_v8, %v126_v8  ;;  %v10013_v10 = vpop.f32.mrb[1].mxu0 }
 0x17b   :  { %v131_v11 = vmul.f32 %v130_v9, %v130_v9 }
 0x17d   :  { %10017 = vmatmul.mubr.msk.f32.vlgmr.msra.gmra.mrb[0].mxu1 %vm132_vm2, %v131_v11 }
 0x17e   :  { %10020 = vmatpush3.msk.msra.mxu1 %vm209_vm3, %v11167_v12  ;;  %10021 = vmatprep.mubr.msk.f32.mxu1 %vm11057_vm1, %v11056_v3 }
 0x17f   :  { %10029 = vmatprep.subr.mxu1 %v11056_v3 }
 0x250   :  { %v202_v13 = vpop.f32.mrb[0].mxu1 }
 0x251   :  { %v10018_v14 = vpop.f32.mrb[1].mxu1  ;;  %10022 = vmatmul.mubr.msk.f32.vlgmr.msra.gmra.mrb[2].mxu1 %vm50_vm0, %v202_v13 }
 0x252   :  { %10031 = vmatprep.mubr.msk.f32.mxu1 %vm11057_vm1, %v11056_v3 }
 0x324   :  { %v279_v15 = vpop.f32.mrb[2].mxu1 }
 0x325   :  { %599 = vrot.lane.b32.xlu1 %v279_v15, %s11058_s29  ;;  %440 = vrot.lane.b32.xlu0 %v279_v15, %s11059_s30  ;;  %v10023_v16 = vpop.f32.mrb[3].mxu1 }
 0x326   :  { %10025 = vmatpush3.xpose.msk.msra.mxu0 %vm132_vm2, %v279_v15  ;;  %10030 = vmatpush3.msra.mxu1 %v279_v15 }
 0x327   :  { %10034 = vmatprep.subr.mxu0 %v11056_v3  ;;  %10039 = vmatprep.subr.mxu1 %v11056_v3 }
 0x329   :  { %10027 = vmatmul.mubr.msk.f32.vlgmr.msra.gmra.mrb[2].mxu0 %vm132_vm2, %v279_v15 }
 0x32a   :  { %10036 = vmatprep.mubr.msk.f32.mxu0 %vm11057_vm1, %v11056_v3 }
 0x397   :  { %v441_v17 = vpop.permute.xlu0 %440  ;;  %v600_v18 = vpop.permute.xlu1 %599 }
 0x398   :  { %10035 = vmatpush3.xpose.msk.msra.mxu0 %vm132_vm2, %v441_v17 }
 0x399   :  { %10044 = vmatprep.subr.mxu0 %v11056_v3 }
 0x39b   :  { %10037 = vmatmul.mubr.msk.f32.vlgmr.msra.gmra.mrb[4].mxu0 %vm132_vm2, %v441_v17 }
 0x39c   :  { %10045 = vmatpush3.xpose.msk.msra.mxu0 %vm132_vm2, %v600_v18  ;;  %10046 = vmatprep.mubr.msk.f32.mxu0 %vm11057_vm1, %v11056_v3 }
 0x39d   :  { %10709 = vmatprep.subr.bf16.mxu0 %v11060_v54 }
 0x39f   :  { %10047 = vmatmul.mubr.msk.f32.vlgmr.msra.gmra.mrb[6].mxu0 %vm132_vm2, %v600_v18 }
 0x3a0   :  { %10060 = vmatprep.mubr.msk.f32.mxu0 %vm11057_vm1, %v11056_v3  ;;  %10711 = vmatpush3.bf16.msra.mxu0 %v11219_v57 }
 0x3a1   :  { %10058 = vmatprep.subr.mxu0 %v11056_v3 }
 0x3a4   :  { %10059 = vmatpush3.msra.mxu0 %v11226_v58 }
 0x3a5   :  { %10068 = vmatprep.subr.mxu0 %v11056_v3 }
 0x3fc   :  { %v352_v19 = vpop.f32.mrb[2].mxu0 }
 0x3fd   :  { %v10028_v20 = vpop.f32.mrb[3].mxu0  ;;  %v356_v21 = vsel %vm132_vm2, %v352_v19, -inf }
 0x3fe   :  { %357 = vmax.xlane.f32.xlu1 %v356_v21 }
 0x46e   :  { %v510_v22 = vpop.f32.mrb[4].mxu0 }
 0x46f   :  { %v10038_v23 = vpop.f32.mrb[5].mxu0  ;;  %v514_v24 = vsel %vm132_vm2, %v510_v22, -inf }
 0x470   :  { %515 = vmax.xlane.f32.xlu0 %v514_v24 }
 0x472   :  { %v669_v25 = vpop.f32.mrb[6].mxu0 }
 0x473   :  { %v10048_v26 = vpop.f32.mrb[7].mxu0  ;;  %v673_v27 = vsel %vm132_vm2, %v669_v25, -inf }
 0x474   :  { %674 = vmax.xlane.f32.xlu1 %v673_v27 }
 0x48b   :  { %v358_v28 = vpop.xlane.xlu1 %357 }
 0x48c   :  { %v359_v29 = vsub.f32 %v352_v19, %v358_v28 }
 0x48e   :  { %v360_v30 = vmul.f32 1.442695, %v359_v29 }
 0x490   :  { %10856 = vpow2.f32 %v360_v30 }
 0x49a   :  { %v10857_v31 = vpop.eup %10856 }
 0x49b   :  { %v362_v32 = vsel %vm132_vm2, %v10857_v31, 0.0 }
 0x49c   :  { %363 = vadd.xlane.f32.xlu1 %v362_v32 }
 0x4fd   :  { %v516_v33 = vpop.xlane.xlu0 %515 }
 0x4fe   :  { %v517_v34 = vsub.f32 %v510_v22, %v516_v33 }
 0x500   :  { %v518_v35 = vmul.f32 1.442695, %v517_v34 }
 0x501   :  { %v675_v36 = vpop.xlane.xlu1 %674 }
 0x502   :  { %10858 = vpow2.f32 %v518_v35  ;;  %v676_v37 = vsub.f32 %v669_v25, %v675_v36 }
 0x504   :  { %v677_v38 = vmul.f32 1.442695, %v676_v37 }
 0x506   :  { %10860 = vpow2.f32 %v677_v38 }
 0x50c   :  { %v10859_v39 = vpop.eup %10858 }
 0x50d   :  { %v520_v40 = vsel %vm132_vm2, %v10859_v39, 0.0 }
 0x50e   :  { %521 = vadd.xlane.f32.xlu1 %v520_v40 }
 0x510   :  { %v10861_v41 = vpop.eup %10860 }
 0x511   :  { %v679_v42 = vsel %vm132_vm2, %v10861_v41, 0.0 }
 0x512   :  { %680 = vadd.xlane.f32.xlu1 %v679_v42 }
 0x529   :  { %v364_v43 = vpop.xlane.xlu1 %363 }
 0x52a   :  { %10862 = vrcp.f32 %v364_v43 }
 0x534   :  { %v10863_v44 = vpop.eup %10862 }
 0x535   :  { %v366_v45 = vmul.f32 %v10863_v44, %v10857_v31 }
 0x537   :  { %10032 = vmatmul.mubr.msk.f32.vlgmr.msra.gmra.mrb[4].mxu1 %vm132_vm2, %v366_v45 }
 0x538   :  { %10040 = vmatpush3.msra.mxu1 %v441_v17  ;;  %10041 = vmatprep.mubr.msk.f32.mxu1 %vm11057_vm1, %v11056_v3 }
 0x539   :  { %10049 = vmatprep.subr.mxu1 %v11056_v3 }
 0x59b   :  { %v522_v46 = vpop.xlane.xlu1 %521 }
 0x59c   :  { %10864 = vrcp.f32 %v522_v46 }
 0x59f   :  { %v681_v47 = vpop.xlane.xlu1 %680 }
 0x5a0   :  { %10866 = vrcp.f32 %v681_v47 }
 0x5a6   :  { %v10865_v48 = vpop.eup %10864 }
 0x5a7   :  { %v524_v49 = vmul.f32 %v10865_v48, %v10859_v39 }
 0x5a9   :  { %10042 = vmatmul.mubr.msk.f32.vlgmr.msra.gmra.mrb[6].mxu1 %vm132_vm2, %v524_v49 }
 0x5aa   :  { %v10867_v50 = vpop.eup %10866  ;;  %10050 = vmatpush3.msra.mxu1 %v600_v18  ;;  %10051 = vmatprep.mubr.msk.f32.mxu1 %vm11057_vm1, %v11056_v3 }
 0x5ab   :  { %v683_v51 = vmul.f32 %v10867_v50, %v10861_v41  ;;  %10063 = vmatprep.subr.mxu1 %v11056_v3 }
 0x5ad   :  { %10052 = vmatmul.mubr.msk.f32.vlgmr.msra.gmra.mrb[8].mxu1 %vm132_vm2, %v683_v51 }
 0x5ae   :  { %10065 = vmatprep.mubr.msk.f32.mxu1 %vm11057_vm1, %v11056_v3 }
 0x60a   :  { %v436_v52 = vpop.f32.mrb[4].mxu1 }
 0x60b   :  { %v10033_v53 = vpop.f32.mrb[5].mxu1 }
 0x67c   :  { %v595_v59 = vpop.f32.mrb[6].mxu1 }
 0x67d   :  { %759 = vrot.lane.b32.xlu1 %v595_v59, %s11061_s20  ;;  %v10043_v60 = vpop.f32.mrb[7].mxu1 }
 0x680   :  { %v754_v61 = vpop.f32.mrb[8].mxu1 }
 0x681   :  { %763 = vrot.lane.b32.xlu0 %v754_v61, %s11062_s21  ;;  %v10053_v62 = vpop.f32.mrb[9].mxu1 }
 0x6a1   :  { %1013 = vadd.xlane.f32.xlu1 %v1012_v7 }
 0x6ef   :  { %v760_v63 = vpop.permute.xlu1 %759 }
 0x6f0   :  { %v766_v0 = vsel %vm132_vm2, %v436_v52, %v760_v63 }
 0x6f3   :  { %v764_v1 = vpop.permute.xlu0 %763 }
 0x6f4   :  { %v768_v2 = vsel %vm767_vm4, %v766_v0, %v764_v1 }
 0x6f5   :  { %v769_v4 = vmax.f32 %v768_v2, 0.0 }
 0x6f7   :  { %10061 = vmatmul.mubr.msk.f32.vlgmr.msra.gmra.mrb[8].mxu0 %vm770_vm5, %v769_v4 }
 0x6f8   :  { %10070 = vmatprep.mubr.msk.f32.mxu0 %vm11057_vm1, %v11056_v3 }
 0x72e   :  { %v1014_v10 = vpop.xlane.xlu1 %1013 }
 0x72f   :  { %v1015_v11 = vadd.f32 1e-12, %v1014_v10 }
 0x731   :  { %10868 = vrsqrt.f32 %v1015_v11 }
 0x73b   :  { %v10869_v13 = vpop.eup %10868 }
 0x73c   :  { %v1017_v14 = vmul.f32 %v10869_v13, %v9553_v5 }
 0x7ca   :  { %v840_v8 = vpop.f32.mrb[8].mxu0 }
 0x7cb   :  { %v10062_v9 = vpop.f32.mrb[9].mxu0  ;;  %10064 = vmatpush3.xpose.msk.msra.mxu1 %vm767_vm4, %v840_v8  ;;  %10069 = vmatpush3.msra.mxu0 %v840_v8 }
 0x7cc   :  { %10073 = vmatprep.subr.mxu1 %v11056_v3  ;;  %10078 = vmatprep.subr.mxu0 %v11056_v3 }
 0x7ce   :  { %10066 = vmatmul.mubr.msk.f32.vlgmr.msra.gmra.mrb[10].mxu1 %vm767_vm4, %v840_v8 }
 0x7cf   :  { %10075 = vmatprep.mubr.msk.f32.mxu1 %vm11057_vm1, %v11056_v3  ;;  %10074 = vmatpush3.xpose.msk.msra.mxu1 %vm50_vm0, %v1017_v14 }
 0x7d0   :  { %10083 = vmatprep.subr.mxu1 %v11056_v3 }
 0x7d2   :  { %10076 = vmatmul.mubr.msk.f32.vlgmr.msra.gmra.mrb[12].mxu1 %vm50_vm0, %v1017_v14 }
 0x7d3   :  { %10084 = vmatpush3.msk.msra.mxu1 %vm209_vm3, %v11167_v12  ;;  %10085 = vmatprep.mubr.msk.f32.mxu1 %vm11057_vm1, %v11056_v3 }
 0x7d4   :  { %10093 = vmatprep.subr.mxu1 %v11056_v3 }
 0x8a1   :  { %v913_v15 = vpop.f32.mrb[10].mxu1 }
 0x8a2   :  { %v10067_v16 = vpop.f32.mrb[11].mxu1  ;;  %v917_v17 = vsel %vm132_vm2, %v913_v15, -inf }
 0x8a3   :  { %918 = vmax.xlane.f32.xlu0 %v917_v17 }
 0x8a5   :  { %v1087_v23 = vpop.f32.mrb[12].mxu1 }
 0x8a6   :  { %v10077_v24 = vpop.f32.mrb[13].mxu1  ;;  %v1091_v27 = vmul.f32 %v1087_v23, %v1087_v23  ;;  %v9572_v23 = vld [vmem:[%s12149_s0 + $0x10] sm:$0xff] }
 0x8a7   :  { %v1965_v24 = vmul.f32 %v9572_v23, %v9572_v23 }
 0x8a8   :  { %v1092_v29 = vmul.f32 %v1091_v27, %v1091_v27 }
 0x930   :  { %v919_v18 = vpop.xlane.xlu0 %918 }
 0x931   :  { %v920_v19 = vsub.f32 %v913_v15, %v919_v18 }
 0x933   :  { %v921_v20 = vmul.f32 1.442695, %v920_v19 }
 0x935   :  { %10870 = vpow2.f32 %v921_v20 }
 0x93f   :  { %v10871_v21 = vpop.eup %10870 }
 0x940   :  { %v923_v22 = vsel %vm132_vm2, %v10871_v21, 0.0 }
 0x941   :  { %924 = vadd.xlane.f32.xlu1 %v923_v22 }
 0x9ce   :  { %v925_v25 = vpop.xlane.xlu1 %924 }
 0x9cf   :  { %10872 = vrcp.f32 %v925_v25  ;;  %v1966_v25 = vsel %vm50_vm0, %v1965_v24, 0.0 }
 0x9d9   :  { %v10873_v26 = vpop.eup %10872 }
 0x9da   :  { %v927_v28 = vmul.f32 %v10873_v26, %v10871_v21 }
 0x9dc   :  { %10071 = vmatmul.mubr.msk.f32.vlgmr.msra.gmra.mrb[10].mxu0 %vm132_vm2, %v927_v28 }
 0x9dd   :  { %10079 = vmatpush3.msra.mxu0 %v9553_v5  ;;  %10080 = vmatprep.mubr.msk.f32.mxu0 %vm11057_vm1, %v11056_v3 }
 0x9de   :  { %10088 = vmatprep.subr.mxu0 %v11056_v3 }
 0x9e0   :  { %10081 = vmatmul.mubr.msk.f32.vlgmr.msra.gmra.mrb[12].mxu0 %vm132_vm2, %v1092_v29 }
 0x9e1   :  { %10090 = vmatprep.mubr.msk.f32.mxu0 %vm11057_vm1, %v11056_v3 }
 0xaaf   :  { %v11264_v30 = vpop.f32.mrb[10].mxu0 }
 0xab0   :  { %v10072_v31 = vpop.f32.mrb[11].mxu0 }
 0xab3   :  { %v1162_v32 = vpop.f32.mrb[12].mxu0 }
 0xab4   :  { %v10082_v33 = vpop.f32.mrb[13].mxu0  ;;  %10086 = vmatmul.mubr.msk.f32.vlgmr.msra.gmra.mrb[14].mxu1 %vm50_vm0, %v1162_v32 }
 0xab5   :  { %10095 = vmatprep.mubr.msk.f32.mxu1 %vm11057_vm1, %v11056_v3 }
 0xb87   :  { %v1235_v34 = vpop.f32.mrb[14].mxu1 }
 0xb88   :  { %1555 = vrot.lane.b32.xlu1 %v1235_v34, %s11058_s29  ;;  %1396 = vrot.lane.b32.xlu0 %v1235_v34, %s11059_s30  ;;  %v10087_v35 = vpop.f32.mrb[15].mxu1 }
 0xb89   :  { %10089 = vmatpush3.xpose.msk.msra.mxu0 %vm132_vm2, %v1235_v34  ;;  %10094 = vmatpush3.msra.mxu1 %v1235_v34 }
 0xb8a   :  { %10098 = vmatprep.subr.mxu0 %v11056_v3  ;;  %10103 = vmatprep.subr.mxu1 %v11056_v3 }
 0xb8c   :  { %10091 = vmatmul.mubr.msk.f32.vlgmr.msra.gmra.mrb[14].mxu0 %vm132_vm2, %v1235_v34 }
 0xb8d   :  { %10100 = vmatprep.mubr.msk.f32.mxu0 %vm11057_vm1, %v11056_v3 }
 0xbfa   :  { %v1397_v36 = vpop.permute.xlu0 %1396  ;;  %v1556_v37 = vpop.permute.xlu1 %1555 }
 0xbfb   :  { %10099 = vmatpush3.xpose.msk.msra.mxu0 %vm132_vm2, %v1397_v36 }
 0xbfc   :  { %10108 = vmatprep.subr.mxu0 %v11056_v3 }
 0xbfe   :  { %10101 = vmatmul.mubr.msk.f32.vlgmr.msra.gmra.mrb[16].mxu0 %vm132_vm2, %v1397_v36 }
 0xbff   :  { %10109 = vmatpush3.xpose.msk.msra.mxu0 %vm132_vm2, %v1556_v37  ;;  %10110 = vmatprep.mubr.msk.f32.mxu0 %vm11057_vm1, %v11056_v3 }
 0xc00   :  { %10712 = vmatprep.subr.bf16.mxu0 %v11060_v54 }
 0xc02   :  { %10111 = vmatmul.mubr.msk.f32.vlgmr.msra.gmra.mrb[18].mxu0 %vm132_vm2, %v1556_v37 }
 0xc03   :  { %10714 = vmatpush3.bf16.msra.mxu0 %v11219_v57  ;;  %10124 = vmatprep.mubr.msk.f32.mxu0 %vm11057_vm1, %v11056_v3 }
 0xc04   :  { %10122 = vmatprep.subr.mxu0 %v11056_v3 }
 0xc07   :  { %10123 = vmatpush3.msra.mxu0 %v11226_v58 }
 0xc08   :  { %10137 = vmatprep.subr.mxu0 %v11056_v3 }
 0xc5f   :  { %v1308_v38 = vpop.f32.mrb[14].mxu0 }
 0xc60   :  { %v10092_v39 = vpop.f32.mrb[15].mxu0  ;;  %v1312_v40 = vsel %vm132_vm2, %v1308_v38, -inf }
 0xc61   :  { %1313 = vmax.xlane.f32.xlu1 %v1312_v40 }
 0xcd1   :  { %v1466_v41 = vpop.f32.mrb[16].mxu0 }
 0xcd2   :  { %v10102_v42 = vpop.f32.mrb[17].mxu0  ;;  %v1470_v43 = vsel %vm132_vm2, %v1466_v41, -inf }
 0xcd3   :  { %1471 = vmax.xlane.f32.xlu0 %v1470_v43 }
 0xcd5   :  { %v1625_v44 = vpop.f32.mrb[18].mxu0 }
 0xcd6   :  { %v10112_v45 = vpop.f32.mrb[19].mxu0  ;;  %v1629_v46 = vsel %vm132_vm2, %v1625_v44, -inf }
 0xcd7   :  { %1630 = vmax.xlane.f32.xlu0 %v1629_v46 }
 0xcee   :  { %v1314_v47 = vpop.xlane.xlu1 %1313 }
 0xcef   :  { %v1315_v48 = vsub.f32 %v1308_v38, %v1314_v47 }
 0xcf1   :  { %v1316_v49 = vmul.f32 1.442695, %v1315_v48  ;;  %v1001_v48 = vmax.f32 %v11264_v30, 0.0 }
 0xcf3   :  { %10874 = vpow2.f32 %v1316_v49  ;;  %v1002_v49 = vsel %vm767_vm4, %v1001_v48, -inf }
 0xcfd   :  { %v10875_v50 = vpop.eup %10874 }
 0xcfe   :  { %v1318_v51 = vsel %vm132_vm2, %v10875_v50, 0.0 }
 0xcff   :  { %1319 = vadd.xlane.f32.xlu1 %v1318_v51 }
 0xd60   :  { %v1472_v52 = vpop.xlane.xlu0 %1471 }
 0xd61   :  { %v1473_v53 = vsub.f32 %v1466_v41, %v1472_v52 }
 0xd63   :  { %v1474_v55 = vmul.f32 1.442695, %v1473_v53 }
 0xd64   :  { %v1631_v56 = vpop.xlane.xlu0 %1630 }
 0xd65   :  { %10876 = vpow2.f32 %v1474_v55  ;;  %v1632_v59 = vsub.f32 %v1625_v44, %v1631_v56 }
 0xd67   :  { %v1633_v60 = vmul.f32 1.442695, %v1632_v59 }
 0xd69   :  { %10878 = vpow2.f32 %v1633_v60 }
 0xd6f   :  { %v10877_v61 = vpop.eup %10876 }
 0xd70   :  { %v1476_v62 = vsel %vm132_vm2, %v10877_v61, 0.0 }
 0xd71   :  { %1477 = vadd.xlane.f32.xlu0 %v1476_v62 }
 0xd73   :  { %v10879_v63 = vpop.eup %10878 }
 0xd74   :  { %v1635_v0 = vsel %vm132_vm2, %v10879_v63, 0.0 }
 0xd75   :  { %1636 = vadd.xlane.f32.xlu1 %v1635_v0 }
 0xd8c   :  { %v1320_v1 = vpop.xlane.xlu1 %1319 }
 0xd8d   :  { %10880 = vrcp.f32 %v1320_v1 }
 0xd97   :  { %v10881_v2 = vpop.eup %10880 }
 0xd98   :  { %v1322_v4 = vmul.f32 %v10881_v2, %v10875_v50  ;;  %v1003_v50 = vrot.slane %v1002_v49, 4 }
 0xd9a   :  { %10096 = vmatmul.mubr.msk.f32.vlgmr.msra.gmra.mrb[16].mxu1 %vm132_vm2, %v1322_v4  ;;  %v1004_v51 = vmax.f32 %v1002_v49, %v1003_v50 }
 0xd9b   :  { %10104 = vmatpush3.msra.mxu1 %v1397_v36  ;;  %10105 = vmatprep.mubr.msk.f32.mxu1 %vm11057_vm1, %v11056_v3 }
 0xd9c   :  { %10113 = vmatprep.subr.mxu1 %v11056_v3  ;;  %v1005_v56 = vrot.slane %v1004_v51, 2 }
 0xdfe   :  { %v1478_v5 = vpop.xlane.xlu0 %1477 }
 0xdff   :  { %10882 = vrcp.f32 %v1478_v5 }
 0xe02   :  { %v1637_v6 = vpop.xlane.xlu1 %1636 }
 0xe03   :  { %10884 = vrcp.f32 %v1637_v6 }
 0xe09   :  { %v10883_v7 = vpop.eup %10882 }
 0xe0a   :  { %v1480_v8 = vmul.f32 %v10883_v7, %v10877_v61 }
 0xe0c   :  { %10106 = vmatmul.mubr.msk.f32.vlgmr.msra.gmra.mrb[18].mxu1 %vm132_vm2, %v1480_v8 }
 0xe0d   :  { %v10885_v9 = vpop.eup %10884  ;;  %10114 = vmatpush3.msra.mxu1 %v1556_v37  ;;  %10115 = vmatprep.mubr.msk.f32.mxu1 %vm11057_vm1, %v11056_v3 }
 0xe0e   :  { %v1639_v10 = vmul.f32 %v10885_v9, %v10879_v63  ;;  %10127 = vmatprep.subr.mxu1 %v11056_v3  ;;  %v1006_v63 = vmax.f32 %v1004_v51, %v1005_v56 }
 0xe10   :  { %10116 = vmatmul.mubr.msk.f32.vlgmr.msra.gmra.mrb[20].mxu1 %vm132_vm2, %v1639_v10  ;;  %v1007_v1 = vrot.slane %v1006_v63, 1 }
 0xe11   :  { %10129 = vmatprep.mubr.msk.f32.mxu1 %vm11057_vm1, %v11056_v3 }
 0xe12   :  { %v1008_v5 = vmax.f32 %v1006_v63, %v1007_v1 }
 0xe6d   :  { %v1392_v11 = vpop.f32.mrb[16].mxu1 }
 0xe6e   :  { %v10097_v13 = vpop.f32.mrb[17].mxu1 }
 0xedf   :  { %v1551_v14 = vpop.f32.mrb[18].mxu1 }
 0xee0   :  { %1715 = vrot.lane.b32.xlu0 %v1551_v14, %s11061_s20  ;;  %v10107_v15 = vpop.f32.mrb[19].mxu1 }
 0xee3   :  { %v1710_v16 = vpop.f32.mrb[20].mxu1 }
 0xee4   :  { %1719 = vrot.lane.b32.xlu1 %v1710_v16, %s11062_s21  ;;  %v10117_v17 = vpop.f32.mrb[21].mxu1 }
 0xf08   :  { %1967 = vadd.xlane.f32.xlu1 %v1966_v25 }
 0xf52   :  { %v1716_v18 = vpop.permute.xlu0 %1715 }
 0xf53   :  { %v1722_v19 = vsel %vm132_vm2, %v1392_v11, %v1716_v18 }
 0xf56   :  { %v1720_v20 = vpop.permute.xlu1 %1719 }
 0xf57   :  { %v1723_v21 = vsel %vm767_vm4, %v1722_v19, %v1720_v20 }
 0xf58   :  { %v1724_v22 = vmax.f32 %v1723_v21, 0.0 }
 0xf5a   :  { %10125 = vmatmul.mubr.msk.f32.vlgmr.msra.gmra.mrb[20].mxu0 %vm770_vm5, %v1724_v22 }
 0xf5b   :  { %10139 = vmatprep.mubr.msk.f32.mxu0 %vm11057_vm1, %v11056_v3 }
 0xf95   :  { %v1968_v28 = vpop.xlane.xlu1 %1967 }
 0xf96   :  { %v1969_v29 = vadd.f32 1e-12, %v1968_v28 }
 0xf98   :  { %10886 = vrsqrt.f32 %v1969_v29 }
 0xfa2   :  { %v10887_v31 = vpop.eup %10886 }
 0xfa3   :  { %v1971_v32 = vmul.f32 %v10887_v31, %v9572_v23 }
 0xfa5   :  { %10138 = vmatpush3.xpose.msk.msra.mxu0 %vm50_vm0, %v1971_v32 }
 0xfa6   :  { %10147 = vmatprep.subr.mxu0 %v11056_v3 }
 0xfa8   :  { %10140 = vmatmul.mubr.msk.f32.vlgmr.msra.gmra.mrb[22].mxu0 %vm50_vm0, %v1971_v32 }
 0xfa9   :  { %10148 = vmatpush3.msk.msra.mxu0 %vm209_vm3, %v11167_v12  ;;  %10149 = vmatprep.mubr.msk.f32.mxu0 %vm11057_vm1, %v11056_v3 }
 0xfaa   :  { %10157 = vmatprep.subr.mxu0 %v11056_v3 }
0x102d   :  { %v1794_v26 = vpop.f32.mrb[20].mxu0 }
0x102e   :  { %v10126_v27 = vpop.f32.mrb[21].mxu0  ;;  %10128 = vmatpush3.xpose.msk.msra.mxu1 %vm767_vm4, %v1794_v26 }
0x102f   :  { %10132 = vmatprep.subr.mxu1 %v11056_v3 }
0x1031   :  { %10130 = vmatmul.mubr.msk.f32.vlgmr.msra.gmra.mrb[22].mxu1 %vm767_vm4, %v1794_v26 }
0x1032   :  { %10133 = vmatpush3.msra.mxu1 %v1794_v26  ;;  %10134 = vmatprep.mubr.msk.f32.mxu1 %vm11057_vm1, %v11056_v3 }
0x1033   :  { %10142 = vmatprep.subr.mxu1 %v11056_v3 }
0x107b   :  { %v2041_v41 = vpop.f32.mrb[22].mxu0 }
0x107c   :  { %v10141_v42 = vpop.f32.mrb[23].mxu0  ;;  %v2045_v45 = vmul.f32 %v2041_v41, %v2041_v41 }
0x107e   :  { %v2046_v47 = vmul.f32 %v2045_v45, %v2045_v45 }
0x1104   :  { %v1867_v33 = vpop.f32.mrb[22].mxu1 }
0x1105   :  { %v10131_v34 = vpop.f32.mrb[23].mxu1  ;;  %v1871_v35 = vsel %vm132_vm2, %v1867_v33, -inf }
0x1106   :  { %1872 = vmax.xlane.f32.xlu0 %v1871_v35 }
0x1193   :  { %v1873_v36 = vpop.xlane.xlu0 %1872 }
0x1194   :  { %v1874_v37 = vsub.f32 %v1867_v33, %v1873_v36 }
0x1196   :  { %v1875_v38 = vmul.f32 1.442695, %v1874_v37 }
0x1198   :  { %10888 = vpow2.f32 %v1875_v38 }
0x11a2   :  { %v10889_v39 = vpop.eup %10888 }
0x11a3   :  { %v1877_v40 = vsel %vm132_vm2, %v10889_v39, 0.0 }
0x11a4   :  { %1878 = vadd.xlane.f32.xlu0 %v1877_v40 }
0x1231   :  { %v1879_v43 = vpop.xlane.xlu0 %1878 }
0x1232   :  { %10890 = vrcp.f32 %v1879_v43 }
0x123c   :  { %v10891_v44 = vpop.eup %10890 }
0x123d   :  { %v1881_v46 = vmul.f32 %v10891_v44, %v10889_v39 }
0x123f   :  { %10135 = vmatmul.mubr.msk.f32.vlgmr.msra.gmra.mrb[24].mxu1 %vm132_vm2, %v1881_v46 }
0x1240   :  { %10143 = vmatpush3.msra.mxu1 %v9572_v23  ;;  %10144 = vmatprep.mubr.msk.f32.mxu1 %vm11057_vm1, %v11056_v3 }
0x1241   :  { %10152 = vmatprep.subr.mxu1 %v11056_v3 }
0x1243   :  { %10145 = vmatmul.mubr.msk.f32.vlgmr.msra.gmra.mrb[26].mxu1 %vm132_vm2, %v2046_v47 }
0x1244   :  { %10154 = vmatprep.mubr.msk.f32.mxu1 %vm11057_vm1, %v11056_v3 }
0x1312   :  { %v1951_v52 = vpop.f32.mrb[24].mxu1 }
0x1313   :  { %v1955_v53 = vmax.f32 %v1951_v52, 0.0  ;;  %v10136_v55 = vpop.f32.mrb[25].mxu1 }
0x1315   :  { %v1956_v59 = vsel %vm767_vm4, %v1955_v53, -inf }
0x1316   :  { %v1957_v60 = vrot.slane %v1956_v59, 4  ;;  %v2116_v61 = vpop.f32.mrb[26].mxu1 }
0x1317   :  { %v10146_v62 = vpop.f32.mrb[27].mxu1  ;;  %10150 = vmatmul.mubr.msk.f32.vlgmr.msra.gmra.mrb[24].mxu0 %vm50_vm0, %v2116_v61  ;;  %v9591_v61 = vld [vmem:[%s12149_s0 + $0x18] sm:$0xff] }
0x1318   :  { %v1958_v0 = vmax.f32 %v1956_v59, %v1957_v60  ;;  %10159 = vmatprep.mubr.msk.f32.mxu0 %vm11057_vm1, %v11056_v3  ;;  %v2919_v62 = vmul.f32 %v9591_v61, %v9591_v61 }
0x131a   :  { %v1959_v30 = vrot.slane %v1958_v0, 2  ;;  %v2920_v63 = vsel %vm50_vm0, %v2919_v62, 0.0 }
0x131c   :  { %v1960_v2 = vmax.f32 %v1958_v0, %v1959_v30 }
0x131e   :  { %v1961_v4 = vrot.slane %v1960_v2, 1 }
0x1320   :  { %v1962_v6 = vmax.f32 %v1960_v2, %v1961_v4 }
0x1322   :  { %v11349_v7 = vsel %vm7687_vm6, %v1008_v5, %v1962_v6 }
0x13ea   :  { %v2189_v8 = vpop.f32.mrb[24].mxu0 }
0x13eb   :  { %2509 = vrot.lane.b32.xlu0 %v2189_v8, %s11058_s29  ;;  %2350 = vrot.lane.b32.xlu1 %v2189_v8, %s11059_s30  ;;  %v10151_v9 = vpop.f32.mrb[25].mxu0 }
0x13ec   :  { %10153 = vmatpush3.xpose.msk.msra.mxu1 %vm132_vm2, %v2189_v8  ;;  %10158 = vmatpush3.msra.mxu0 %v2189_v8 }
0x13ed   :  { %10162 = vmatprep.subr.mxu1 %v11056_v3  ;;  %10167 = vmatprep.subr.mxu0 %v11056_v3 }
0x13ef   :  { %10155 = vmatmul.mubr.msk.f32.vlgmr.msra.gmra.mrb[28].mxu1 %vm132_vm2, %v2189_v8 }
0x13f0   :  { %10164 = vmatprep.mubr.msk.f32.mxu1 %vm11057_vm1, %v11056_v3 }
0x145d   :  { %v2351_v10 = vpop.permute.xlu1 %2350  ;;  %v2510_v11 = vpop.permute.xlu0 %2509 }
0x145e   :  { %10163 = vmatpush3.xpose.msk.msra.mxu1 %vm132_vm2, %v2351_v10 }
0x145f   :  { %10172 = vmatprep.subr.mxu1 %v11056_v3 }
0x1461   :  { %10165 = vmatmul.mubr.msk.f32.vlgmr.msra.gmra.mrb[30].mxu1 %vm132_vm2, %v2351_v10 }
0x1462   :  { %10173 = vmatpush3.xpose.msk.msra.mxu1 %vm132_vm2, %v2510_v11  ;;  %10174 = vmatprep.mubr.msk.f32.mxu1 %vm11057_vm1, %v11056_v3 }
0x1463   :  { %10715 = vmatprep.subr.bf16.mxu1 %v11060_v54 }
0x1465   :  { %10175 = vmatmul.mubr.msk.f32.vlgmr.msra.gmra.mrb[32].mxu1 %vm132_vm2, %v2510_v11 }
0x1466   :  { %10717 = vmatpush3.bf16.msra.mxu1 %v11219_v57  ;;  %10188 = vmatprep.mubr.msk.f32.mxu1 %vm11057_vm1, %v11056_v3 }
0x1467   :  { %10186 = vmatprep.subr.mxu1 %v11056_v3 }
0x146a   :  { %10187 = vmatpush3.msra.mxu1 %v11226_v58 }
0x146b   :  { %10201 = vmatprep.subr.mxu1 %v11056_v3 }
0x14c2   :  { %v2262_v13 = vpop.f32.mrb[28].mxu1 }
0x14c3   :  { %v10156_v14 = vpop.f32.mrb[29].mxu1  ;;  %v2266_v15 = vsel %vm132_vm2, %v2262_v13, -inf }
0x14c4   :  { %2267 = vmax.xlane.f32.xlu1 %v2266_v15 }
0x1534   :  { %v2420_v16 = vpop.f32.mrb[30].mxu1 }
0x1535   :  { %v10166_v17 = vpop.f32.mrb[31].mxu1  ;;  %v2424_v18 = vsel %vm132_vm2, %v2420_v16, -inf }
0x1536   :  { %2425 = vmax.xlane.f32.xlu0 %v2424_v18 }
0x1538   :  { %v2579_v19 = vpop.f32.mrb[32].mxu1 }
0x1539   :  { %v10176_v20 = vpop.f32.mrb[33].mxu1  ;;  %v2583_v21 = vsel %vm132_vm2, %v2579_v19, -inf }
0x153a   :  { %2584 = vmax.xlane.f32.xlu1 %v2583_v21 }
0x1551   :  { %v2268_v22 = vpop.xlane.xlu1 %2267 }
0x1552   :  { %v2269_v23 = vsub.f32 %v2262_v13, %v2268_v22 }
0x1554   :  { %v2270_v24 = vmul.f32 1.442695, %v2269_v23 }
0x1556   :  { %10892 = vpow2.f32 %v2270_v24 }
0x1560   :  { %v10893_v25 = vpop.eup %10892 }
0x1561   :  { %v2272_v26 = vsel %vm132_vm2, %v10893_v25, 0.0 }
0x1562   :  { %2273 = vadd.xlane.f32.xlu0 %v2272_v26 }
0x15c3   :  { %v2426_v27 = vpop.xlane.xlu0 %2425 }
0x15c4   :  { %v2427_v28 = vsub.f32 %v2420_v16, %v2426_v27 }
0x15c6   :  { %v2428_v29 = vmul.f32 1.442695, %v2427_v28 }
0x15c7   :  { %v2585_v31 = vpop.xlane.xlu1 %2584 }
0x15c8   :  { %10894 = vpow2.f32 %v2428_v29  ;;  %v2586_v32 = vsub.f32 %v2579_v19, %v2585_v31 }
0x15ca   :  { %v2587_v33 = vmul.f32 1.442695, %v2586_v32 }
0x15cc   :  { %10896 = vpow2.f32 %v2587_v33 }
0x15d2   :  { %v10895_v34 = vpop.eup %10894 }
0x15d3   :  { %v2430_v35 = vsel %vm132_vm2, %v10895_v34, 0.0 }
0x15d4   :  { %2431 = vadd.xlane.f32.xlu1 %v2430_v35 }
0x15d6   :  { %v10897_v36 = vpop.eup %10896 }
0x15d7   :  { %v2589_v37 = vsel %vm132_vm2, %v10897_v36, 0.0 }
0x15d8   :  { %2590 = vadd.xlane.f32.xlu0 %v2589_v37 }
0x15ef   :  { %v2274_v38 = vpop.xlane.xlu0 %2273 }
0x15f0   :  { %10898 = vrcp.f32 %v2274_v38 }
0x15fa   :  { %v10899_v39 = vpop.eup %10898 }
0x15fb   :  { %v2276_v40 = vmul.f32 %v10899_v39, %v10893_v25 }
0x15fd   :  { %10160 = vmatmul.mubr.msk.f32.vlgmr.msra.gmra.mrb[26].mxu0 %vm132_vm2, %v2276_v40 }
0x15fe   :  { %10168 = vmatpush3.msra.mxu0 %v2351_v10  ;;  %10169 = vmatprep.mubr.msk.f32.mxu0 %vm11057_vm1, %v11056_v3 }
0x15ff   :  { %10177 = vmatprep.subr.mxu0 %v11056_v3 }
0x1661   :  { %v2432_v41 = vpop.xlane.xlu1 %2431 }
0x1662   :  { %10900 = vrcp.f32 %v2432_v41 }
0x1665   :  { %v2591_v42 = vpop.xlane.xlu0 %2590 }
0x1666   :  { %10902 = vrcp.f32 %v2591_v42 }
0x166c   :  { %v10901_v43 = vpop.eup %10900 }
0x166d   :  { %v2434_v44 = vmul.f32 %v10901_v43, %v10895_v34 }
0x166f   :  { %10170 = vmatmul.mubr.msk.f32.vlgmr.msra.gmra.mrb[28].mxu0 %vm132_vm2, %v2434_v44 }
0x1670   :  { %v10903_v45 = vpop.eup %10902  ;;  %10178 = vmatpush3.msra.mxu0 %v2510_v11  ;;  %10179 = vmatprep.mubr.msk.f32.mxu0 %vm11057_vm1, %v11056_v3 }
0x1671   :  { %v2593_v46 = vmul.f32 %v10903_v45, %v10897_v36  ;;  %10191 = vmatprep.subr.mxu0 %v11056_v3 }
0x1673   :  { %10180 = vmatmul.mubr.msk.f32.vlgmr.msra.gmra.mrb[30].mxu0 %vm132_vm2, %v2593_v46 }
0x1674   :  { %10193 = vmatprep.mubr.msk.f32.mxu0 %vm11057_vm1, %v11056_v3 }
0x16d0   :  { %v2346_v47 = vpop.f32.mrb[26].mxu0 }
0x16d1   :  { %v10161_v48 = vpop.f32.mrb[27].mxu0 }
0x1742   :  { %v2505_v49 = vpop.f32.mrb[28].mxu0 }
0x1743   :  { %2669 = vrot.lane.b32.xlu1 %v2505_v49, %s11061_s20  ;;  %v10171_v50 = vpop.f32.mrb[29].mxu0 }
0x1746   :  { %v2664_v51 = vpop.f32.mrb[30].mxu0 }
0x1747   :  { %2673 = vrot.lane.b32.xlu0 %v2664_v51, %s11062_s21  ;;  %v10181_v52 = vpop.f32.mrb[31].mxu0 }
0x1767   :  { %2921 = vadd.xlane.f32.xlu1 %v2920_v63 }
0x17b5   :  { %v2670_v53 = vpop.permute.xlu1 %2669 }
0x17b6   :  { %v2676_v55 = vsel %vm132_vm2, %v2346_v47, %v2670_v53 }
0x17b9   :  { %v2674_v56 = vpop.permute.xlu0 %2673 }
0x17ba   :  { %v2677_v59 = vsel %vm767_vm4, %v2676_v55, %v2674_v56 }
0x17bb   :  { %v2678_v60 = vmax.f32 %v2677_v59, 0.0 }
0x17bd   :  { %10189 = vmatmul.mubr.msk.f32.vlgmr.msra.gmra.mrb[34].mxu1 %vm770_vm5, %v2678_v60 }
0x17be   :  { %10203 = vmatprep.mubr.msk.f32.mxu1 %vm11057_vm1, %v11056_v3 }
0x17f4   :  { %v2922_v1 = vpop.xlane.xlu1 %2921 }
0x17f5   :  { %v2923_v2 = vadd.f32 1e-12, %v2922_v1 }
0x17f7   :  { %10904 = vrsqrt.f32 %v2923_v2 }
0x1801   :  { %v10905_v4 = vpop.eup %10904 }
0x1802   :  { %v2925_v5 = vmul.f32 %v10905_v4, %v9591_v61 }
0x1804   :  { %10202 = vmatpush3.xpose.msk.msra.mxu1 %vm50_vm0, %v2925_v5 }
0x1805   :  { %10211 = vmatprep.subr.mxu1 %v11056_v3 }
0x1807   :  { %10204 = vmatmul.mubr.msk.f32.vlgmr.msra.gmra.mrb[36].mxu1 %vm50_vm0, %v2925_v5 }
0x1808   :  { %10212 = vmatpush3.msk.msra.mxu1 %vm209_vm3, %v11167_v12  ;;  %10213 = vmatprep.mubr.msk.f32.mxu1 %vm11057_vm1, %v11056_v3 }
0x1809   :  { %10221 = vmatprep.subr.mxu1 %v11056_v3 }
0x1890   :  { %v2748_v0 = vpop.f32.mrb[34].mxu1 }
0x1891   :  { %v10190_v30 = vpop.f32.mrb[35].mxu1  ;;  %10192 = vmatpush3.xpose.msk.msra.mxu0 %vm767_vm4, %v2748_v0 }
0x1892   :  { %10196 = vmatprep.subr.mxu0 %v11056_v3 }
0x1894   :  { %10194 = vmatmul.mubr.msk.f32.vlgmr.msra.gmra.mrb[32].mxu0 %vm767_vm4, %v2748_v0 }
0x1895   :  { %10197 = vmatpush3.msra.mxu0 %v2748_v0  ;;  %10198 = vmatprep.mubr.msk.f32.mxu0 %vm11057_vm1, %v11056_v3 }
0x1896   :  { %10206 = vmatprep.subr.mxu0 %v11056_v3 }
0x18da   :  { %v2995_v16 = vpop.f32.mrb[36].mxu1 }
0x18db   :  { %v10205_v12 = vpop.f32.mrb[37].mxu1  ;;  %v2999_v19 = vmul.f32 %v2995_v16, %v2995_v16 }
0x18dd   :  { %v3000_v21 = vmul.f32 %v2999_v19, %v2999_v19 }
0x1967   :  { %v2821_v6 = vpop.f32.mrb[32].mxu0 }
0x1968   :  { %v10195_v8 = vpop.f32.mrb[33].mxu0  ;;  %v2825_v9 = vsel %vm132_vm2, %v2821_v6, -inf }
0x1969   :  { %2826 = vmax.xlane.f32.xlu0 %v2825_v9 }
0x19f6   :  { %v2827_v10 = vpop.xlane.xlu0 %2826 }
0x19f7   :  { %v2828_v11 = vsub.f32 %v2821_v6, %v2827_v10 }
0x19f9   :  { %v2829_v13 = vmul.f32 1.442695, %v2828_v11 }
0x19fb   :  { %10906 = vpow2.f32 %v2829_v13 }
0x1a05   :  { %v10907_v14 = vpop.eup %10906 }
0x1a06   :  { %v2831_v15 = vsel %vm132_vm2, %v10907_v14, 0.0 }
0x1a07   :  { %2832 = vadd.xlane.f32.xlu1 %v2831_v15 }
0x1a94   :  { %v2833_v17 = vpop.xlane.xlu1 %2832 }
0x1a95   :  { %10908 = vrcp.f32 %v2833_v17 }
0x1a9f   :  { %v10909_v18 = vpop.eup %10908 }
0x1aa0   :  { %v2835_v20 = vmul.f32 %v10909_v18, %v10907_v14 }
0x1aa2   :  { %10199 = vmatmul.mubr.msk.f32.vlgmr.msra.gmra.mrb[34].mxu0 %vm132_vm2, %v2835_v20 }
0x1aa3   :  { %10207 = vmatpush3.msra.mxu0 %v9591_v61  ;;  %10208 = vmatprep.mubr.msk.f32.mxu0 %vm11057_vm1, %v11056_v3 }
0x1aa4   :  { %10216 = vmatprep.subr.mxu0 %v11056_v3 }
0x1aa6   :  { %10209 = vmatmul.mubr.msk.f32.vlgmr.msra.gmra.mrb[36].mxu0 %vm132_vm2, %v3000_v21 }
0x1aa7   :  { %10218 = vmatprep.mubr.msk.f32.mxu0 %vm11057_vm1, %v11056_v3 }
0x1b75   :  { %v2905_v22 = vpop.f32.mrb[34].mxu0 }
0x1b76   :  { %v2909_v23 = vmax.f32 %v2905_v22, 0.0  ;;  %v10200_v24 = vpop.f32.mrb[35].mxu0  ;;  %v9610_v22 = vld [vmem:[%s12149_s0 + $0x20] sm:$0xff] }
0x1b78   :  { %v2910_v25 = vsel %vm767_vm4, %v2909_v23, -inf  ;;  %v3873_v23 = vmul.f32 %v9610_v22, %v9610_v22 }
0x1b79   :  { %v2911_v26 = vrot.slane %v2910_v25, 4  ;;  %v3070_v27 = vpop.f32.mrb[36].mxu0 }
0x1b7a   :  { %v10210_v28 = vpop.f32.mrb[37].mxu0  ;;  %10214 = vmatmul.mubr.msk.f32.vlgmr.msra.gmra.mrb[38].mxu1 %vm50_vm0, %v3070_v27  ;;  %v3874_v24 = vsel %vm50_vm0, %v3873_v23, 0.0 }
0x1b7b   :  { %v2912_v29 = vmax.f32 %v2910_v25, %v2911_v26  ;;  %10223 = vmatprep.mubr.msk.f32.mxu1 %vm11057_vm1, %v11056_v3 }
0x1b7d   :  { %v2913_v31 = vrot.slane %v2912_v29, 2 }
0x1b7f   :  { %v2914_v32 = vmax.f32 %v2912_v29, %v2913_v31 }
0x1b81   :  { %v2915_v33 = vrot.slane %v2914_v32, 1 }
0x1b83   :  { %v2916_v34 = vmax.f32 %v2914_v32, %v2915_v33  ;;  %v11494_v32 = vld [vmem:[%s12150_s3] sm:$0xf]  ;;  %s11070_s3 = smov 122  }
0x1b85   :  { %v11430_v35 = vsel %vm7689_vm7, %v11349_v7, %v2916_v34 }
0x1c4d   :  { %v3143_v36 = vpop.f32.mrb[38].mxu1 }
0x1c4e   :  { %3463 = vrot.lane.b32.xlu1 %v3143_v36, %s11058_s29  ;;  %3304 = vrot.lane.b32.xlu0 %v3143_v36, %s11059_s30  ;;  %v10215_v37 = vpop.f32.mrb[39].mxu1 }
0x1c4f   :  { %10217 = vmatpush3.xpose.msk.msra.mxu0 %vm132_vm2, %v3143_v36  ;;  %10222 = vmatpush3.msra.mxu1 %v3143_v36 }
0x1c50   :  { %10226 = vmatprep.subr.mxu0 %v11056_v3  ;;  %10231 = vmatprep.subr.mxu1 %v11056_v3 }
0x1c52   :  { %10219 = vmatmul.mubr.msk.f32.vlgmr.msra.gmra.mrb[38].mxu0 %vm132_vm2, %v3143_v36 }
0x1c53   :  { %10228 = vmatprep.mubr.msk.f32.mxu0 %vm11057_vm1, %v11056_v3 }
0x1cc0   :  { %v3305_v7 = vpop.permute.xlu0 %3304  ;;  %v3464_v38 = vpop.permute.xlu1 %3463 }
0x1cc1   :  { %10227 = vmatpush3.xpose.msk.msra.mxu0 %vm132_vm2, %v3305_v7 }
0x1cc2   :  { %10236 = vmatprep.subr.mxu0 %v11056_v3 }
0x1cc4   :  { %10229 = vmatmul.mubr.msk.f32.vlgmr.msra.gmra.mrb[40].mxu0 %vm132_vm2, %v3305_v7 }
0x1cc5   :  { %10237 = vmatpush3.xpose.msk.msra.mxu0 %vm132_vm2, %v3464_v38  ;;  %10238 = vmatprep.mubr.msk.f32.mxu0 %vm11057_vm1, %v11056_v3 }
0x1cc6   :  { %10718 = vmatprep.subr.bf16.mxu0 %v11060_v54 }
0x1cc8   :  { %10239 = vmatmul.mubr.msk.f32.vlgmr.msra.gmra.mrb[42].mxu0 %vm132_vm2, %v3464_v38 }
0x1cc9   :  { %10720 = vmatpush3.bf16.msra.mxu0 %v11219_v57  ;;  %10252 = vmatprep.mubr.msk.f32.mxu0 %vm11057_vm1, %v11056_v3 }
0x1cca   :  { %10250 = vmatprep.subr.mxu0 %v11056_v3 }
0x1ccd   :  { %10251 = vmatpush3.msra.mxu0 %v11226_v58 }
0x1cce   :  { %10265 = vmatprep.subr.mxu0 %v11056_v3 }
0x1d25   :  { %v3216_v39 = vpop.f32.mrb[38].mxu0 }
0x1d26   :  { %v10220_v40 = vpop.f32.mrb[39].mxu0  ;;  %v3220_v41 = vsel %vm132_vm2, %v3216_v39, -inf }
0x1d27   :  { %3221 = vmax.xlane.f32.xlu1 %v3220_v41 }
0x1d97   :  { %v3374_v42 = vpop.f32.mrb[40].mxu0 }
0x1d98   :  { %v10230_v43 = vpop.f32.mrb[41].mxu0  ;;  %v3378_v44 = vsel %vm132_vm2, %v3374_v42, -inf }
0x1d99   :  { %3379 = vmax.xlane.f32.xlu0 %v3378_v44 }
0x1d9b   :  { %v3533_v45 = vpop.f32.mrb[42].mxu0 }
0x1d9c   :  { %v10240_v46 = vpop.f32.mrb[43].mxu0  ;;  %v3537_v47 = vsel %vm132_vm2, %v3533_v45, -inf }
0x1d9d   :  { %3538 = vmax.xlane.f32.xlu0 %v3537_v47 }
0x1db4   :  { %v3222_v48 = vpop.xlane.xlu1 %3221 }
0x1db5   :  { %v3223_v49 = vsub.f32 %v3216_v39, %v3222_v48 }
0x1db7   :  { %v3224_v58 = vmul.f32 1.442695, %v3223_v49 }
0x1db9   :  { %10910 = vpow2.f32 %v3224_v58 }
0x1dc3   :  { %v10911_v50 = vpop.eup %10910 }
0x1dc4   :  { %v3226_v51 = vsel %vm132_vm2, %v10911_v50, 0.0 }
0x1dc5   :  { %3227 = vadd.xlane.f32.xlu1 %v3226_v51 }
0x1e26   :  { %v3380_v52 = vpop.xlane.xlu0 %3379 }
0x1e27   :  { %v3381_v53 = vsub.f32 %v3374_v42, %v3380_v52 }
0x1e29   :  { %v3382_v55 = vmul.f32 1.442695, %v3381_v53 }
0x1e2a   :  { %v3539_v56 = vpop.xlane.xlu0 %3538 }
0x1e2b   :  { %10912 = vpow2.f32 %v3382_v55  ;;  %v3540_v59 = vsub.f32 %v3533_v45, %v3539_v56 }
0x1e2d   :  { %v3541_v60 = vmul.f32 1.442695, %v3540_v59 }
0x1e2f   :  { %10914 = vpow2.f32 %v3541_v60 }
0x1e35   :  { %v10913_v61 = vpop.eup %10912 }
0x1e36   :  { %v3384_v62 = vsel %vm132_vm2, %v10913_v61, 0.0 }
0x1e37   :  { %3385 = vadd.xlane.f32.xlu0 %v3384_v62 }
0x1e39   :  { %v10915_v63 = vpop.eup %10914 }
0x1e3a   :  { %v3543_v0 = vsel %vm132_vm2, %v10915_v63, 0.0 }
0x1e3b   :  { %3544 = vadd.xlane.f32.xlu1 %v3543_v0 }
0x1e52   :  { %v3228_v30 = vpop.xlane.xlu1 %3227 }
0x1e53   :  { %10916 = vrcp.f32 %v3228_v30 }
0x1e5d   :  { %v10917_v1 = vpop.eup %10916 }
0x1e5e   :  { %v3230_v2 = vmul.f32 %v10917_v1, %v10911_v50  ;;  %v11541_v1 = vld [vmem:[%s12151_s4 + $0x10] sm:$0xff]  ;;  %s11063_s4 = smov 64  }
0x1e60   :  { %10224 = vmatmul.mubr.msk.f32.vlgmr.msra.gmra.mrb[40].mxu1 %vm132_vm2, %v3230_v2 }
0x1e61   :  { %10232 = vmatpush3.msra.mxu1 %v3305_v7  ;;  %10233 = vmatprep.mubr.msk.f32.mxu1 %vm11057_vm1, %v11056_v3 }
0x1e62   :  { %10241 = vmatprep.subr.mxu1 %v11056_v3 }
0x1ec4   :  { %v3386_v4 = vpop.xlane.xlu0 %3385 }
0x1ec5   :  { %10918 = vrcp.f32 %v3386_v4 }
0x1ec8   :  { %v3545_v5 = vpop.xlane.xlu1 %3544 }
0x1ec9   :  { %10920 = vrcp.f32 %v3545_v5 }
0x1ecf   :  { %v10919_v6 = vpop.eup %10918 }
0x1ed0   :  { %v3388_v8 = vmul.f32 %v10919_v6, %v10913_v61 }
0x1ed2   :  { %10234 = vmatmul.mubr.msk.f32.vlgmr.msra.gmra.mrb[42].mxu1 %vm132_vm2, %v3388_v8 }
0x1ed3   :  { %v10921_v9 = vpop.eup %10920  ;;  %10242 = vmatpush3.msra.mxu1 %v3464_v38  ;;  %10243 = vmatprep.mubr.msk.f32.mxu1 %vm11057_vm1, %v11056_v3 }
0x1ed4   :  { %v3547_v10 = vmul.f32 %v10921_v9, %v10915_v63  ;;  %10255 = vmatprep.subr.mxu1 %v11056_v3 }
0x1ed6   :  { %10244 = vmatmul.mubr.msk.f32.vlgmr.msra.gmra.mrb[44].mxu1 %vm132_vm2, %v3547_v10 }
0x1ed7   :  { %10257 = vmatprep.mubr.msk.f32.mxu1 %vm11057_vm1, %v11056_v3 }
0x1f33   :  { %v3300_v11 = vpop.f32.mrb[40].mxu1 }
0x1f34   :  { %v10225_v13 = vpop.f32.mrb[41].mxu1 }
0x1fa5   :  { %v3459_v14 = vpop.f32.mrb[42].mxu1 }
0x1fa6   :  { %3623 = vrot.lane.b32.xlu0 %v3459_v14, %s11061_s20  ;;  %v10235_v15 = vpop.f32.mrb[43].mxu1 }
0x1fa9   :  { %v3618_v16 = vpop.f32.mrb[44].mxu1 }
0x1faa   :  { %3627 = vrot.lane.b32.xlu1 %v3618_v16, %s11062_s21  ;;  %v10245_v12 = vpop.f32.mrb[45].mxu1 }
0x1fce   :  { %3875 = vadd.xlane.f32.xlu1 %v3874_v24 }
0x2018   :  { %v3624_v17 = vpop.permute.xlu0 %3623 }
0x2019   :  { %v3630_v18 = vsel %vm132_vm2, %v3300_v11, %v3624_v17 }
0x201c   :  { %v3628_v19 = vpop.permute.xlu1 %3627 }
0x201d   :  { %v3631_v20 = vsel %vm767_vm4, %v3630_v18, %v3628_v19 }
0x201e   :  { %v3632_v21 = vmax.f32 %v3631_v20, 0.0 }
0x2020   :  { %10253 = vmatmul.mubr.msk.f32.vlgmr.msra.gmra.mrb[44].mxu0 %vm770_vm5, %v3632_v21 }
0x2021   :  { %10267 = vmatprep.mubr.msk.f32.mxu0 %vm11057_vm1, %v11056_v3 }
0x205b   :  { %v3876_v27 = vpop.xlane.xlu1 %3875 }
0x205c   :  { %v3877_v28 = vadd.f32 1e-12, %v3876_v27 }
0x205e   :  { %10922 = vrsqrt.f32 %v3877_v28 }
0x2068   :  { %v10923_v29 = vpop.eup %10922 }
0x2069   :  { %v3879_v31 = vmul.f32 %v10923_v29, %v9610_v22 }
0x206b   :  { %10266 = vmatpush3.xpose.msk.msra.mxu0 %vm50_vm0, %v3879_v31 }
0x206c   :  { %10275 = vmatprep.subr.mxu0 %v11056_v3 }
0x206e   :  { %10268 = vmatmul.mubr.msk.f32.vlgmr.msra.gmra.mrb[46].mxu0 %vm50_vm0, %v3879_v31 }
0x206f   :  { %10276 = vmatpush3.msk.msra.mxu0 %vm209_vm3, %v11494_v32  ;;  %10277 = vmatprep.mubr.msk.f32.mxu0 %vm11057_vm1, %v11056_v3 }
0x2070   :  { %10285 = vmatprep.subr.mxu0 %v11056_v3 }
0x20f3   :  { %v3702_v25 = vpop.f32.mrb[44].mxu0 }
0x20f4   :  { %v10254_v26 = vpop.f32.mrb[45].mxu0  ;;  %10256 = vmatpush3.xpose.msk.msra.mxu1 %vm767_vm4, %v3702_v25 }
0x20f5   :  { %10260 = vmatprep.subr.mxu1 %v11056_v3 }
0x20f7   :  { %10258 = vmatmul.mubr.msk.f32.vlgmr.msra.gmra.mrb[46].mxu1 %vm767_vm4, %v3702_v25 }
0x20f8   :  { %10261 = vmatpush3.msra.mxu1 %v3702_v25  ;;  %10262 = vmatprep.mubr.msk.f32.mxu1 %vm11057_vm1, %v11056_v3 }
0x20f9   :  { %10270 = vmatprep.subr.mxu1 %v11056_v3 }
0x2141   :  { %v3949_v41 = vpop.f32.mrb[46].mxu0 }
0x2142   :  { %v10269_v42 = vpop.f32.mrb[47].mxu0  ;;  %v3953_v45 = vmul.f32 %v3949_v41, %v3949_v41 }
0x2144   :  { %v3954_v47 = vmul.f32 %v3953_v45, %v3953_v45 }
0x21ca   :  { %v3775_v33 = vpop.f32.mrb[46].mxu1 }
0x21cb   :  { %v10259_v34 = vpop.f32.mrb[47].mxu1  ;;  %v3779_v36 = vsel %vm132_vm2, %v3775_v33, -inf }
0x21cc   :  { %3780 = vmax.xlane.f32.xlu0 %v3779_v36 }
0x2259   :  { %v3781_v37 = vpop.xlane.xlu0 %3780 }
0x225a   :  { %v3782_v7 = vsub.f32 %v3775_v33, %v3781_v37 }
0x225c   :  { %v3783_v38 = vmul.f32 1.442695, %v3782_v7 }
0x225e   :  { %10924 = vpow2.f32 %v3783_v38 }
0x2268   :  { %v10925_v39 = vpop.eup %10924 }
0x2269   :  { %v3785_v40 = vsel %vm132_vm2, %v10925_v39, 0.0 }
0x226a   :  { %3786 = vadd.xlane.f32.xlu0 %v3785_v40 }
0x22f7   :  { %v3787_v43 = vpop.xlane.xlu0 %3786 }
0x22f8   :  { %10926 = vrcp.f32 %v3787_v43 }
0x2302   :  { %v10927_v44 = vpop.eup %10926 }
0x2303   :  { %v3789_v46 = vmul.f32 %v10927_v44, %v10925_v39 }
0x2305   :  { %10263 = vmatmul.mubr.msk.f32.vlgmr.msra.gmra.mrb[48].mxu1 %vm132_vm2, %v3789_v46 }
0x2306   :  { %10271 = vmatpush3.msra.mxu1 %v9610_v22  ;;  %10272 = vmatprep.mubr.msk.f32.mxu1 %vm11057_vm1, %v11056_v3 }
0x2307   :  { %10280 = vmatprep.subr.mxu1 %v11056_v3 }
0x2309   :  { %10273 = vmatmul.mubr.msk.f32.vlgmr.msra.gmra.mrb[50].mxu1 %vm132_vm2, %v3954_v47 }
0x230a   :  { %10282 = vmatprep.mubr.msk.f32.mxu1 %vm11057_vm1, %v11056_v3 }
0x23d8   :  { %v3859_v48 = vpop.f32.mrb[48].mxu1 }
0x23d9   :  { %v3863_v49 = vmax.f32 %v3859_v48, 0.0  ;;  %v10264_v58 = vpop.f32.mrb[49].mxu1 }
0x23da   :  { %v9629_v58 = vld [vmem:[%s12149_s0 + $0x28] sm:$0xff] }
0x23db   :  { %v3864_v50 = vsel %vm767_vm4, %v3863_v49, -inf }
0x23dc   :  { %v3865_v51 = vrot.slane %v3864_v50, 4  ;;  %v4024_v52 = vpop.f32.mrb[50].mxu1 }
0x23dd   :  { %v10274_v53 = vpop.f32.mrb[51].mxu1  ;;  %10278 = vmatmul.mubr.msk.f32.vlgmr.msra.gmra.mrb[48].mxu0 %vm50_vm0, %v4024_v52 }
0x23de   :  { %v3866_v55 = vmax.f32 %v3864_v50, %v3865_v51  ;;  %10287 = vmatprep.mubr.msk.f32.mxu0 %vm11057_vm1, %v11056_v3  ;;  %v4827_v50 = vmul.f32 %v9629_v58, %v9629_v58 }
0x23e0   :  { %v3867_v56 = vrot.slane %v3866_v55, 2  ;;  %v4828_v51 = vsel %vm50_vm0, %v4827_v50, 0.0 }
0x23e2   :  { %v3868_v59 = vmax.f32 %v3866_v55, %v3867_v56 }
0x23e4   :  { %v3869_v60 = vrot.slane %v3868_v59, 1 }
0x23e6   :  { %v3870_v61 = vmax.f32 %v3868_v59, %v3869_v60 }
0x23e8   :  { %v11516_v62 = vsel %vm7691_vm8, %v11430_v35, %v3870_v61 }
0x24b0   :  { %v4097_v63 = vpop.f32.mrb[48].mxu0 }
0x24b1   :  { %4417 = vrot.lane.b32.xlu0 %v4097_v63, %s11058_s29  ;;  %4258 = vrot.lane.b32.xlu1 %v4097_v63, %s11059_s30  ;;  %v10279_v0 = vpop.f32.mrb[49].mxu0 }
0x24b2   :  { %10281 = vmatpush3.xpose.msk.msra.mxu1 %vm132_vm2, %v4097_v63  ;;  %10286 = vmatpush3.msra.mxu0 %v4097_v63 }
0x24b3   :  { %10290 = vmatprep.subr.mxu1 %v11056_v3  ;;  %10295 = vmatprep.subr.mxu0 %v11056_v3 }
0x24b5   :  { %10283 = vmatmul.mubr.msk.f32.vlgmr.msra.gmra.mrb[52].mxu1 %vm132_vm2, %v4097_v63 }
0x24b6   :  { %10292 = vmatprep.mubr.msk.f32.mxu1 %vm11057_vm1, %v11056_v3 }
0x2523   :  { %v4259_v35 = vpop.permute.xlu1 %4258  ;;  %v4418_v30 = vpop.permute.xlu0 %4417 }
0x2524   :  { %10291 = vmatpush3.xpose.msk.msra.mxu1 %vm132_vm2, %v4259_v35 }
0x2525   :  { %10300 = vmatprep.subr.mxu1 %v11056_v3 }
0x2527   :  { %10293 = vmatmul.mubr.msk.f32.vlgmr.msra.gmra.mrb[54].mxu1 %vm132_vm2, %v4259_v35 }
0x2528   :  { %10301 = vmatpush3.xpose.msk.msra.mxu1 %vm132_vm2, %v4418_v30  ;;  %10302 = vmatprep.mubr.msk.f32.mxu1 %vm11057_vm1, %v11056_v3 }
0x2529   :  { %10721 = vmatprep.subr.bf16.mxu1 %v11060_v54 }
0x252b   :  { %10303 = vmatmul.mubr.msk.f32.vlgmr.msra.gmra.mrb[56].mxu1 %vm132_vm2, %v4418_v30 }
0x252c   :  { %10723 = vmatpush3.bf16.msra.mxu1 %v11219_v57  ;;  %10316 = vmatprep.mubr.msk.f32.mxu1 %vm11057_vm1, %v11056_v3 }
0x252d   :  { %10314 = vmatprep.subr.mxu1 %v11056_v3 }
0x2530   :  { %10315 = vmatpush3.msra.mxu1 %v11541_v1 }
0x2531   :  { %10329 = vmatprep.subr.mxu1 %v11056_v3 }
0x2588   :  { %v4170_v2 = vpop.f32.mrb[52].mxu1 }
0x2589   :  { %v10284_v4 = vpop.f32.mrb[53].mxu1  ;;  %v4174_v5 = vsel %vm132_vm2, %v4170_v2, -inf }
0x258a   :  { %4175 = vmax.xlane.f32.xlu1 %v4174_v5 }
0x25fa   :  { %v4328_v6 = vpop.f32.mrb[54].mxu1 }
0x25fb   :  { %v10294_v8 = vpop.f32.mrb[55].mxu1  ;;  %v4332_v9 = vsel %vm132_vm2, %v4328_v6, -inf }
0x25fc   :  { %4333 = vmax.xlane.f32.xlu0 %v4332_v9 }
0x25fe   :  { %v4487_v10 = vpop.f32.mrb[56].mxu1 }
0x25ff   :  { %v10304_v11 = vpop.f32.mrb[57].mxu1  ;;  %v4491_v13 = vsel %vm132_vm2, %v4487_v10, -inf }
0x2600   :  { %4492 = vmax.xlane.f32.xlu1 %v4491_v13 }
0x2617   :  { %v4176_v14 = vpop.xlane.xlu1 %4175 }
0x2618   :  { %v4177_v15 = vsub.f32 %v4170_v2, %v4176_v14 }
0x261a   :  { %v4178_v16 = vmul.f32 1.442695, %v4177_v15 }
0x261c   :  { %10928 = vpow2.f32 %v4178_v16 }
0x2626   :  { %v10929_v12 = vpop.eup %10928 }
0x2627   :  { %v4180_v17 = vsel %vm132_vm2, %v10929_v12, 0.0 }
0x2628   :  { %4181 = vadd.xlane.f32.xlu0 %v4180_v17 }
0x2689   :  { %v4334_v18 = vpop.xlane.xlu0 %4333 }
0x268a   :  { %v4335_v19 = vsub.f32 %v4328_v6, %v4334_v18 }
0x268c   :  { %v4336_v20 = vmul.f32 1.442695, %v4335_v19 }
0x268d   :  { %v4493_v21 = vpop.xlane.xlu1 %4492 }
0x268e   :  { %10930 = vpow2.f32 %v4336_v20  ;;  %v4494_v22 = vsub.f32 %v4487_v10, %v4493_v21 }
0x2690   :  { %v4495_v23 = vmul.f32 1.442695, %v4494_v22 }
0x2692   :  { %10932 = vpow2.f32 %v4495_v23 }
0x2698   :  { %v10931_v24 = vpop.eup %10930 }
0x2699   :  { %v4338_v25 = vsel %vm132_vm2, %v10931_v24, 0.0 }
0x269a   :  { %4339 = vadd.xlane.f32.xlu1 %v4338_v25 }
0x269c   :  { %v10933_v26 = vpop.eup %10932 }
0x269d   :  { %v4497_v27 = vsel %vm132_vm2, %v10933_v26, 0.0 }
0x269e   :  { %4498 = vadd.xlane.f32.xlu0 %v4497_v27 }
0x26b5   :  { %v4182_v28 = vpop.xlane.xlu0 %4181 }
0x26b6   :  { %10934 = vrcp.f32 %v4182_v28 }
0x26c0   :  { %v10935_v29 = vpop.eup %10934 }
0x26c1   :  { %v4184_v31 = vmul.f32 %v10935_v29, %v10929_v12 }
0x26c3   :  { %10288 = vmatmul.mubr.msk.f32.vlgmr.msra.gmra.mrb[50].mxu0 %vm132_vm2, %v4184_v31 }
0x26c4   :  { %10296 = vmatpush3.msra.mxu0 %v4259_v35  ;;  %10297 = vmatprep.mubr.msk.f32.mxu0 %vm11057_vm1, %v11056_v3 }
0x26c5   :  { %10305 = vmatprep.subr.mxu0 %v11056_v3 }
0x2727   :  { %v4340_v33 = vpop.xlane.xlu1 %4339 }
0x2728   :  { %10936 = vrcp.f32 %v4340_v33 }
0x272b   :  { %v4499_v34 = vpop.xlane.xlu0 %4498 }
0x272c   :  { %10938 = vrcp.f32 %v4499_v34 }
0x2732   :  { %v10937_v36 = vpop.eup %10936 }
0x2733   :  { %v4342_v37 = vmul.f32 %v10937_v36, %v10931_v24 }
0x2735   :  { %10298 = vmatmul.mubr.msk.f32.vlgmr.msra.gmra.mrb[52].mxu0 %vm132_vm2, %v4342_v37 }
0x2736   :  { %v10939_v7 = vpop.eup %10938  ;;  %10306 = vmatpush3.msra.mxu0 %v4418_v30  ;;  %10307 = vmatprep.mubr.msk.f32.mxu0 %vm11057_vm1, %v11056_v3 }
0x2737   :  { %v4501_v38 = vmul.f32 %v10939_v7, %v10933_v26  ;;  %10319 = vmatprep.subr.mxu0 %v11056_v3 }
0x2739   :  { %10308 = vmatmul.mubr.msk.f32.vlgmr.msra.gmra.mrb[54].mxu0 %vm132_vm2, %v4501_v38 }
0x273a   :  { %10321 = vmatprep.mubr.msk.f32.mxu0 %vm11057_vm1, %v11056_v3 }
0x2796   :  { %v4254_v39 = vpop.f32.mrb[50].mxu0 }
0x2797   :  { %v10289_v40 = vpop.f32.mrb[51].mxu0 }
0x2808   :  { %v4413_v41 = vpop.f32.mrb[52].mxu0 }
0x2809   :  { %4577 = vrot.lane.b32.xlu1 %v4413_v41, %s11061_s20  ;;  %v10299_v42 = vpop.f32.mrb[53].mxu0 }
0x280c   :  { %v4572_v43 = vpop.f32.mrb[54].mxu0 }
0x280d   :  { %4581 = vrot.lane.b32.xlu0 %v4572_v43, %s11062_s21  ;;  %v10309_v44 = vpop.f32.mrb[55].mxu0 }
0x282d   :  { %4829 = vadd.xlane.f32.xlu1 %v4828_v51 }
0x287b   :  { %v4578_v45 = vpop.permute.xlu1 %4577 }
0x287c   :  { %v4584_v46 = vsel %vm132_vm2, %v4254_v39, %v4578_v45 }
0x287f   :  { %v4582_v47 = vpop.permute.xlu0 %4581 }
0x2880   :  { %v4585_v48 = vsel %vm767_vm4, %v4584_v46, %v4582_v47 }
0x2881   :  { %v4586_v49 = vmax.f32 %v4585_v48, 0.0 }
0x2883   :  { %10317 = vmatmul.mubr.msk.f32.vlgmr.msra.gmra.mrb[58].mxu1 %vm770_vm5, %v4586_v49 }
0x2884   :  { %10331 = vmatprep.mubr.msk.f32.mxu1 %vm11057_vm1, %v11056_v3 }
0x28ba   :  { %v4830_v55 = vpop.xlane.xlu1 %4829 }
0x28bb   :  { %v4831_v56 = vadd.f32 1e-12, %v4830_v55 }
0x28bd   :  { %10940 = vrsqrt.f32 %v4831_v56 }
0x28c7   :  { %v10941_v59 = vpop.eup %10940 }
0x28c8   :  { %v4833_v60 = vmul.f32 %v10941_v59, %v9629_v58 }
0x28ca   :  { %10330 = vmatpush3.xpose.msk.msra.mxu1 %vm50_vm0, %v4833_v60 }
0x28cb   :  { %10339 = vmatprep.subr.mxu1 %v11056_v3 }
0x28cd   :  { %10332 = vmatmul.mubr.msk.f32.vlgmr.msra.gmra.mrb[60].mxu1 %vm50_vm0, %v4833_v60 }
0x28ce   :  { %10340 = vmatpush3.msk.msra.mxu1 %vm209_vm3, %v11494_v32  ;;  %10341 = vmatprep.mubr.msk.f32.mxu1 %vm11057_vm1, %v11056_v3 }
0x28cf   :  { %10349 = vmatprep.subr.mxu1 %v11056_v3 }
0x2956   :  { %v4656_v52 = vpop.f32.mrb[58].mxu1 }
0x2957   :  { %v10318_v53 = vpop.f32.mrb[59].mxu1  ;;  %10320 = vmatpush3.xpose.msk.msra.mxu0 %vm767_vm4, %v4656_v52 }
0x2958   :  { %10324 = vmatprep.subr.mxu0 %v11056_v3 }
0x295a   :  { %10322 = vmatmul.mubr.msk.f32.vlgmr.msra.gmra.mrb[56].mxu0 %vm767_vm4, %v4656_v52 }
0x295b   :  { %10325 = vmatpush3.msra.mxu0 %v4656_v52  ;;  %10326 = vmatprep.mubr.msk.f32.mxu0 %vm11057_vm1, %v11056_v3 }
0x295c   :  { %10334 = vmatprep.subr.mxu0 %v11056_v3 }
0x29a0   :  { %v4903_v6 = vpop.f32.mrb[60].mxu1 }
0x29a1   :  { %v10333_v8 = vpop.f32.mrb[61].mxu1  ;;  %v4907_v11 = vmul.f32 %v4903_v6, %v4903_v6 }
0x29a3   :  { %v4908_v14 = vmul.f32 %v4907_v11, %v4907_v11 }
0x2a2d   :  { %v4729_v61 = vpop.f32.mrb[56].mxu0 }
0x2a2e   :  { %v10323_v63 = vpop.f32.mrb[57].mxu0  ;;  %v4733_v0 = vsel %vm132_vm2, %v4729_v61, -inf }
0x2a2f   :  { %4734 = vmax.xlane.f32.xlu0 %v4733_v0 }
0x2abc   :  { %v4735_v35 = vpop.xlane.xlu0 %4734 }
0x2abd   :  { %v4736_v30 = vsub.f32 %v4729_v61, %v4735_v35 }
0x2abf   :  { %v4737_v2 = vmul.f32 1.442695, %v4736_v30 }
0x2ac1   :  { %10942 = vpow2.f32 %v4737_v2 }
0x2acb   :  { %v10943_v4 = vpop.eup %10942 }
0x2acc   :  { %v4739_v5 = vsel %vm132_vm2, %v10943_v4, 0.0 }
0x2acd   :  { %4740 = vadd.xlane.f32.xlu1 %v4739_v5 }
0x2b5a   :  { %v4741_v9 = vpop.xlane.xlu1 %4740 }
0x2b5b   :  { %10944 = vrcp.f32 %v4741_v9 }
0x2b65   :  { %v10945_v10 = vpop.eup %10944 }
0x2b66   :  { %v4743_v13 = vmul.f32 %v10945_v10, %v10943_v4 }
0x2b68   :  { %10327 = vmatmul.mubr.msk.f32.vlgmr.msra.gmra.mrb[58].mxu0 %vm132_vm2, %v4743_v13 }
0x2b69   :  { %10335 = vmatpush3.msra.mxu0 %v9629_v58  ;;  %10336 = vmatprep.mubr.msk.f32.mxu0 %vm11057_vm1, %v11056_v3 }
0x2b6a   :  { %10344 = vmatprep.subr.mxu0 %v11056_v3 }
0x2b6c   :  { %10337 = vmatmul.mubr.msk.f32.vlgmr.msra.gmra.mrb[60].mxu0 %vm132_vm2, %v4908_v14 }
0x2b6d   :  { %10346 = vmatprep.mubr.msk.f32.mxu0 %vm11057_vm1, %v11056_v3 }
0x2c3b   :  { %v4813_v15 = vpop.f32.mrb[58].mxu0 }
0x2c3c   :  { %v4817_v16 = vmax.f32 %v4813_v15, 0.0  ;;  %v10328_v12 = vpop.f32.mrb[59].mxu0 }
0x2c3d   :  { %v9648_v12 = vld [vmem:[%s12149_s0 + $0x30] sm:$0xff] }
0x2c3e   :  { %v4818_v17 = vsel %vm767_vm4, %v4817_v16, -inf }
0x2c3f   :  { %v4819_v18 = vrot.slane %v4818_v17, 4  ;;  %v4978_v19 = vpop.f32.mrb[60].mxu0 }
0x2c40   :  { %v10338_v20 = vpop.f32.mrb[61].mxu0  ;;  %10342 = vmatmul.mubr.msk.f32.vlgmr.msra.gmra.mrb[62].mxu1 %vm50_vm0, %v4978_v19 }
0x2c41   :  { %v4820_v21 = vmax.f32 %v4818_v17, %v4819_v18  ;;  %10351 = vmatprep.mubr.msk.f32.mxu1 %vm11057_vm1, %v11056_v3  ;;  %v5781_v17 = vmul.f32 %v9648_v12, %v9648_v12 }
0x2c43   :  { %v4821_v22 = vrot.slane %v4820_v21, 2  ;;  %v5782_v18 = vsel %vm50_vm0, %v5781_v17, 0.0 }
0x2c45   :  { %v4822_v23 = vmax.f32 %v4820_v21, %v4821_v22 }
0x2c47   :  { %v4823_v24 = vrot.slane %v4822_v23, 1 }
0x2c49   :  { %v4824_v25 = vmax.f32 %v4822_v23, %v4823_v24 }
0x2c4b   :  { %v11602_v26 = vsel %vm209_vm3, %v11516_v62, %v4824_v25 }
0x2d13   :  { %v5051_v27 = vpop.f32.mrb[62].mxu1 }
0x2d14   :  { %5371 = vrot.lane.b32.xlu1 %v5051_v27, %s11058_s29  ;;  %5212 = vrot.lane.b32.xlu0 %v5051_v27, %s11059_s30  ;;  %v10343_v28 = vpop.f32.mrb[63].mxu1 }
0x2d15   :  { %10345 = vmatpush3.xpose.msk.msra.mxu0 %vm132_vm2, %v5051_v27  ;;  %10350 = vmatpush3.msra.mxu1 %v5051_v27 }
0x2d16   :  { %10354 = vmatprep.subr.mxu0 %v11056_v3  ;;  %10359 = vmatprep.subr.mxu1 %v11056_v3 }
0x2d18   :  { %10347 = vmatmul.mubr.msk.f32.vlgmr.msra.gmra.mrb[62].mxu0 %vm132_vm2, %v5051_v27 }
0x2d19   :  { %10356 = vmatprep.mubr.msk.f32.mxu0 %vm11057_vm1, %v11056_v3 }
0x2d86   :  { %v5213_v62 = vpop.permute.xlu0 %5212  ;;  %v5372_v29 = vpop.permute.xlu1 %5371 }
0x2d87   :  { %10355 = vmatpush3.xpose.msk.msra.mxu0 %vm132_vm2, %v5213_v62 }
0x2d88   :  { %10364 = vmatprep.subr.mxu0 %v11056_v3 }
0x2d8a   :  { %10357 = vmatmul.mubr.msk.f32.vlgmr.msra.gmra.mrb[64].mxu0 %vm132_vm2, %v5213_v62 }
0x2d8b   :  { %10365 = vmatpush3.xpose.msk.msra.mxu0 %vm132_vm2, %v5372_v29  ;;  %10366 = vmatprep.mubr.msk.f32.mxu0 %vm11057_vm1, %v11056_v3 }
0x2d8c   :  { %10724 = vmatprep.subr.bf16.mxu0 %v11060_v54 }
0x2d8e   :  { %10367 = vmatmul.mubr.msk.f32.vlgmr.msra.gmra.mrb[66].mxu0 %vm132_vm2, %v5372_v29 }
0x2d8f   :  { %10726 = vmatpush3.bf16.msra.mxu0 %v11219_v57  ;;  %10380 = vmatprep.mubr.msk.f32.mxu0 %vm11057_vm1, %v11056_v3 }
0x2d90   :  { %10378 = vmatprep.subr.mxu0 %v11056_v3 }
0x2d93   :  { %10379 = vmatpush3.msra.mxu0 %v11541_v1 }
0x2d94   :  { %10393 = vmatprep.subr.mxu0 %v11056_v3 }
0x2deb   :  { %v5124_v31 = vpop.f32.mrb[62].mxu0 }
0x2dec   :  { %v10348_v33 = vpop.f32.mrb[63].mxu0  ;;  %v5128_v34 = vsel %vm132_vm2, %v5124_v31, -inf }
0x2ded   :  { %5129 = vmax.xlane.f32.xlu1 %v5128_v34 }
0x2e5d   :  { %v5282_v36 = vpop.f32.mrb[64].mxu0 }
0x2e5e   :  { %v10358_v37 = vpop.f32.mrb[65].mxu0  ;;  %v5286_v7 = vsel %vm132_vm2, %v5282_v36, -inf }
0x2e5f   :  { %5287 = vmax.xlane.f32.xlu0 %v5286_v7 }
0x2e61   :  { %v5441_v38 = vpop.f32.mrb[66].mxu0 }
0x2e62   :  { %v10368_v39 = vpop.f32.mrb[67].mxu0  ;;  %v5445_v40 = vsel %vm132_vm2, %v5441_v38, -inf }
0x2e63   :  { %5446 = vmax.xlane.f32.xlu0 %v5445_v40 }
0x2e7a   :  { %v5130_v41 = vpop.xlane.xlu1 %5129 }
0x2e7b   :  { %v5131_v42 = vsub.f32 %v5124_v31, %v5130_v41 }
0x2e7d   :  { %v5132_v43 = vmul.f32 1.442695, %v5131_v42 }
0x2e7f   :  { %10946 = vpow2.f32 %v5132_v43 }
0x2e89   :  { %v10947_v44 = vpop.eup %10946 }
0x2e8a   :  { %v5134_v45 = vsel %vm132_vm2, %v10947_v44, 0.0 }
0x2e8b   :  { %5135 = vadd.xlane.f32.xlu1 %v5134_v45 }
0x2eec   :  { %v5288_v46 = vpop.xlane.xlu0 %5287 }
0x2eed   :  { %v5289_v47 = vsub.f32 %v5282_v36, %v5288_v46 }
0x2eef   :  { %v5290_v48 = vmul.f32 1.442695, %v5289_v47 }
0x2ef0   :  { %v5447_v49 = vpop.xlane.xlu0 %5446 }
0x2ef1   :  { %10948 = vpow2.f32 %v5290_v48  ;;  %v5448_v58 = vsub.f32 %v5441_v38, %v5447_v49 }
0x2ef3   :  { %v5449_v50 = vmul.f32 1.442695, %v5448_v58 }
0x2ef5   :  { %10950 = vpow2.f32 %v5449_v50 }
0x2efb   :  { %v10949_v51 = vpop.eup %10948 }
0x2efc   :  { %v5292_v52 = vsel %vm132_vm2, %v10949_v51, 0.0 }
0x2efd   :  { %5293 = vadd.xlane.f32.xlu0 %v5292_v52 }
0x2eff   :  { %v10951_v53 = vpop.eup %10950 }
0x2f00   :  { %v5451_v55 = vsel %vm132_vm2, %v10951_v53, 0.0 }
0x2f01   :  { %5452 = vadd.xlane.f32.xlu1 %v5451_v55 }
0x2f18   :  { %v5136_v56 = vpop.xlane.xlu1 %5135 }
0x2f19   :  { %10952 = vrcp.f32 %v5136_v56 }
0x2f23   :  { %v10953_v59 = vpop.eup %10952 }
0x2f24   :  { %v5138_v60 = vmul.f32 %v10953_v59, %v10947_v44 }
0x2f26   :  { %10352 = vmatmul.mubr.msk.f32.vlgmr.msra.gmra.mrb[64].mxu1 %vm132_vm2, %v5138_v60 }
0x2f27   :  { %10360 = vmatpush3.msra.mxu1 %v5213_v62  ;;  %10361 = vmatprep.mubr.msk.f32.mxu1 %vm11057_vm1, %v11056_v3 }
0x2f28   :  { %10369 = vmatprep.subr.mxu1 %v11056_v3 }
0x2f8a   :  { %v5294_v61 = vpop.xlane.xlu0 %5293 }
0x2f8b   :  { %10954 = vrcp.f32 %v5294_v61 }
0x2f8e   :  { %v5453_v63 = vpop.xlane.xlu1 %5452 }
0x2f8f   :  { %10956 = vrcp.f32 %v5453_v63 }
0x2f95   :  { %v10955_v0 = vpop.eup %10954 }
0x2f96   :  { %v5296_v35 = vmul.f32 %v10955_v0, %v10949_v51 }
0x2f98   :  { %10362 = vmatmul.mubr.msk.f32.vlgmr.msra.gmra.mrb[66].mxu1 %vm132_vm2, %v5296_v35 }
0x2f99   :  { %v10957_v30 = vpop.eup %10956  ;;  %10370 = vmatpush3.msra.mxu1 %v5372_v29  ;;  %10371 = vmatprep.mubr.msk.f32.mxu1 %vm11057_vm1, %v11056_v3 }
0x2f9a   :  { %v5455_v2 = vmul.f32 %v10957_v30, %v10951_v53  ;;  %10383 = vmatprep.subr.mxu1 %v11056_v3 }
0x2f9c   :  { %10372 = vmatmul.mubr.msk.f32.vlgmr.msra.gmra.mrb[68].mxu1 %vm132_vm2, %v5455_v2 }
0x2f9d   :  { %10385 = vmatprep.mubr.msk.f32.mxu1 %vm11057_vm1, %v11056_v3 }
0x2ff9   :  { %v5208_v4 = vpop.f32.mrb[64].mxu1 }
0x2ffa   :  { %v10353_v5 = vpop.f32.mrb[65].mxu1 }
0x306b   :  { %v5367_v6 = vpop.f32.mrb[66].mxu1 }
0x306c   :  { %5531 = vrot.lane.b32.xlu0 %v5367_v6, %s11061_s20  ;;  %v10363_v8 = vpop.f32.mrb[67].mxu1 }
0x306f   :  { %v5526_v9 = vpop.f32.mrb[68].mxu1 }
0x3070   :  { %5535 = vrot.lane.b32.xlu1 %v5526_v9, %s11062_s21  ;;  %v10373_v10 = vpop.f32.mrb[69].mxu1 }
0x3094   :  { %5783 = vadd.xlane.f32.xlu1 %v5782_v18 }
0x30de   :  { %v5532_v11 = vpop.permute.xlu0 %5531 }
0x30df   :  { %v5538_v13 = vsel %vm132_vm2, %v5208_v4, %v5532_v11 }
0x30e2   :  { %v5536_v14 = vpop.permute.xlu1 %5535 }
0x30e3   :  { %v5539_v15 = vsel %vm767_vm4, %v5538_v13, %v5536_v14 }
0x30e4   :  { %v5540_v16 = vmax.f32 %v5539_v15, 0.0 }
0x30e6   :  { %10381 = vmatmul.mubr.msk.f32.vlgmr.msra.gmra.mrb[68].mxu0 %vm770_vm5, %v5540_v16 }
0x30e7   :  { %10395 = vmatprep.mubr.msk.f32.mxu0 %vm11057_vm1, %v11056_v3 }
0x3121   :  { %v5784_v21 = vpop.xlane.xlu1 %5783 }
0x3122   :  { %v5785_v22 = vadd.f32 1e-12, %v5784_v21 }
0x3124   :  { %10958 = vrsqrt.f32 %v5785_v22 }
0x312e   :  { %v10959_v23 = vpop.eup %10958 }
0x312f   :  { %v5787_v24 = vmul.f32 %v10959_v23, %v9648_v12 }
0x3131   :  { %10394 = vmatpush3.xpose.msk.msra.mxu0 %vm50_vm0, %v5787_v24 }
0x3132   :  { %10403 = vmatprep.subr.mxu0 %v11056_v3 }
0x3134   :  { %10396 = vmatmul.mubr.msk.f32.vlgmr.msra.gmra.mrb[70].mxu0 %vm50_vm0, %v5787_v24 }
0x3135   :  { %10404 = vmatpush3.msk.msra.mxu0 %vm209_vm3, %v11494_v32  ;;  %10405 = vmatprep.mubr.msk.f32.mxu0 %vm11057_vm1, %v11056_v3 }
0x3136   :  { %10413 = vmatprep.subr.mxu0 %v11056_v3 }
0x31b9   :  { %v5610_v19 = vpop.f32.mrb[68].mxu0 }
0x31ba   :  { %v10382_v20 = vpop.f32.mrb[69].mxu0  ;;  %10384 = vmatpush3.xpose.msk.msra.mxu1 %vm767_vm4, %v5610_v19 }
0x31bb   :  { %10388 = vmatprep.subr.mxu1 %v11056_v3 }
0x31bd   :  { %10386 = vmatmul.mubr.msk.f32.vlgmr.msra.gmra.mrb[70].mxu1 %vm767_vm4, %v5610_v19 }
0x31be   :  { %10389 = vmatpush3.msra.mxu1 %v5610_v19  ;;  %10390 = vmatprep.mubr.msk.f32.mxu1 %vm11057_vm1, %v11056_v3 }
0x31bf   :  { %10398 = vmatprep.subr.mxu1 %v11056_v3 }
0x3207   :  { %v5857_v36 = vpop.f32.mrb[70].mxu0 }
0x3208   :  { %v10397_v37 = vpop.f32.mrb[71].mxu0  ;;  %v5861_v40 = vmul.f32 %v5857_v36, %v5857_v36 }
0x320a   :  { %v5862_v41 = vmul.f32 %v5861_v40, %v5861_v40 }
0x3290   :  { %v5683_v25 = vpop.f32.mrb[70].mxu1 }
0x3291   :  { %v10387_v27 = vpop.f32.mrb[71].mxu1  ;;  %v5687_v28 = vsel %vm132_vm2, %v5683_v25, -inf }
0x3292   :  { %5688 = vmax.xlane.f32.xlu0 %v5687_v28 }
0x331f   :  { %v5689_v62 = vpop.xlane.xlu0 %5688 }
0x3320   :  { %v5690_v29 = vsub.f32 %v5683_v25, %v5689_v62 }
0x3322   :  { %v5691_v31 = vmul.f32 1.442695, %v5690_v29 }
0x3324   :  { %10960 = vpow2.f32 %v5691_v31 }
0x332e   :  { %v10961_v33 = vpop.eup %10960 }
0x332f   :  { %v5693_v34 = vsel %vm132_vm2, %v10961_v33, 0.0 }
0x3330   :  { %5694 = vadd.xlane.f32.xlu0 %v5693_v34 }
0x33bd   :  { %v5695_v7 = vpop.xlane.xlu0 %5694 }
0x33be   :  { %10962 = vrcp.f32 %v5695_v7 }
0x33c8   :  { %v10963_v38 = vpop.eup %10962 }
0x33c9   :  { %v5697_v39 = vmul.f32 %v10963_v38, %v10961_v33 }
0x33cb   :  { %10391 = vmatmul.mubr.msk.f32.vlgmr.msra.gmra.mrb[72].mxu1 %vm132_vm2, %v5697_v39 }
0x33cc   :  { %10399 = vmatpush3.msra.mxu1 %v9648_v12  ;;  %10400 = vmatprep.mubr.msk.f32.mxu1 %vm11057_vm1, %v11056_v3 }
0x33cd   :  { %10408 = vmatprep.subr.mxu1 %v11056_v3 }
0x33cf   :  { %10401 = vmatmul.mubr.msk.f32.vlgmr.msra.gmra.mrb[74].mxu1 %vm132_vm2, %v5862_v41 }
0x33d0   :  { %10410 = vmatprep.mubr.msk.f32.mxu1 %vm11057_vm1, %v11056_v3 }
0x349e   :  { %v5767_v42 = vpop.f32.mrb[72].mxu1 }
0x349f   :  { %v5771_v43 = vmax.f32 %v5767_v42, 0.0  ;;  %v10392_v44 = vpop.f32.mrb[73].mxu1 }
0x34a0   :  { %v9667_v44 = vld [vmem:[%s12149_s0 + $0x38] sm:$0xff] }
0x34a1   :  { %v5772_v45 = vsel %vm767_vm4, %v5771_v43, -inf }
0x34a2   :  { %v5773_v46 = vrot.slane %v5772_v45, 4  ;;  %v5932_v47 = vpop.f32.mrb[74].mxu1 }
0x34a3   :  { %v10402_v48 = vpop.f32.mrb[75].mxu1  ;;  %10406 = vmatmul.mubr.msk.f32.vlgmr.msra.gmra.mrb[72].mxu0 %vm50_vm0, %v5932_v47 }
0x34a4   :  { %v5774_v49 = vmax.f32 %v5772_v45, %v5773_v46  ;;  %10415 = vmatprep.mubr.msk.f32.mxu0 %vm11057_vm1, %v11056_v3  ;;  %v6735_v45 = vmul.f32 %v9667_v44, %v9667_v44 }
0x34a6   :  { %v5775_v58 = vrot.slane %v5774_v49, 2  ;;  %v6736_v46 = vsel %vm50_vm0, %v6735_v45, 0.0 }
0x34a8   :  { %v5776_v50 = vmax.f32 %v5774_v49, %v5775_v58 }
0x34aa   :  { %v5777_v51 = vrot.slane %v5776_v50, 1 }
0x34ac   :  { %v5778_v52 = vmax.f32 %v5776_v50, %v5777_v51 }
0x34ae   :  { %v11683_v53 = vsel %vm7694_vm9, %v11602_v26, %v5778_v52 }
0x3576   :  { %v6005_v55 = vpop.f32.mrb[72].mxu0 }
0x3577   :  { %6325 = vrot.lane.b32.xlu0 %v6005_v55, %s11058_s29  ;;  %6166 = vrot.lane.b32.xlu1 %v6005_v55, %s11059_s30  ;;  %v10407_v56 = vpop.f32.mrb[73].mxu0 }
0x3578   :  { %10409 = vmatpush3.xpose.msk.msra.mxu1 %vm132_vm2, %v6005_v55  ;;  %10414 = vmatpush3.msra.mxu0 %v6005_v55 }
0x3579   :  { %10418 = vmatprep.subr.mxu1 %v11056_v3  ;;  %10423 = vmatprep.subr.mxu0 %v11056_v3 }
0x357b   :  { %10411 = vmatmul.mubr.msk.f32.vlgmr.msra.gmra.mrb[76].mxu1 %vm132_vm2, %v6005_v55 }
0x357c   :  { %10420 = vmatprep.mubr.msk.f32.mxu1 %vm11057_vm1, %v11056_v3 }
0x35e9   :  { %v6167_v26 = vpop.permute.xlu1 %6166  ;;  %v6326_v59 = vpop.permute.xlu0 %6325 }
0x35ea   :  { %10419 = vmatpush3.xpose.msk.msra.mxu1 %vm132_vm2, %v6167_v26 }
0x35eb   :  { %10428 = vmatprep.subr.mxu1 %v11056_v3 }
0x35ed   :  { %10421 = vmatmul.mubr.msk.f32.vlgmr.msra.gmra.mrb[78].mxu1 %vm132_vm2, %v6167_v26 }
0x35ee   :  { %10429 = vmatpush3.xpose.msk.msra.mxu1 %vm132_vm2, %v6326_v59  ;;  %10430 = vmatprep.mubr.msk.f32.mxu1 %vm11057_vm1, %v11056_v3 }
0x35ef   :  { %10727 = vmatprep.subr.bf16.mxu1 %v11060_v54 }
0x35f1   :  { %10431 = vmatmul.mubr.msk.f32.vlgmr.msra.gmra.mrb[80].mxu1 %vm132_vm2, %v6326_v59 }
0x35f2   :  { %10729 = vmatpush3.bf16.msra.mxu1 %v11219_v57  ;;  %10444 = vmatprep.mubr.msk.f32.mxu1 %vm11057_vm1, %v11056_v3 }
0x35f3   :  { %10442 = vmatprep.subr.mxu1 %v11056_v3 }
0x35f6   :  { %10443 = vmatpush3.msra.mxu1 %v11541_v1 }
0x35f7   :  { %10457 = vmatprep.subr.mxu1 %v11056_v3 }
0x364e   :  { %v6078_v60 = vpop.f32.mrb[76].mxu1 }
0x364f   :  { %v10412_v61 = vpop.f32.mrb[77].mxu1  ;;  %v6082_v63 = vsel %vm132_vm2, %v6078_v60, -inf }
0x3650   :  { %6083 = vmax.xlane.f32.xlu1 %v6082_v63 }
0x36c0   :  { %v6236_v0 = vpop.f32.mrb[78].mxu1 }
0x36c1   :  { %v10422_v35 = vpop.f32.mrb[79].mxu1  ;;  %v6240_v30 = vsel %vm132_vm2, %v6236_v0, -inf }
0x36c2   :  { %6241 = vmax.xlane.f32.xlu0 %v6240_v30 }
0x36c4   :  { %v6395_v2 = vpop.f32.mrb[80].mxu1 }
0x36c5   :  { %v10432_v4 = vpop.f32.mrb[81].mxu1  ;;  %v6399_v5 = vsel %vm132_vm2, %v6395_v2, -inf }
0x36c6   :  { %6400 = vmax.xlane.f32.xlu1 %v6399_v5 }
0x36dd   :  { %v6084_v6 = vpop.xlane.xlu1 %6083 }
0x36de   :  { %v6085_v8 = vsub.f32 %v6078_v60, %v6084_v6 }
0x36e0   :  { %v6086_v9 = vmul.f32 1.442695, %v6085_v8 }
0x36e2   :  { %10964 = vpow2.f32 %v6086_v9 }
0x36ec   :  { %v10965_v10 = vpop.eup %10964 }
0x36ed   :  { %v6088_v11 = vsel %vm132_vm2, %v10965_v10, 0.0 }
0x36ee   :  { %6089 = vadd.xlane.f32.xlu0 %v6088_v11 }
0x374f   :  { %v6242_v13 = vpop.xlane.xlu0 %6241 }
0x3750   :  { %v6243_v14 = vsub.f32 %v6236_v0, %v6242_v13 }
0x3752   :  { %v6244_v15 = vmul.f32 1.442695, %v6243_v14 }
0x3753   :  { %v6401_v16 = vpop.xlane.xlu1 %6400 }
0x3754   :  { %10966 = vpow2.f32 %v6244_v15  ;;  %v6402_v12 = vsub.f32 %v6395_v2, %v6401_v16 }
0x3756   :  { %v6403_v17 = vmul.f32 1.442695, %v6402_v12 }
0x3758   :  { %10968 = vpow2.f32 %v6403_v17 }
0x375e   :  { %v10967_v18 = vpop.eup %10966 }
0x375f   :  { %v6246_v19 = vsel %vm132_vm2, %v10967_v18, 0.0 }
0x3760   :  { %6247 = vadd.xlane.f32.xlu1 %v6246_v19 }
0x3762   :  { %v10969_v20 = vpop.eup %10968 }
0x3763   :  { %v6405_v21 = vsel %vm132_vm2, %v10969_v20, 0.0 }
0x3764   :  { %6406 = vadd.xlane.f32.xlu0 %v6405_v21 }
0x377b   :  { %v6090_v22 = vpop.xlane.xlu0 %6089 }
0x377c   :  { %10970 = vrcp.f32 %v6090_v22 }
0x3786   :  { %v10971_v23 = vpop.eup %10970 }
0x3787   :  { %v6092_v24 = vmul.f32 %v10971_v23, %v10965_v10 }
0x3789   :  { %10416 = vmatmul.mubr.msk.f32.vlgmr.msra.gmra.mrb[74].mxu0 %vm132_vm2, %v6092_v24 }
0x378a   :  { %10424 = vmatpush3.msra.mxu0 %v6167_v26  ;;  %10425 = vmatprep.mubr.msk.f32.mxu0 %vm11057_vm1, %v11056_v3 }
0x378b   :  { %10433 = vmatprep.subr.mxu0 %v11056_v3 }
0x37ed   :  { %v6248_v25 = vpop.xlane.xlu1 %6247 }
0x37ee   :  { %10972 = vrcp.f32 %v6248_v25 }
0x37f1   :  { %v6407_v27 = vpop.xlane.xlu0 %6406 }
0x37f2   :  { %10974 = vrcp.f32 %v6407_v27 }
0x37f8   :  { %v10973_v28 = vpop.eup %10972 }
0x37f9   :  { %v6250_v62 = vmul.f32 %v10973_v28, %v10967_v18 }
0x37fb   :  { %10426 = vmatmul.mubr.msk.f32.vlgmr.msra.gmra.mrb[76].mxu0 %vm132_vm2, %v6250_v62 }
0x37fc   :  { %v10975_v29 = vpop.eup %10974  ;;  %10434 = vmatpush3.msra.mxu0 %v6326_v59  ;;  %10435 = vmatprep.mubr.msk.f32.mxu0 %vm11057_vm1, %v11056_v3 }
0x37fd   :  { %v6409_v31 = vmul.f32 %v10975_v29, %v10969_v20  ;;  %10447 = vmatprep.subr.mxu0 %v11056_v3 }
0x37ff   :  { %10436 = vmatmul.mubr.msk.f32.vlgmr.msra.gmra.mrb[78].mxu0 %vm132_vm2, %v6409_v31 }
0x3800   :  { %10449 = vmatprep.mubr.msk.f32.mxu0 %vm11057_vm1, %v11056_v3 }
0x385c   :  { %v6162_v33 = vpop.f32.mrb[74].mxu0 }
0x385d   :  { %v10417_v34 = vpop.f32.mrb[75].mxu0 }
0x38ce   :  { %v6321_v36 = vpop.f32.mrb[76].mxu0 }
0x38cf   :  { %6485 = vrot.lane.b32.xlu1 %v6321_v36, %s11061_s20  ;;  %v10427_v37 = vpop.f32.mrb[77].mxu0 }
0x38d2   :  { %v6480_v7 = vpop.f32.mrb[78].mxu0 }
0x38d3   :  { %6489 = vrot.lane.b32.xlu0 %v6480_v7, %s11062_s21  ;;  %v10437_v38 = vpop.f32.mrb[79].mxu0 }
0x38f3   :  { %6737 = vadd.xlane.f32.xlu1 %v6736_v46 }
0x3941   :  { %v6486_v39 = vpop.permute.xlu1 %6485 }
0x3942   :  { %v6492_v40 = vsel %vm132_vm2, %v6162_v33, %v6486_v39 }
0x3945   :  { %v6490_v41 = vpop.permute.xlu0 %6489 }
0x3946   :  { %v6493_v42 = vsel %vm767_vm4, %v6492_v40, %v6490_v41 }
0x3947   :  { %v6494_v43 = vmax.f32 %v6493_v42, 0.0 }
0x3949   :  { %10445 = vmatmul.mubr.msk.f32.vlgmr.msra.gmra.mrb[82].mxu1 %vm770_vm5, %v6494_v43 }
0x394a   :  { %10459 = vmatprep.mubr.msk.f32.mxu1 %vm11057_vm1, %v11056_v3 }
0x3980   :  { %v6738_v49 = vpop.xlane.xlu1 %6737 }
0x3981   :  { %v6739_v58 = vadd.f32 1e-12, %v6738_v49 }
0x3983   :  { %10976 = vrsqrt.f32 %v6739_v58 }
0x398d   :  { %v10977_v50 = vpop.eup %10976 }
0x398e   :  { %v6741_v51 = vmul.f32 %v10977_v50, %v9667_v44 }
0x3990   :  { %10458 = vmatpush3.xpose.msk.msra.mxu1 %vm50_vm0, %v6741_v51 }
0x3991   :  { %10467 = vmatprep.subr.mxu1 %v11056_v3 }
0x3993   :  { %10460 = vmatmul.mubr.msk.f32.vlgmr.msra.gmra.mrb[84].mxu1 %vm50_vm0, %v6741_v51 }
0x3994   :  { %10468 = vmatpush3.msk.msra.mxu1 %vm209_vm3, %v11494_v32  ;;  %10469 = vmatprep.mubr.msk.f32.mxu1 %vm11057_vm1, %v11056_v3 }
0x3995   :  { %10477 = vmatprep.subr.mxu1 %v11056_v3 }
0x3a1c   :  { %v6564_v47 = vpop.f32.mrb[82].mxu1 }
0x3a1d   :  { %v10446_v48 = vpop.f32.mrb[83].mxu1  ;;  %10448 = vmatpush3.xpose.msk.msra.mxu0 %vm767_vm4, %v6564_v47 }
0x3a1e   :  { %10452 = vmatprep.subr.mxu0 %v11056_v3 }
0x3a20   :  { %10450 = vmatmul.mubr.msk.f32.vlgmr.msra.gmra.mrb[80].mxu0 %vm767_vm4, %v6564_v47 }
0x3a21   :  { %10453 = vmatpush3.msra.mxu0 %v6564_v47  ;;  %10454 = vmatprep.mubr.msk.f32.mxu0 %vm11057_vm1, %v11056_v3 }
0x3a22   :  { %10462 = vmatprep.subr.mxu0 %v11056_v3 }
0x3a66   :  { %v6811_v0 = vpop.f32.mrb[84].mxu1 }
0x3a67   :  { %v10461_v32 = vpop.f32.mrb[85].mxu1  ;;  %v6815_v4 = vmul.f32 %v6811_v0, %v6811_v0 }
0x3a69   :  { %v6816_v5 = vmul.f32 %v6815_v4, %v6815_v4 }
0x3af3   :  { %v6637_v52 = vpop.f32.mrb[80].mxu0 }
0x3af4   :  { %v10451_v55 = vpop.f32.mrb[81].mxu0  ;;  %v6641_v56 = vsel %vm132_vm2, %v6637_v52, -inf }
0x3af5   :  { %6642 = vmax.xlane.f32.xlu0 %v6641_v56 }
0x3b82   :  { %v6643_v26 = vpop.xlane.xlu0 %6642 }
0x3b83   :  { %v6644_v59 = vsub.f32 %v6637_v52, %v6643_v26 }
0x3b85   :  { %v6645_v60 = vmul.f32 1.442695, %v6644_v59 }
0x3b87   :  { %10978 = vpow2.f32 %v6645_v60 }
0x3b91   :  { %v10979_v61 = vpop.eup %10978 }
0x3b92   :  { %v6647_v63 = vsel %vm132_vm2, %v10979_v61, 0.0 }
0x3b93   :  { %6648 = vadd.xlane.f32.xlu1 %v6647_v63 }
0x3c20   :  { %v6649_v35 = vpop.xlane.xlu1 %6648 }
0x3c21   :  { %10980 = vrcp.f32 %v6649_v35 }
0x3c2b   :  { %v10981_v30 = vpop.eup %10980 }
0x3c2c   :  { %v6651_v2 = vmul.f32 %v10981_v30, %v10979_v61 }
0x3c2e   :  { %10455 = vmatmul.mubr.msk.f32.vlgmr.msra.gmra.mrb[82].mxu0 %vm132_vm2, %v6651_v2 }
0x3c2f   :  { %10463 = vmatpush3.msra.mxu0 %v9667_v44  ;;  %10464 = vmatprep.mubr.msk.f32.mxu0 %vm11057_vm1, %v11056_v3 }
0x3c30   :  { %10472 = vmatprep.subr.mxu0 %v11056_v3 }
0x3c32   :  { %10465 = vmatmul.mubr.msk.f32.vlgmr.msra.gmra.mrb[84].mxu0 %vm132_vm2, %v6816_v5 }
0x3c33   :  { %10474 = vmatprep.mubr.msk.f32.mxu0 %vm11057_vm1, %v11056_v3 }
0x3d01   :  { %v6721_v6 = vpop.f32.mrb[82].mxu0 }
0x3d02   :  { %v6725_v8 = vmax.f32 %v6721_v6, 0.0  ;;  %v10456_v9 = vpop.f32.mrb[83].mxu0 }
0x3d04   :  { %v6726_v10 = vsel %vm767_vm4, %v6725_v8, -inf }
0x3d05   :  { %v6727_v11 = vrot.slane %v6726_v10, 4  ;;  %v6886_v13 = vpop.f32.mrb[84].mxu0 }
0x3d06   :  { %v10466_v14 = vpop.f32.mrb[85].mxu0  ;;  %10470 = vmatmul.mubr.msk.f32.vlgmr.msra.gmra.mrb[86].mxu1 %vm50_vm0, %v6886_v13 }
0x3d07   :  { %v6728_v15 = vmax.f32 %v6726_v10, %v6727_v11  ;;  %10479 = vmatprep.mubr.msk.f32.mxu1 %vm11057_vm1, %v11056_v3 }
0x3d09   :  { %v6729_v16 = vrot.slane %v6728_v15, 2 }
0x3d0b   :  { %v6730_v12 = vmax.f32 %v6728_v15, %v6729_v16 }
0x3d0d   :  { %v6731_v17 = vrot.slane %v6730_v12, 1 }
0x3d0f   :  { %v6732_v18 = vmax.f32 %v6730_v12, %v6731_v17 }
0x3d11   :  { %v11764_v19 = vsel %vm7696_vm10, %v11683_v53, %v6732_v18 }
0x3dd9   :  { %v6959_v20 = vpop.f32.mrb[86].mxu1 }
0x3dda   :  { %7279 = vrot.lane.b32.xlu1 %v6959_v20, %s11058_s29  ;;  %7120 = vrot.lane.b32.xlu0 %v6959_v20, %s11059_s30  ;;  %v10471_v21 = vpop.f32.mrb[87].mxu1 }
0x3ddb   :  { %10473 = vmatpush3.xpose.msk.msra.mxu0 %vm132_vm2, %v6959_v20  ;;  %10478 = vmatpush3.msra.mxu1 %v6959_v20  ;;  %v7701_v21 = vld [vmem:[%s12152_s5 + $0x8] sm:$0xff] }
0x3ddc   :  { %10482 = vmatprep.subr.mxu0 %v11056_v3  ;;  %10487 = vmatprep.subr.mxu1 %v11056_v3 }
0x3dde   :  { %10475 = vmatmul.mubr.msk.f32.vlgmr.msra.gmra.mrb[86].mxu0 %vm132_vm2, %v6959_v20  ;;  %v7700_v20 = vld [vmem:[%s12152_s5] sm:$0xff] }
0x3ddf   :  { %10484 = vmatprep.mubr.msk.f32.mxu0 %vm11057_vm1, %v11056_v3 }
0x3e4c   :  { %v7121_v53 = vpop.permute.xlu0 %7120  ;;  %v7280_v22 = vpop.permute.xlu1 %7279 }
0x3e4d   :  { %10483 = vmatpush3.xpose.msk.msra.mxu0 %vm132_vm2, %v7121_v53 }
0x3e4e   :  { %10492 = vmatprep.subr.mxu0 %v11056_v3 }
0x3e50   :  { %10485 = vmatmul.mubr.msk.f32.vlgmr.msra.gmra.mrb[88].mxu0 %vm132_vm2, %v7121_v53 }
0x3e51   :  { %10493 = vmatpush3.xpose.msk.msra.mxu0 %vm132_vm2, %v7280_v22  ;;  %10494 = vmatprep.mubr.msk.f32.mxu0 %vm11057_vm1, %v11056_v3 }
0x3e52   :  { %10730 = vmatprep.subr.bf16.mxu0 %v11060_v54 }
0x3e54   :  { %10495 = vmatmul.mubr.msk.f32.vlgmr.msra.gmra.mrb[90].mxu0 %vm132_vm2, %v7280_v22 }
0x3e55   :  { %10732 = vmatpush3.bf16.msra.mxu0 %v11219_v57  ;;  %10508 = vmatprep.mubr.msk.f32.mxu0 %vm11057_vm1, %v11056_v3 }
0x3e56   :  { %10506 = vmatprep.subr.mxu0 %v11056_v3 }
0x3e59   :  { %10507 = vmatpush3.msra.mxu0 %v11541_v1 }
0x3e5a   :  { %10733 = vmatprep.subr.bf16.mxu0 %v11060_v54 }
0x3eb1   :  { %v7032_v23 = vpop.f32.mrb[86].mxu0 }
0x3eb2   :  { %v10476_v24 = vpop.f32.mrb[87].mxu0  ;;  %v7036_v25 = vsel %vm132_vm2, %v7032_v23, -inf }
0x3eb3   :  { %7037 = vmax.xlane.f32.xlu1 %v7036_v25 }
0x3f23   :  { %v7190_v27 = vpop.f32.mrb[88].mxu0 }
0x3f24   :  { %v10486_v28 = vpop.f32.mrb[89].mxu0  ;;  %v7194_v62 = vsel %vm132_vm2, %v7190_v27, -inf }
0x3f25   :  { %7195 = vmax.xlane.f32.xlu0 %v7194_v62 }
0x3f27   :  { %v7349_v57 = vpop.f32.mrb[90].mxu0 }
0x3f28   :  { %v10496_v29 = vpop.f32.mrb[91].mxu0  ;;  %v7353_v31 = vsel %vm132_vm2, %v7349_v57, -inf }
0x3f29   :  { %7354 = vmax.xlane.f32.xlu0 %v7353_v31  ;;  %v7874_v31 = vld [vmem:[%s12154_s9] sm:$0xff] }
0x3f40   :  { %v7038_v33 = vpop.xlane.xlu1 %7037 }
0x3f41   :  { %v7039_v34 = vsub.f32 %v7032_v23, %v7038_v33  ;;  %v7875_v33 = vld [vmem:[%s12154_s9 + $0x8] sm:$0xff] }
0x3f43   :  { %v7040_v1 = vmul.f32 1.442695, %v7039_v34 }
0x3f45   :  { %10982 = vpow2.f32 %v7040_v1 }
0x3f4f   :  { %v10983_v36 = vpop.eup %10982 }
0x3f50   :  { %v7042_v37 = vsel %vm132_vm2, %v10983_v36, 0.0 }
0x3f51   :  { %7043 = vadd.xlane.f32.xlu1 %v7042_v37  ;;  %v7876_v37 = vld [vmem:[%s12154_s9 + $0x10] sm:$0xff] }
0x3fb2   :  { %v7196_v7 = vpop.xlane.xlu0 %7195 }
0x3fb3   :  { %v7197_v38 = vsub.f32 %v7190_v27, %v7196_v7  ;;  %v7877_v7 = vld [vmem:[%s12154_s9 + $0x18] sm:$0xff]  ;;  %s11072_s9 = smov 3  }
0x3fb5   :  { %v7198_v39 = vmul.f32 1.442695, %v7197_v38 }
0x3fb6   :  { %v7355_v40 = vpop.xlane.xlu0 %7354 }
0x3fb7   :  { %10984 = vpow2.f32 %v7198_v39  ;;  %v7356_v41 = vsub.f32 %v7349_v57, %v7355_v40  ;;  %v11852_v39 = vpack.c.bf16 %v7877_v7, %v7876_v37 }
0x3fb9   :  { %v7357_v42 = vmul.f32 1.442695, %v7356_v41 }
0x3fbb   :  { %10986 = vpow2.f32 %v7357_v42 }
0x3fc1   :  { %v10985_v43 = vpop.eup %10984 }
0x3fc2   :  { %v7200_v44 = vsel %vm132_vm2, %v10985_v43, 0.0 }
0x3fc3   :  { %7201 = vadd.xlane.f32.xlu0 %v7200_v44  ;;  %v11869_v44 = vld [vmem:[%s12155_s10] sm:$0x1] }
0x3fc5   :  { %v10987_v45 = vpop.eup %10986 }
0x3fc6   :  { %v7359_v46 = vsel %vm132_vm2, %v10987_v45, 0.0 }
0x3fc7   :  { %7360 = vadd.xlane.f32.xlu1 %v7359_v46 }
0x3fde   :  { %v7044_v47 = vpop.xlane.xlu1 %7043 }
0x3fdf   :  { %10988 = vrcp.f32 %v7044_v47 }
0x3fe9   :  { %v10989_v48 = vpop.eup %10988 }
0x3fea   :  { %v7046_v49 = vmul.f32 %v10989_v48, %v10983_v36  ;;  %v11840_v36 = vpack.c.bf16 %v7875_v33, %v7874_v31 }
0x3fec   :  { %10480 = vmatmul.mubr.msk.f32.vlgmr.msra.gmra.mrb[88].mxu1 %vm132_vm2, %v7046_v49 }
0x3fed   :  { %10488 = vmatpush3.msra.mxu1 %v7121_v53  ;;  %10489 = vmatprep.mubr.msk.f32.mxu1 %vm11057_vm1, %v11056_v3  ;;  %v10734_v53 = vpack.c.bf16 %v7701_v21, %v7700_v20 }
0x3fee   :  { %10497 = vmatprep.subr.mxu1 %v11056_v3 }
0x4050   :  { %v7202_v58 = vpop.xlane.xlu0 %7201 }
0x4051   :  { %10990 = vrcp.f32 %v7202_v58  ;;  %v9686_v58 = vld [vmem:[%s12156_s6] ss:$0 sm:$0xff] }
0x4054   :  { %v7361_v50 = vpop.xlane.xlu1 %7360 }
0x4055   :  { %10992 = vrcp.f32 %v7361_v50 }
0x405b   :  { %v10991_v51 = vpop.eup %10990 }
0x405c   :  { %v7204_v52 = vmul.f32 %v10991_v51, %v10985_v43 }
0x405e   :  { %10490 = vmatmul.mubr.msk.f32.vlgmr.msra.gmra.mrb[90].mxu1 %vm132_vm2, %v7204_v52 }
0x405f   :  { %v10993_v55 = vpop.eup %10992  ;;  %10498 = vmatpush3.msra.mxu1 %v7280_v22  ;;  %10499 = vmatprep.mubr.msk.f32.mxu1 %vm11057_vm1, %v11056_v3  ;;  %v7871_v22 = vld [vmem:[%s12153_s2] sm:$0x1]  ;;  %s11069_s2 = smov 4  }
0x4060   :  { %v7363_v56 = vmul.f32 %v10993_v55, %v10987_v45  ;;  %10511 = vmatprep.subr.mxu1 %v11056_v3  ;;  %7873 = vst.msk [vmem:[#allocation2] sm:$0x1] %vm7872_vm11, %v7871_v22 }
0x4062   :  { %10500 = vmatmul.mubr.msk.f32.vlgmr.msra.gmra.mrb[92].mxu1 %vm132_vm2, %v7363_v56 }
0x4063   :  { %10513 = vmatprep.mubr.msk.f32.mxu1 %vm11057_vm1, %v11056_v3 }
0x4067   :  { %v7883_v40 = vld [vmem:[#allocation2] sm:$0x1] }
0x40bf   :  { %v7116_v26 = vpop.f32.mrb[88].mxu1 }
0x40c0   :  { %v10481_v59 = vpop.f32.mrb[89].mxu1 }
0x4131   :  { %v7275_v60 = vpop.f32.mrb[90].mxu1 }
0x4132   :  { %7439 = vrot.lane.b32.xlu0 %v7275_v60, %s11061_s20  ;;  %v10491_v61 = vpop.f32.mrb[91].mxu1 }
0x4135   :  { %v7434_v63 = vpop.f32.mrb[92].mxu1 }
0x4136   :  { %7443 = vrot.lane.b32.xlu1 %v7434_v63, %s11062_s21  ;;  %v10501_v0 = vpop.f32.mrb[93].mxu1 }
0x4137   :  { %v7782_v0 = vld [vmem:[%s12157_s7] sm:$0x3] }
0x41a4   :  { %v7440_v32 = vpop.permute.xlu0 %7439 }
0x41a5   :  { %v7446_v35 = vsel %vm132_vm2, %v7116_v26, %v7440_v32  ;;  %v11887_v32 = vld [vmem:[%s12158_s1] sm:$0xff]  ;;  %s11065_s1 = smov 96  }
0x41a8   :  { %v7444_v30 = vpop.permute.xlu1 %7443 }
0x41a9   :  { %v7447_v2 = vsel %vm767_vm4, %v7446_v35, %v7444_v30  ;;  %v7879_v35 = vld [vmem:[%s12159_s11] sm:$0xff]  ;;  %v7880_v30 = vld [vmem:[%s12159_s11 + $0x8] sm:$0xff] }
0x41aa   :  { %v7448_v4 = vmax.f32 %v7447_v2, 0.0  ;;  %v7881_v2 = vld [vmem:[%s12159_s11 + $0x10] sm:$0xff] }
0x41ac   :  { %10509 = vmatmul.mubr.msk.f32.vlgmr.msra.gmra.mrb[92].mxu0 %vm770_vm5, %v7448_v4  ;;  %v7882_v4 = vld [vmem:[%s12159_s11 + $0x18] sm:$0xff]  ;;  %vm9521_vm5 = vcmask 48128  }
0x41ad   :  { %10525 = vmatprep.mubr.msk.f32.mxu0 %vm11057_vm1, %v11056_v3  ;;  %10735 = vmatpush3.bf16.msra.mxu0 %v10734_v53 }
0x41ae   :  { %10736 = vmatprep.subr.bf16.mxu0 %v11060_v54 }
0x427f   :  { %v7518_v5 = vpop.f32.mrb[92].mxu0 }
0x4280   :  { %v10510_v6 = vpop.f32.mrb[93].mxu0  ;;  %10512 = vmatpush3.xpose.msk.msra.mxu1 %vm767_vm4, %v7518_v5 }
0x4281   :  { %10516 = vmatprep.subr.mxu1 %v11056_v3  ;;  %v11910_v6 = vpack.c.bf16 %v7882_v4, %v7881_v2 }
0x4283   :  { %10514 = vmatmul.mubr.msk.f32.vlgmr.msra.gmra.mrb[94].mxu1 %vm767_vm4, %v7518_v5 }
0x4284   :  { %10517 = vmatpush3.msra.mxu1 %v7518_v5  ;;  %10518 = vmatprep.mubr.msk.f32.mxu1 %vm11057_vm1, %v11056_v3  ;;  %v11905_v5 = vpack.c.bf16 %v7880_v30, %v7879_v35 }
0x4285   :  { %10528 = vmatprep.subr.mxu1 %v11056_v3 }
0x4356   :  { %v7591_v8 = vpop.f32.mrb[94].mxu1 }
0x4357   :  { %v10515_v9 = vpop.f32.mrb[95].mxu1  ;;  %v7595_v10 = vsel %vm132_vm2, %v7591_v8, -inf }
0x4358   :  { %7596 = vmax.xlane.f32.xlu1 %v7595_v10 }
0x43e5   :  { %v7597_v11 = vpop.xlane.xlu1 %7596 }
0x43e6   :  { %v7598_v13 = vsub.f32 %v7591_v8, %v7597_v11 }
0x43e8   :  { %v7599_v14 = vmul.f32 1.442695, %v7598_v13 }
0x43ea   :  { %10994 = vpow2.f32 %v7599_v14 }
0x43f4   :  { %v10995_v15 = vpop.eup %10994 }
0x43f5   :  { %v7601_v16 = vsel %vm132_vm2, %v10995_v15, 0.0 }
0x43f6   :  { %7602 = vadd.xlane.f32.xlu0 %v7601_v16 }
0x4483   :  { %v7603_v12 = vpop.xlane.xlu0 %7602 }
0x4484   :  { %10996 = vrcp.f32 %v7603_v12 }
0x448e   :  { %v10997_v17 = vpop.eup %10996 }
0x448f   :  { %v7605_v18 = vmul.f32 %v10997_v17, %v10995_v15 }
0x4491   :  { %10519 = vmatmul.mubr.msk.f32.vlgmr.msra.gmra.mrb[96].mxu1 %vm132_vm2, %v7605_v18  ;;  %v9688_v18 = vld [vmem:[%s12160_s8] ss:$0 sm:$0xff]  ;;  %s11066_s8 = smov 127  }
0x4492   :  { %10530 = vmatprep.mubr.msk.f32.mxu1 %vm11057_vm1, %v11056_v3  ;;  %10529 = vmatpush3.msk.msra.mxu1 %vm7689_vm7, %v7782_v0 }
0x4493   :  { %10742 = vmatprep.subr.bf16.mxu1 %v11060_v54 }
0x4495   :  { %10531 = vmatmul.mubr.msk.f32.vlgmr.msra.gmra.mrb[98].mxu1 %vm7790_vm14, %v11887_v32 }
0x4496   :  { %10552 = vmatprep.mubr.msk.f32.mxu1 %vm11057_vm1, %v11056_v3  ;;  %10744 = vmatpush3.bf16.msra.mxu1 %v11905_v5 }
0x4497   :  { %10745 = vmatprep.subr.bf16.mxu1 %v11060_v54 }
0x449a   :  { %10747 = vmatpush3.bf16.msra.mxu1 %v11910_v6 }
0x449b   :  { %10754 = vmatprep.subr.bf16.mxu1 %v11060_v54 }
0x4564   :  { %v7675_v23 = vpop.f32.mrb[96].mxu1 }
0x4565   :  { %v7679_v24 = vmax.f32 %v7675_v23, 0.0  ;;  %v10520_v25 = vpop.f32.mrb[97].mxu1 }
0x4567   :  { %v7680_v27 = vsel %vm767_vm4, %v7679_v24, -inf }
0x4568   :  { %v7681_v28 = vrot.slane %v7680_v27, 4  ;;  %v7863_v16 = vpop.f32.mrb[98].mxu1 }
0x4569   :  { %v10532_v12 = vpop.f32.mrb[99].mxu1  ;;  %v11934_v20 = vadd.f32 %v9688_v18, %v7863_v16 }
0x456a   :  { %v7682_v62 = vmax.f32 %v7680_v27, %v7681_v28 }
0x456b   :  { %v8349_v18 = vrot.slane %v11934_v20, 2 }
0x456c   :  { %v7683_v57 = vrot.slane %v7682_v62, 2 }
0x456e   :  { %v7684_v29 = vmax.f32 %v7682_v62, %v7683_v57 }
0x4570   :  { %v7685_v34 = vrot.slane %v7684_v29, 1 }
0x4572   :  { %v7686_v1 = vmax.f32 %v7684_v29, %v7685_v34 }
0x4574   :  { %v7699_v38 = vsel %vm7698_vm12, %v11764_v19, %v7686_v1  ;;  %v7982_v19 = vlaneseq }
0x4575   :  { %10526 = vmatmul.mubr.msk.f32.vlgmr.msra.gmra.mrb[94].mxu0 %vm767_vm4, %v7699_v38  ;;  %vm9519_vm4 = vcmask 39936  }
0x4576   :  { %10738 = vmatpush3.bf16.msra.mxu0 %v11840_v36  ;;  %10541 = vmatprep.mubr.msk.f32.mxu0 %vm11057_vm1, %v11056_v3  ;;  %v7983_v43 = vshrl.u32 %v7982_v19, 7 }
0x4577   :  { %10739 = vmatprep.subr.bf16.mxu0 %v11060_v54 }
0x4578   :  { %v7984_v45 = vsub.s32 0, %v7983_v43 }
0x457a   :  { %10741 = vmatpush3.bf16.msra.mxu0 %v11852_v39  ;;  %v7985_v49 = vrot.slane %v7883_v40, %v7984_v45 }
0x457b   :  { %10748 = vmatprep.subr.bf16.mxu0 %v11060_v54 }
0x457d   :  { %10542 = vmatmul.mubr.msk.f32.vlgmr.msra.gmra.mrb[96].mxu0 %vm7884_vm13, %v7883_v40 }
0x457e   :  { %10750 = vmatpush3.bf16.msra.mxu0 %v11840_v36  ;;  %10563 = vmatprep.mubr.msk.f32.mxu0 %vm11057_vm1, %v11056_v3 }
0x457f   :  { %10751 = vmatprep.subr.bf16.mxu0 %v11060_v54 }
0x4582   :  { %10753 = vmatpush3.bf16.msra.mxu0 %v11852_v39 }
0x4583   :  { %10760 = vmatprep.subr.bf16.mxu0 %v11060_v54 }
0x4648   :  { %v7778_v41 = vpop.f32.mrb[94].mxu0 }
0x4649   :  { %v10527_v42 = vpop.f32.mrb[95].mxu0  ;;  %v11876_v50 = vadd.f32 %v9686_v58, %v7778_v41 }
0x4650   :  { %v7954_v46 = vpop.f32.mrb[96].mxu0 }
0x4651   :  { %v7955_v47 = vadd.f32 %v7954_v46, %v11869_v44  ;;  %v10543_v48 = vpop.f32.mrb[97].mxu0 }
0x4653   :  { %7966 = vrot.lane.b32.xlu0 %v7955_v47, %s11063_s4  ;;  %v7958_v51 = vadd.f32 %v7955_v47, %v11876_v50  ;;  %v8171_v47 = vrot.slane %v11934_v20, 1 }
0x4655   :  { %v9692_v52 = vmul.f32 -1.442695, %v7958_v51 }
0x4657   :  { %7986 = vrot.lane.b32.xlu0 %v7985_v49, %s11064_s18  ;;  %10998 = vpow2.f32 %v9692_v52  ;;  %s11075_s18 = smov 123  }
0x4661   :  { %v10999_v55 = vpop.eup %10998 }
0x4662   :  { %v7962_v56 = vadd.f32 1.0, %v10999_v55 }
0x4664   :  { %11000 = vrcp.f32 %v7962_v56 }
0x466e   :  { %v11001_v26 = vpop.eup %11000 }
0x466f   :  { %v7976_v10 = vsub.f32 1.0, %v11001_v26 }
0x46c5   :  { %v7967_v59 = vpop.permute.xlu0 %7966 }
0x46c6   :  { %v7969_v60 = vmul.f32 %v11001_v26, %v7967_v59 }
0x46c8   :  { %7971 = vrot.lane.b32.xlu1 %v7969_v60, %s11063_s4 }
0x46c9   :  { %v7987_v9 = vpop.permute.xlu0 %7986 }
0x46ca   :  { %v7989_v13 = vmul.f32 %v11001_v26, %v7987_v9 }
0x473a   :  { %v7972_v61 = vpop.permute.xlu1 %7971 }
0x473b   :  { %v7974_v63 = vadd.f32 %v7972_v61, %v11876_v50 }
0x473d   :  { %11002 = vtanh.f32 %v7974_v63 }
0x4747   :  { %v11003_v8 = vpop.eup %11002 }
0x4748   :  { %7978 = vrot.lane.b32.xlu1 %v11003_v8, %s11065_s1 }
0x47ba   :  { %v7979_v11 = vpop.permute.xlu1 %7978 }
0x47bb   :  { %v7981_v14 = vmul.f32 %v7979_v11, %v7976_v10 }
0x47bd   :  { %v7990_v15 = vadd.f32 %v7989_v13, %v7981_v14 }
0x47bf   :  { %7992 = vrot.lane.b32.xlu1 %v7990_v15, %s11065_s1  ;;  %v8162_v38 = vrot.slane %v7990_v15, 7 }
0x4831   :  { %v7993_v17 = vpop.permute.xlu1 %7992 }
0x4832   :  { %10553 = vmatmul.mubr.msk.f32.vlgmr.msra.gmra.mrb[100].mxu1 %vm7884_vm13, %v7993_v17  ;;  %10564 = vmatmul.mubr.msk.f32.vlgmr.msra.gmra.mrb[98].mxu0 %vm7884_vm13, %v7993_v17 }
0x4833   :  { %10756 = vmatpush3.bf16.msra.mxu1 %v11905_v5  ;;  %10762 = vmatpush3.bf16.msra.mxu0 %v11840_v36 }
0x4834   :  { %10757 = vmatprep.subr.bf16.mxu1 %v11060_v54  ;;  %10763 = vmatprep.subr.bf16.mxu0 %v11060_v54 }
0x4835   :  { %10574 = vmatprep.mubr.msk.f32.mxu1 %vm11057_vm1, %v11056_v3  ;;  %10585 = vmatprep.mubr.msk.f32.mxu0 %vm11057_vm1, %v11056_v3 }
0x4837   :  { %10759 = vmatpush3.bf16.msra.mxu1 %v11910_v6  ;;  %10765 = vmatpush3.bf16.msra.mxu0 %v11852_v39 }
0x4838   :  { %10766 = vmatprep.subr.bf16.mxu1 %v11060_v54  ;;  %10772 = vmatprep.subr.bf16.mxu0 %v11060_v54 }
0x4905   :  { %v8062_v21 = vpop.f32.mrb[100].mxu1  ;;  %v8132_v53 = vpop.f32.mrb[98].mxu0 }
0x4906   :  { %v8063_v22 = vadd.f32 %v8062_v21, %v11934_v20  ;;  %v8133_v23 = vadd.f32 %v8132_v53, %v11869_v44  ;;  %v10554_v24 = vpop.f32.mrb[101].mxu1  ;;  %v10565_v25 = vpop.f32.mrb[99].mxu0 }
0x4908   :  { %v8137_v27 = vrot.slane %v8133_v23, 7 }
0x490a   :  { %8146 = vrot.lane.b32.xlu0 %v8137_v27, %s11063_s4  ;;  %v8139_v28 = vadd.f32 %v8137_v27, %v11876_v50 }
0x490c   :  { %v9695_v62 = vmul.f32 -1.442695, %v8139_v28 }
0x490e   :  { %11004 = vpow2.f32 %v9695_v62 }
0x4918   :  { %v11005_v57 = vpop.eup %11004 }
0x4919   :  { %v8143_v29 = vadd.f32 1.0, %v11005_v57 }
0x491b   :  { %11006 = vrcp.f32 %v8143_v29 }
0x4925   :  { %v11007_v31 = vpop.eup %11006 }
0x4926   :  { %v8156_v40 = vsub.f32 1.0, %v11007_v31  ;;  %v8164_v41 = vmul.f32 %v11007_v31, %v8162_v38 }
0x497c   :  { %v8147_v33 = vpop.permute.xlu0 %8146 }
0x497d   :  { %v8149_v34 = vmul.f32 %v11007_v31, %v8147_v33 }
0x497f   :  { %8151 = vrot.lane.b32.xlu1 %v8149_v34, %s11063_s4 }
0x49f1   :  { %v8152_v1 = vpop.permute.xlu1 %8151 }
0x49f2   :  { %v8154_v37 = vadd.f32 %v8152_v1, %v11876_v50 }
0x49f4   :  { %11008 = vtanh.f32 %v8154_v37 }
0x49fe   :  { %v11009_v7 = vpop.eup %11008 }
0x49ff   :  { %8158 = vrot.lane.b32.xlu0 %v11009_v7, %s11065_s1 }
0x4a71   :  { %v8159_v19 = vpop.permute.xlu0 %8158 }
0x4a72   :  { %v8161_v42 = vmul.f32 %v8159_v19, %v8156_v40 }
0x4a74   :  { %v8165_v43 = vadd.f32 %v8164_v41, %v8161_v42 }
0x4a76   :  { %v8167_v45 = vrot.slane %v8165_v43, 1  ;;  %v8341_v10 = vrot.slane %v8165_v43, 7 }
0x4a78   :  { %8168 = vrot.lane.b32.xlu1 %v8167_v45, %s11065_s1 }
0x4aea   :  { %v8169_v46 = vpop.permute.xlu1 %8168 }
0x4aeb   :  { %10575 = vmatmul.mubr.msk.f32.vlgmr.msra.gmra.mrb[102].mxu1 %vm7884_vm13, %v8169_v46  ;;  %10586 = vmatmul.mubr.msk.f32.vlgmr.msra.gmra.mrb[100].mxu0 %vm7884_vm13, %v8169_v46 }
0x4aec   :  { %10768 = vmatpush3.bf16.msra.mxu1 %v11905_v5  ;;  %10774 = vmatpush3.bf16.msra.mxu0 %v11840_v36 }
0x4aed   :  { %10769 = vmatprep.subr.bf16.mxu1 %v11060_v54  ;;  %10775 = vmatprep.subr.bf16.mxu0 %v11060_v54 }
0x4aee   :  { %10596 = vmatprep.mubr.msk.f32.mxu1 %vm11057_vm1, %v11056_v3  ;;  %10607 = vmatprep.mubr.msk.f32.mxu0 %vm11057_vm1, %v11056_v3 }
0x4af0   :  { %10771 = vmatpush3.bf16.msra.mxu1 %v11910_v6  ;;  %10777 = vmatpush3.bf16.msra.mxu0 %v11852_v39 }
0x4af1   :  { %10778 = vmatprep.subr.bf16.mxu1 %v11060_v54  ;;  %10784 = vmatprep.subr.bf16.mxu0 %v11060_v54 }
0x4bbe   :  { %v8241_v48 = vpop.f32.mrb[102].mxu1  ;;  %v8311_v49 = vpop.f32.mrb[100].mxu0 }
0x4bbf   :  { %v8242_v58 = vadd.f32 %v8241_v48, %v8171_v47  ;;  %v8312_v51 = vadd.f32 %v8311_v49, %v11869_v44  ;;  %v10576_v52 = vpop.f32.mrb[103].mxu1  ;;  %v10587_v55 = vpop.f32.mrb[101].mxu0  ;;  %v8527_v49 = vrot.slane %v11934_v20, 3 }
0x4bc1   :  { %v9319_v56 = vrot.slane %v8242_v58, 7  ;;  %v8316_v26 = vrot.slane %v8312_v51, 6 }
0x4bc3   :  { %v9339_v59 = vsel %vm7687_vm6, %v8063_v22, %v9319_v56  ;;  %8325 = vrot.lane.b32.xlu0 %v8316_v26, %s11063_s4  ;;  %v8318_v60 = vadd.f32 %v8316_v26, %v11876_v50  ;;  %vm9523_vm6 = vcmask 56320  }
0x4bc5   :  { %v9698_v61 = vmul.f32 -1.442695, %v8318_v60 }
0x4bc7   :  { %11010 = vpow2.f32 %v9698_v61 }
0x4bd1   :  { %v11011_v63 = vpop.eup %11010 }
0x4bd2   :  { %v8322_v0 = vadd.f32 1.0, %v11011_v63 }
0x4bd4   :  { %11012 = vrcp.f32 %v8322_v0 }
0x4bde   :  { %v11013_v35 = vpop.eup %11012 }
0x4bdf   :  { %v8335_v11 = vsub.f32 1.0, %v11013_v35  ;;  %v8343_v14 = vmul.f32 %v11013_v35, %v8341_v10 }
0x4c35   :  { %v8326_v30 = vpop.permute.xlu0 %8325 }
0x4c36   :  { %v8328_v2 = vmul.f32 %v11013_v35, %v8326_v30 }
0x4c38   :  { %8330 = vrot.lane.b32.xlu1 %v8328_v2, %s11063_s4 }
0x4caa   :  { %v8331_v4 = vpop.permute.xlu1 %8330 }
0x4cab   :  { %v8333_v8 = vadd.f32 %v8331_v4, %v11876_v50 }
0x4cad   :  { %11014 = vtanh.f32 %v8333_v8 }
0x4cb7   :  { %v11015_v9 = vpop.eup %11014 }
0x4cb8   :  { %8337 = vrot.lane.b32.xlu0 %v11015_v9, %s11065_s1 }
0x4d2a   :  { %v8338_v13 = vpop.permute.xlu0 %8337 }
0x4d2b   :  { %v8340_v15 = vmul.f32 %v8338_v13, %v8335_v11 }
0x4d2d   :  { %v8344_v16 = vadd.f32 %v8343_v14, %v8340_v15 }
0x4d2f   :  { %v8346_v12 = vrot.slane %v8344_v16, 2  ;;  %v8519_v19 = vrot.slane %v8344_v16, 7 }
0x4d31   :  { %8347 = vrot.lane.b32.xlu1 %v8346_v12, %s11065_s1 }
0x4da3   :  { %v8348_v17 = vpop.permute.xlu1 %8347 }
0x4da4   :  { %10597 = vmatmul.mubr.msk.f32.vlgmr.msra.gmra.mrb[104].mxu1 %vm7884_vm13, %v8348_v17  ;;  %10608 = vmatmul.mubr.msk.f32.vlgmr.msra.gmra.mrb[102].mxu0 %vm7884_vm13, %v8348_v17 }
0x4da5   :  { %10780 = vmatpush3.bf16.msra.mxu1 %v11905_v5  ;;  %10786 = vmatpush3.bf16.msra.mxu0 %v11840_v36 }
0x4da6   :  { %10781 = vmatprep.subr.bf16.mxu1 %v11060_v54  ;;  %10787 = vmatprep.subr.bf16.mxu0 %v11060_v54 }
0x4da7   :  { %10618 = vmatprep.mubr.msk.f32.mxu1 %vm11057_vm1, %v11056_v3  ;;  %10629 = vmatprep.mubr.msk.f32.mxu0 %vm11057_vm1, %v11056_v3 }
0x4da9   :  { %10783 = vmatpush3.bf16.msra.mxu1 %v11910_v6  ;;  %10789 = vmatpush3.bf16.msra.mxu0 %v11852_v39 }
0x4daa   :  { %10790 = vmatprep.subr.bf16.mxu1 %v11060_v54  ;;  %10796 = vmatprep.subr.bf16.mxu0 %v11060_v54 }
0x4e77   :  { %v8419_v21 = vpop.f32.mrb[104].mxu1  ;;  %v8489_v53 = vpop.f32.mrb[102].mxu0 }
0x4e78   :  { %v8420_v22 = vadd.f32 %v8419_v21, %v8349_v18  ;;  %v8490_v23 = vadd.f32 %v8489_v53, %v11869_v44  ;;  %v10598_v24 = vpop.f32.mrb[105].mxu1  ;;  %v10609_v25 = vpop.f32.mrb[103].mxu0  ;;  %v8705_v53 = vrot.slane %v11934_v20, 4 }
0x4e7a   :  { %v9322_v27 = vrot.slane %v8420_v22, 6  ;;  %v8494_v28 = vrot.slane %v8490_v23, 5 }
0x4e7c   :  { %v9340_v62 = vsel %vm7689_vm7, %v9339_v59, %v9322_v27  ;;  %8503 = vrot.lane.b32.xlu0 %v8494_v28, %s11063_s4  ;;  %v8496_v57 = vadd.f32 %v8494_v28, %v11876_v50 }
0x4e7e   :  { %v9701_v29 = vmul.f32 -1.442695, %v8496_v57 }
0x4e80   :  { %11016 = vpow2.f32 %v9701_v29 }
0x4e8a   :  { %v11017_v31 = vpop.eup %11016 }
0x4e8b   :  { %v8500_v33 = vadd.f32 1.0, %v11017_v31 }
0x4e8d   :  { %11018 = vrcp.f32 %v8500_v33 }
0x4e97   :  { %v11019_v34 = vpop.eup %11018 }
0x4e98   :  { %v8513_v41 = vsub.f32 1.0, %v11019_v34  ;;  %v8521_v43 = vmul.f32 %v11019_v34, %v8519_v19 }
0x4eee   :  { %v8504_v1 = vpop.permute.xlu0 %8503 }
0x4eef   :  { %v8506_v37 = vmul.f32 %v11019_v34, %v8504_v1 }
0x4ef1   :  { %8508 = vrot.lane.b32.xlu1 %v8506_v37, %s11063_s4 }
0x4f63   :  { %v8509_v7 = vpop.permute.xlu1 %8508 }
0x4f64   :  { %v8511_v38 = vadd.f32 %v8509_v7, %v11876_v50 }
0x4f66   :  { %11020 = vtanh.f32 %v8511_v38 }
0x4f70   :  { %v11021_v40 = vpop.eup %11020 }
0x4f71   :  { %8515 = vrot.lane.b32.xlu0 %v11021_v40, %s11065_s1 }
0x4fe3   :  { %v8516_v42 = vpop.permute.xlu0 %8515 }
0x4fe4   :  { %v8518_v45 = vmul.f32 %v8516_v42, %v8513_v41 }
0x4fe6   :  { %v8522_v46 = vadd.f32 %v8521_v43, %v8518_v45 }
0x4fe8   :  { %v8524_v47 = vrot.slane %v8522_v46, 3  ;;  %v8697_v13 = vrot.slane %v8522_v46, 7 }
0x4fea   :  { %8525 = vrot.lane.b32.xlu1 %v8524_v47, %s11065_s1 }
0x505c   :  { %v8526_v48 = vpop.permute.xlu1 %8525 }
0x505d   :  { %10619 = vmatmul.mubr.msk.f32.vlgmr.msra.gmra.mrb[106].mxu1 %vm7884_vm13, %v8526_v48  ;;  %10630 = vmatmul.mubr.msk.f32.vlgmr.msra.gmra.mrb[104].mxu0 %vm7884_vm13, %v8526_v48 }
0x505e   :  { %10792 = vmatpush3.bf16.msra.mxu1 %v11905_v5  ;;  %10798 = vmatpush3.bf16.msra.mxu0 %v11840_v36 }
0x505f   :  { %10793 = vmatprep.subr.bf16.mxu1 %v11060_v54  ;;  %10799 = vmatprep.subr.bf16.mxu0 %v11060_v54 }
0x5060   :  { %10640 = vmatprep.mubr.msk.f32.mxu1 %vm11057_vm1, %v11056_v3  ;;  %10651 = vmatprep.mubr.msk.f32.mxu0 %vm11057_vm1, %v11056_v3 }
0x5062   :  { %10795 = vmatpush3.bf16.msra.mxu1 %v11910_v6  ;;  %10801 = vmatpush3.bf16.msra.mxu0 %v11852_v39 }
0x5063   :  { %10802 = vmatprep.subr.bf16.mxu1 %v11060_v54  ;;  %10808 = vmatprep.subr.bf16.mxu0 %v11060_v54 }
0x5130   :  { %v8597_v58 = vpop.f32.mrb[106].mxu1  ;;  %v8667_v51 = vpop.f32.mrb[104].mxu0 }
0x5131   :  { %v8598_v52 = vadd.f32 %v8597_v58, %v8527_v49  ;;  %v8668_v55 = vadd.f32 %v8667_v51, %v11869_v44  ;;  %v10620_v56 = vpop.f32.mrb[107].mxu1  ;;  %v10631_v26 = vpop.f32.mrb[105].mxu0  ;;  %v8883_v51 = vrot.slane %v11934_v20, 5 }
0x5133   :  { %v9325_v59 = vrot.slane %v8598_v52, 5  ;;  %v8672_v60 = vrot.slane %v8668_v55, 4 }
0x5135   :  { %v9341_v61 = vsel %vm7691_vm8, %v9340_v62, %v9325_v59  ;;  %8681 = vrot.lane.b32.xlu0 %v8672_v60, %s11063_s4  ;;  %v8674_v63 = vadd.f32 %v8672_v60, %v11876_v50 }
0x5137   :  { %v9704_v0 = vmul.f32 -1.442695, %v8674_v63 }
0x5139   :  { %11022 = vpow2.f32 %v9704_v0 }
0x5143   :  { %v11023_v35 = vpop.eup %11022 }
0x5144   :  { %v8678_v30 = vadd.f32 1.0, %v11023_v35 }
0x5146   :  { %11024 = vrcp.f32 %v8678_v30 }
0x5150   :  { %v11025_v2 = vpop.eup %11024 }
0x5151   :  { %v8691_v14 = vsub.f32 1.0, %v11025_v2  ;;  %v8699_v16 = vmul.f32 %v11025_v2, %v8697_v13 }
0x51a7   :  { %v8682_v4 = vpop.permute.xlu0 %8681 }
0x51a8   :  { %v8684_v8 = vmul.f32 %v11025_v2, %v8682_v4 }
0x51aa   :  { %8686 = vrot.lane.b32.xlu1 %v8684_v8, %s11063_s4 }
0x521c   :  { %v8687_v9 = vpop.permute.xlu1 %8686 }
0x521d   :  { %v8689_v10 = vadd.f32 %v8687_v9, %v11876_v50 }
0x521f   :  { %11026 = vtanh.f32 %v8689_v10 }
0x5229   :  { %v11027_v11 = vpop.eup %11026 }
0x522a   :  { %8693 = vrot.lane.b32.xlu0 %v11027_v11, %s11065_s1 }
0x529c   :  { %v8694_v15 = vpop.permute.xlu0 %8693 }
0x529d   :  { %v8696_v12 = vmul.f32 %v8694_v15, %v8691_v14 }
0x529f   :  { %v8700_v17 = vadd.f32 %v8699_v16, %v8696_v12 }
0x52a1   :  { %v8702_v18 = vrot.slane %v8700_v17, 4  ;;  %v8875_v42 = vrot.slane %v8700_v17, 7 }
0x52a3   :  { %8703 = vrot.lane.b32.xlu1 %v8702_v18, %s11065_s1 }
0x5315   :  { %v8704_v21 = vpop.permute.xlu1 %8703 }
0x5316   :  { %10641 = vmatmul.mubr.msk.f32.vlgmr.msra.gmra.mrb[108].mxu1 %vm7884_vm13, %v8704_v21  ;;  %10652 = vmatmul.mubr.msk.f32.vlgmr.msra.gmra.mrb[106].mxu0 %vm7884_vm13, %v8704_v21 }
0x5317   :  { %10804 = vmatpush3.bf16.msra.mxu1 %v11905_v5  ;;  %10810 = vmatpush3.bf16.msra.mxu0 %v11840_v36 }
0x5318   :  { %10805 = vmatprep.subr.bf16.mxu1 %v11060_v54  ;;  %10811 = vmatprep.subr.bf16.mxu0 %v11060_v54 }
0x5319   :  { %10662 = vmatprep.mubr.msk.f32.mxu1 %vm11057_vm1, %v11056_v3  ;;  %10673 = vmatprep.mubr.msk.f32.mxu0 %vm11057_vm1, %v11056_v3 }
0x531b   :  { %10807 = vmatpush3.bf16.msra.mxu1 %v11910_v6  ;;  %10813 = vmatpush3.bf16.msra.mxu0 %v11852_v39 }
0x531c   :  { %10814 = vmatprep.subr.bf16.mxu1 %v11060_v54  ;;  %10820 = vmatprep.subr.bf16.mxu0 %v11060_v54 }
0x53e9   :  { %v8775_v22 = vpop.f32.mrb[108].mxu1  ;;  %v8845_v23 = vpop.f32.mrb[106].mxu0 }
0x53ea   :  { %v8776_v24 = vadd.f32 %v8775_v22, %v8705_v53  ;;  %v8846_v25 = vadd.f32 %v8845_v23, %v11869_v44  ;;  %v10642_v27 = vpop.f32.mrb[109].mxu1  ;;  %v10653_v28 = vpop.f32.mrb[107].mxu0  ;;  %v9061_v53 = vrot.slane %v11934_v20, 6 }
0x53ec   :  { %v9328_v62 = vrot.slane %v8776_v24, 4  ;;  %v8850_v57 = vrot.slane %v8846_v25, 3 }
0x53ee   :  { %v9342_v29 = vsel %vm209_vm3, %v9341_v61, %v9328_v62  ;;  %8859 = vrot.lane.b32.xlu0 %v8850_v57, %s11063_s4  ;;  %v8852_v31 = vadd.f32 %v8850_v57, %v11876_v50  ;;  %vm9516_vm3 = vcmask 23552  }
0x53f0   :  { %v9707_v33 = vmul.f32 -1.442695, %v8852_v31 }
0x53f2   :  { %11028 = vpow2.f32 %v9707_v33 }
0x53fc   :  { %v11029_v34 = vpop.eup %11028 }
0x53fd   :  { %v8856_v1 = vadd.f32 1.0, %v11029_v34 }
0x53ff   :  { %11030 = vrcp.f32 %v8856_v1 }
0x5409   :  { %v11031_v37 = vpop.eup %11030 }
0x540a   :  { %v8869_v43 = vsub.f32 1.0, %v11031_v37  ;;  %v8877_v46 = vmul.f32 %v11031_v37, %v8875_v42 }
0x5460   :  { %v8860_v7 = vpop.permute.xlu0 %8859 }
0x5461   :  { %v8862_v38 = vmul.f32 %v11031_v37, %v8860_v7 }
0x5463   :  { %8864 = vrot.lane.b32.xlu1 %v8862_v38, %s11063_s4 }
0x54d5   :  { %v8865_v40 = vpop.permute.xlu1 %8864 }
0x54d6   :  { %v8867_v19 = vadd.f32 %v8865_v40, %v11876_v50 }
0x54d8   :  { %11032 = vtanh.f32 %v8867_v19 }
0x54e2   :  { %v11033_v41 = vpop.eup %11032 }
0x54e3   :  { %8871 = vrot.lane.b32.xlu0 %v11033_v41, %s11065_s1 }
0x5555   :  { %v8872_v45 = vpop.permute.xlu0 %8871 }
0x5556   :  { %v8874_v47 = vmul.f32 %v8872_v45, %v8869_v43 }
0x5558   :  { %v8878_v48 = vadd.f32 %v8877_v46, %v8874_v47 }
0x555a   :  { %v8880_v49 = vrot.slane %v8878_v48, 5  ;;  %v9053_v13 = vrot.slane %v8878_v48, 7  ;;  %v9239_v48 = vrot.slane %v11934_v20, 7 }
0x555c   :  { %8881 = vrot.lane.b32.xlu1 %v8880_v49, %s11065_s1 }
0x55ce   :  { %v8882_v58 = vpop.permute.xlu1 %8881 }
0x55cf   :  { %10663 = vmatmul.mubr.msk.f32.vlgmr.msra.gmra.mrb[110].mxu1 %vm7884_vm13, %v8882_v58  ;;  %10674 = vmatmul.mubr.msk.f32.vlgmr.msra.gmra.mrb[108].mxu0 %vm7884_vm13, %v8882_v58 }
0x55d0   :  { %10816 = vmatpush3.bf16.msra.mxu1 %v11905_v5  ;;  %10822 = vmatpush3.bf16.msra.mxu0 %v11840_v36 }
0x55d1   :  { %10817 = vmatprep.subr.bf16.mxu1 %v11060_v54  ;;  %10823 = vmatprep.subr.bf16.mxu0 %v11060_v54 }
0x55d2   :  { %10684 = vmatprep.mubr.msk.f32.mxu1 %vm11057_vm1, %v11056_v3  ;;  %10695 = vmatprep.mubr.msk.f32.mxu0 %vm11057_vm1, %v11056_v3 }
0x55d4   :  { %10819 = vmatpush3.bf16.msra.mxu1 %v11910_v6  ;;  %10825 = vmatpush3.bf16.msra.mxu0 %v11852_v39 }
0x55d5   :  { %10826 = vmatprep.subr.bf16.mxu1 %v11060_v54 }
0x56a2   :  { %v8953_v52 = vpop.f32.mrb[110].mxu1  ;;  %v9023_v36 = vpop.f32.mrb[108].mxu0 }
0x56a3   :  { %v8954_v55 = vadd.f32 %v8953_v52, %v8883_v51  ;;  %v9024_v56 = vadd.f32 %v9023_v36, %v11869_v44  ;;  %v10664_v26 = vpop.f32.mrb[111].mxu1  ;;  %v10675_v59 = vpop.f32.mrb[109].mxu0 }
0x56a5   :  { %v9331_v60 = vrot.slane %v8954_v55, 3  ;;  %v9028_v61 = vrot.slane %v9024_v56, 2 }
0x56a7   :  { %v9343_v63 = vsel %vm7694_vm9, %v9342_v29, %v9331_v60  ;;  %9037 = vrot.lane.b32.xlu0 %v9028_v61, %s11063_s4  ;;  %v9030_v0 = vadd.f32 %v9028_v61, %v11876_v50 }
0x56a9   :  { %v9710_v39 = vmul.f32 -1.442695, %v9030_v0 }
0x56ab   :  { %11034 = vpow2.f32 %v9710_v39 }
0x56b5   :  { %v11035_v35 = vpop.eup %11034 }
0x56b6   :  { %v9034_v30 = vadd.f32 1.0, %v11035_v35 }
0x56b8   :  { %11036 = vrcp.f32 %v9034_v30 }
0x56c2   :  { %v11037_v2 = vpop.eup %11036 }
0x56c3   :  { %v9047_v14 = vsub.f32 1.0, %v11037_v2  ;;  %v9055_v16 = vmul.f32 %v11037_v2, %v9053_v13 }
0x5719   :  { %v9038_v4 = vpop.permute.xlu0 %9037 }
0x571a   :  { %v9040_v8 = vmul.f32 %v11037_v2, %v9038_v4 }
0x571c   :  { %9042 = vrot.lane.b32.xlu1 %v9040_v8, %s11063_s4 }
0x578e   :  { %v9043_v9 = vpop.permute.xlu1 %9042 }
0x578f   :  { %v9045_v10 = vadd.f32 %v9043_v9, %v11876_v50 }
0x5791   :  { %11038 = vtanh.f32 %v9045_v10 }
0x579b   :  { %v11039_v11 = vpop.eup %11038 }
0x579c   :  { %9049 = vrot.lane.b32.xlu0 %v11039_v11, %s11065_s1 }
0x580e   :  { %v9050_v15 = vpop.permute.xlu0 %9049 }
0x580f   :  { %v9052_v12 = vmul.f32 %v9050_v15, %v9047_v14 }
0x5811   :  { %v9056_v17 = vadd.f32 %v9055_v16, %v9052_v12 }
0x5813   :  { %v9058_v18 = vrot.slane %v9056_v17, 6  ;;  %v9231_v7 = vrot.slane %v9056_v17, 7 }
0x5815   :  { %9059 = vrot.lane.b32.xlu1 %v9058_v18, %s11065_s1 }
0x5887   :  { %v9060_v21 = vpop.permute.xlu1 %9059 }
0x5888   :  { %10685 = vmatmul.mubr.msk.f32.vlgmr.msra.gmra.mrb[112].mxu1 %vm7884_vm13, %v9060_v21  ;;  %10696 = vmatmul.mubr.msk.f32.vlgmr.msra.gmra.mrb[110].mxu0 %vm7884_vm13, %v9060_v21 }
0x5889   :  { %10828 = vmatpush3.bf16.msra.mxu1 %v11905_v5  ;;  %10706 = vmatprep.mubr.msk.f32.mxu1 %vm11057_vm1, %v11056_v3  ;;  %vm9513_vm1 = vcmask 7168  }
0x588a   :  { %10829 = vmatprep.subr.bf16.mxu1 %v11060_v54 }
0x588d   :  { %10831 = vmatpush3.bf16.msra.mxu1 %v11910_v6 }
0x595b   :  { %v9131_v22 = vpop.f32.mrb[112].mxu1  ;;  %v9201_v23 = vpop.f32.mrb[110].mxu0 }
0x595c   :  { %v9132_v24 = vadd.f32 %v9131_v22, %v9061_v53  ;;  %v9202_v25 = vadd.f32 %v9201_v23, %v11869_v44  ;;  %v10686_v27 = vpop.f32.mrb[113].mxu1  ;;  %v10697_v28 = vpop.f32.mrb[111].mxu0 }
0x595e   :  { %v9334_v62 = vrot.slane %v9132_v24, 2  ;;  %v9206_v57 = vrot.slane %v9202_v25, 1 }
0x5960   :  { %v9344_v5 = vsel %vm7696_vm10, %v9343_v63, %v9334_v62  ;;  %9215 = vrot.lane.b32.xlu0 %v9206_v57, %s11063_s4  ;;  %v9208_v3 = vadd.f32 %v9206_v57, %v11876_v50 }
0x5962   :  { %v9713_v54 = vmul.f32 -1.442695, %v9208_v3 }
0x5964   :  { %11040 = vpow2.f32 %v9713_v54 }
0x596e   :  { %v11041_v6 = vpop.eup %11040 }
0x596f   :  { %v9212_v29 = vadd.f32 1.0, %v11041_v6 }
0x5971   :  { %11042 = vrcp.f32 %v9212_v29 }
0x597b   :  { %v11043_v31 = vpop.eup %11042 }
0x597c   :  { %v9225_v38 = vsub.f32 1.0, %v11043_v31  ;;  %v9233_v19 = vmul.f32 %v11043_v31, %v9231_v7 }
0x59d2   :  { %v9216_v33 = vpop.permute.xlu0 %9215 }
0x59d3   :  { %v9218_v34 = vmul.f32 %v11043_v31, %v9216_v33 }
0x59d5   :  { %9220 = vrot.lane.b32.xlu1 %v9218_v34, %s11063_s4  ;;  %s11074_s4 = smov 121  }
0x5a47   :  { %v9221_v44 = vpop.permute.xlu1 %9220 }
0x5a48   :  { %v9223_v1 = vadd.f32 %v9221_v44, %v11876_v50 }
0x5a4a   :  { %11044 = vtanh.f32 %v9223_v1 }
0x5a54   :  { %v11045_v37 = vpop.eup %11044 }
0x5a55   :  { %9227 = vrot.lane.b32.xlu0 %v11045_v37, %s11065_s1 }
0x5a59   :  { %9357 = vrot.lane.b32.xlu0 %v11887_v32, %s11066_s8 }
0x5a5d   :  { %9353 = vrot.lane.b32.xlu0 %v11887_v32, %s11067_s28 }
0x5ac7   :  { %v9228_v40 = vpop.permute.xlu0 %9227 }
0x5ac8   :  { %v9230_v41 = vmul.f32 %v9228_v40, %v9225_v38 }
0x5aca   :  { %v12077_v42 = vadd.f32 %v9233_v19, %v9230_v41 }
0x5acb   :  { %v9358_v43 = vpop.permute.xlu0 %9357 }
0x5acc   :  { %v9236_v50 = vrot.slane %v12077_v42, 7  ;;  %11046 = vrcp.f32 %v9358_v43 }
0x5ace   :  { %9237 = vrot.lane.b32.xlu1 %v9236_v50, %s11065_s1 }
0x5acf   :  { %v9354_v61 = vpop.permute.xlu0 %9353 }
0x5ad2   :  { %9367 = vrot.lane.b32.xlu1 %v11887_v32, %s11068_s14 }
0x5ad6   :  { %v11047_v45 = vpop.eup %11046 }
0x5ad7   :  { %v9361_v47 = vmul.f32 %v11047_v45, %v11887_v32 }
0x5ad9   :  { %9363 = vrot.lane.b32.xlu1 %v9361_v47, %s11069_s2 }
0x5b40   :  { %v9238_v46 = vpop.permute.xlu1 %9237 }
0x5b41   :  { %10707 = vmatmul.mubr.msk.f32.vlgmr.msra.gmra.mrb[114].mxu1 %vm7884_vm13, %v9238_v46 }
0x5b44   :  { %v9368_v60 = vpop.permute.xlu1 %9367 }
0x5b4b   :  { %v9364_v0 = vpop.permute.xlu1 %9363 }
0x5c14   :  { %v9309_v49 = vpop.f32.mrb[114].mxu1 }
0x5c15   :  { %v9310_v58 = vadd.f32 %v9309_v49, %v9239_v48  ;;  %v10708_v51 = vpop.f32.mrb[115].mxu1 }
0x5c17   :  { %v9337_v52 = vrot.slane %v9310_v58, 1 }
0x5c19   :  { %v9345_v36 = vsel %vm7698_vm12, %v9344_v5, %v9337_v52 }
0x5c1a   :  { %9346 = vst [vmem:[%s12161_s12] sm:$0xff] %v9345_v36  ;;  %v9715_v55 = vmul.f32 -1.442695, %v9345_v36  ;;  %s11071_s12 = smov 2  }
0x5c1c   :  { %11048 = vpow2.f32 %v9715_v55 }
0x5c26   :  { %v11049_v56 = vpop.eup %11048 }
0x5c27   :  { %v9350_v26 = vadd.f32 1.0, %v11049_v56 }
0x5c29   :  { %11050 = vrcp.f32 %v9350_v26 }
0x5c2a   :  { %11052 = vrcp.f32 %v11887_v32 }
0x5c33   :  { %v12090_v59 = vpop.eup %11050 }
0x5c34   :  { %v12093_v20 = vmul.f32 %v12090_v59, %v9368_v60  ;;  %v9356_v63 = vmul.f32 %v12090_v59, %v9354_v61  ;;  %v11053_v13 = vpop.eup %11052 }
0x5c36   :  { %9372 = vrot.lane.b32.xlu0 %v12093_v20, %s11066_s8  ;;  %v9366_v39 = vmul.f32 %v9364_v0, %v9356_v63 }
0x5c3a   :  { %9381 = vrot.lane.b32.xlu0 %v12093_v20, %s11070_s3 }
0x5ca8   :  { %v9373_v35 = vpop.permute.xlu0 %9372 }
0x5ca9   :  { %v12100_v30 = vsub.f32 %v9366_v39, %v9373_v35 }
0x5cab   :  { %9377 = vrot.lane.b32.xlu1 %v12100_v30, %s11070_s3 }
0x5cac   :  { %v9382_v2 = vpop.permute.xlu0 %9381 }
0x5cad   :  { %v9384_v4 = vadd.f32 %v9382_v2, %v11887_v32 }
0x5caf   :  { %9391 = vrot.lane.b32.xlu0 %v9384_v4, %s11071_s12 }
0x5d1d   :  { %v9378_v8 = vpop.permute.xlu1 %9377 }
0x5d1e   :  { %v9380_v9 = vadd.f32 %v9378_v8, %v11887_v32 }
0x5d20   :  { %9386 = vrot.lane.b32.xlu1 %v9380_v9, %s11072_s9  ;;  %9395 = vrot.lane.b32.xlu0 %v9380_v9, %s11067_s28 }
0x5d21   :  { %v9392_v14 = vpop.permute.xlu0 %9391 }
0x5d24   :  { %9406 = vrot.lane.b32.xlu1 %v9380_v9, %s11068_s14 }
0x5d92   :  { %v9387_v10 = vpop.permute.xlu1 %9386  ;;  %v9396_v18 = vpop.permute.xlu0 %9395 }
0x5d93   :  { %v9389_v11 = vsub.f32 %v11887_v32, %v9387_v10  ;;  %v9398_v21 = vmul.f32 %v12090_v59, %v9396_v18 }
0x5d95   :  { %v9394_v15 = vsub.f32 %v9389_v11, %v9392_v14 }
0x5d96   :  { %v9407_v16 = vpop.permute.xlu1 %9406 }
0x5d97   :  { %v9400_v12 = vmul.f32 %v11053_v13, %v9394_v15  ;;  %v9409_v17 = vmul.f32 %v12090_v59, %v9407_v16 }
0x5d99   :  { %9411 = vrot.lane.b32.xlu0 %v9409_v17, %s11066_s8  ;;  %9402 = vrot.lane.b32.xlu1 %v9400_v12, %s11072_s9 }
0x5d9d   :  { %9420 = vrot.lane.b32.xlu0 %v9409_v17, %s11070_s3 }
0x5e0b   :  { %v9403_v53 = vpop.permute.xlu1 %9402  ;;  %v9412_v22 = vpop.permute.xlu0 %9411 }
0x5e0c   :  { %v9405_v23 = vmul.f32 %v9403_v53, %v9398_v21 }
0x5e0e   :  { %v9414_v24 = vsub.f32 %v9405_v23, %v9412_v22 }
0x5e0f   :  { %v9421_v25 = vpop.permute.xlu0 %9420 }
0x5e10   :  { %v9423_v27 = vadd.f32 %v9421_v25, %v9384_v4  ;;  %9416 = vrot.lane.b32.xlu1 %v9414_v24, %s11070_s3 }
0x5e12   :  { %9430 = vrot.lane.b32.xlu0 %v9423_v27, %s11071_s12 }
0x5e82   :  { %v9417_v28 = vpop.permute.xlu1 %9416 }
0x5e83   :  { %v9419_v62 = vadd.f32 %v9417_v28, %v9380_v9 }
0x5e84   :  { %v9431_v3 = vpop.permute.xlu0 %9430 }
0x5e85   :  { %9425 = vrot.lane.b32.xlu1 %v9419_v62, %s11072_s9  ;;  %9434 = vrot.lane.b32.xlu0 %v9419_v62, %s11067_s28 }
0x5e89   :  { %9444 = vrot.lane.b32.xlu1 %v9419_v62, %s11068_s14 }
0x5ef7   :  { %v9426_v57 = vpop.permute.xlu1 %9425  ;;  %v9435_v33 = vpop.permute.xlu0 %9434 }
0x5ef8   :  { %v9428_v5 = vsub.f32 %v11887_v32, %v9426_v57  ;;  %v9437_v34 = vmul.f32 %v12090_v59, %v9435_v33 }
0x5efa   :  { %v9433_v54 = vsub.f32 %v9428_v5, %v9431_v3 }
0x5efb   :  { %v9445_v6 = vpop.permute.xlu1 %9444 }
0x5efc   :  { %v9438_v29 = vmul.f32 %v11053_v13, %v9433_v54  ;;  %v9447_v31 = vmul.f32 %v12090_v59, %v9445_v6 }
0x5efe   :  { %9449 = vrot.lane.b32.xlu0 %v9447_v31, %s11066_s8  ;;  %9440 = vrot.lane.b32.xlu1 %v9438_v29, %s11072_s9 }
0x5f02   :  { %9458 = vrot.lane.b32.xlu0 %v9447_v31, %s11070_s3 }
0x5f70   :  { %v9441_v44 = vpop.permute.xlu1 %9440  ;;  %v9450_v37 = vpop.permute.xlu0 %9449 }
0x5f71   :  { %v9443_v1 = vmul.f32 %v9441_v44, %v9437_v34 }
0x5f73   :  { %v9452_v7 = vsub.f32 %v9443_v1, %v9450_v37 }
0x5f74   :  { %v9459_v38 = vpop.permute.xlu0 %9458 }
0x5f75   :  { %9454 = vrot.lane.b32.xlu1 %v9452_v7, %s11070_s3  ;;  %v9461_v40 = vadd.f32 %v9459_v38, %v9423_v27 }
0x5f79   :  { %9313 = vrot.lane.b32.xlu1 %v12077_v42, %s11065_s1 }
0x5f7d   :  { %9468 = vrot.lane.b32.xlu1 %v9461_v40, %s11071_s12 }
0x5fe7   :  { %v9455_v19 = vpop.permute.xlu1 %9454 }
0x5fe8   :  { %v9457_v41 = vadd.f32 %v9455_v19, %v9419_v62 }
0x5fea   :  { %9463 = vrot.lane.b32.xlu0 %v9457_v41, %s11072_s9 }
0x5feb   :  { %v9314_v50 = vpop.permute.xlu1 %9313 }
0x5fec   :  { %9317 = vst.msk [vmem:[#allocation2 - $0x7] sm:$0x80] %vm9316_vm15, %v9314_v50 }
0x5fee   :  { %9472 = vrot.lane.b32.xlu0 %v9457_v41, %s11067_s28 }
0x5fef   :  { %v9469_v45 = vpop.permute.xlu1 %9468 }
0x5ff2   :  { %9482 = vrot.lane.b32.xlu0 %v9457_v41, %s11068_s14 }
0x5ff6   :  { %9491 = vrot.lane.b32.xlu0 %v12100_v30, %s11059_s30  ;;  %s11076_s30 = smov 125  }
0x5ffa   :  { %9504 = vrot.lane.b32.xlu0 %v9409_v17, %s11073_s17 }
0x605c   :  { %v9464_v42 = vpop.permute.xlu0 %9463 }
0x605d   :  { %v9466_v43 = vsub.f32 %v11887_v32, %v9464_v42 }
0x605f   :  { %v9471_v46 = vsub.f32 %v9466_v43, %v9469_v45 }
0x6060   :  { %v9473_v47 = vpop.permute.xlu0 %9472 }
0x6061   :  { %v9476_v48 = vmul.f32 %v11053_v13, %v9471_v46  ;;  %v9475_v32 = vmul.f32 %v12090_v59, %v9473_v47 }
0x6063   :  { %9478 = vrot.lane.b32.xlu1 %v9476_v48, %s11072_s9 }
0x6064   :  { %v9483_v49 = vpop.permute.xlu0 %9482 }
0x6065   :  { %v9485_v58 = vmul.f32 %v12090_v59, %v9483_v49 }
0x6067   :  { %9487 = vrot.lane.b32.xlu1 %v9485_v58, %s11066_s8 }
0x6068   :  { %v9492_v56 = vpop.permute.xlu0 %9491 }
0x606b   :  { %9494 = vrot.lane.b32.xlu1 %v9414_v24, %s11074_s4 }
0x606c   :  { %v9505_v60 = vpop.permute.xlu0 %9504 }
0x606f   :  { %9501 = vrot.lane.b32.xlu1 %v12093_v20, %s11075_s18 }
0x6073   :  { %9507 = vrot.lane.b32.xlu1 %v9447_v31, %s11076_s30 }
0x60d5   :  { %v9479_v51 = vpop.permute.xlu1 %9478 }
0x60d6   :  { %v9481_v52 = vmul.f32 %v9479_v51, %v9475_v32 }
0x60d9   :  { %v9488_v36 = vpop.permute.xlu1 %9487 }
0x60da   :  { %v9490_v55 = vsub.f32 %v9481_v52, %v9488_v36 }
0x60dc   :  { %9498 = vrot.lane.b32.xlu0 %v9490_v55, %s11075_s18 }
0x60dd   :  { %v9495_v26 = vpop.permute.xlu1 %9494 }
0x60de   :  { %v9514_v61 = vsel %vm9513_vm1, %v9492_v56, %v9495_v26 }
0x60df   :  { %v9515_v20 = vsel %vm7790_vm14, %v9514_v61, %v9455_v19 }
0x60e0   :  { %9510 = vrot.lane.b32.xlu0 %v9485_v58, %s11077_s19 }
0x60e1   :  { %v9502_v63 = vpop.permute.xlu1 %9501 }
0x60e5   :  { %v9508_v35 = vpop.permute.xlu1 %9507 }
0x614e   :  { %v9499_v0 = vpop.permute.xlu0 %9498 }
0x614f   :  { %v9517_v39 = vsel %vm9516_vm3, %v9515_v20, %v9499_v0 }
0x6150   :  { %v9518_v59 = vsel %vm50_vm0, %v9517_v39, %v9502_v63 }
0x6151   :  { %v9520_v30 = vsel %vm9519_vm4, %v9518_v59, %v9505_v60 }
0x6152   :  { %v9522_v2 = vsel %vm9521_vm5, %v9520_v30, %v9508_v35  ;;  %v9511_v4 = vpop.permute.xlu0 %9510 }
0x6153   :  { %v9524_v8 = vsel %vm9523_vm6, %v9522_v2, %v9511_v4 }
0x6154   :  { %v9525_v9 = vsel %vm132_vm2, %v9524_v8, 0.0 }
0x6155   :  { %9526 = vst [vmem:[%s12162_s13] sm:$0xff] %v9525_v9 }

</bundles_post_ra>
